<compile_context>
chip_gen: v7x
topology: tpu7x:2x2x1
jax: 0.10.0
libtpu: 0.0.40
codegen_flags: <defaults>
</compile_context>

<pallas_src>
import math
import numpy as np
import jax
import jax.numpy as jnp
from jax.experimental import pallas as pl
from jax.experimental.pallas import tpu as pltpu

# ---------------- small, module-consistent configuration ----------------
STATE_DIM = 2
DEPTH = 5
MAX_FREQ = 4
HIDDEN_DIM = 32
CODE_DIM = 64
NUM_FREQ = 2 * MAX_FREQ + 1          # 9 spherical-harmonic orders
NUM_LAYERS = DEPTH + 1               # number of spherical filters / out_linears
LN_EPS = 1e-5

B, H_SP, W_SP = 2, 8, 16             # batch, spatial h, w
P = H_SP * W_SP                      # pixels per batch element (128) == one lane tile
FPAD = 64                            # NUM_LAYERS*NUM_FREQ (=54) + ones row, padded to 64


# ---------------- host glue: real spherical harmonics ----------------
def _assoc_legendre(m, l, x):
    """P_l^m(x), m >= 0, with Condon-Shortley phase (scipy lpmv convention)."""
    pmm = np.ones_like(x)
    if m > 0:
        somx2 = np.sqrt(np.clip((1.0 - x) * (1.0 + x), 0.0, None))
        fact = 1.0
        for _ in range(m):
            pmm = -pmm * fact * somx2
            fact += 2.0
    if l == m:
        return pmm
    pmmp1 = x * (2 * m + 1) * pmm
    if l == m + 1:
        return pmmp1
    pll = pmmp1
    for ll in range(m + 2, l + 1):
        pll = (x * (2 * ll - 1) * pmmp1 - (ll + m - 1) * pmm) / (ll - m)
        pmm, pmmp1 = pmmp1, pll
    return pll


def _real_sph_harm(m, l, theta, phi):
    """Real spherical harmonic, identical to SphericalFilter.Yreal
    (theta = azimuth = x[...,0], phi = polar = x[...,1])."""
    mu = abs(m)
    norm = math.sqrt((2 * l + 1) / (4 * math.pi)
                     * math.factorial(l - mu) / math.factorial(l + mu))
    Plm = _assoc_legendre(mu, l, np.cos(phi))
    if m == 0:
        return norm * Plm
    c = math.sqrt(2.0) * ((-1.0) ** mu)
    if m > 0:
        return c * norm * Plm * np.cos(mu * theta)
    return c * norm * Plm * np.sin(mu * theta)


def compute_sph_features(x_np):
    """x_np: (B, h, w, 1, 2) -> (depth+1, B, h*w, 2*max_freq+1) float32."""
    theta = x_np[..., 0, 0]
    phi = x_np[..., 0, 1]
    feats = []
    for shift in range(NUM_LAYERS):
        ys = [_real_sph_harm(m, abs(m) + shift, theta, phi)
              for m in range(-MAX_FREQ, MAX_FREQ + 1)]
        feats.append(np.stack(ys, axis=-1).reshape(x_np.shape[0], -1, NUM_FREQ))
    return np.stack(feats, axis=0).astype(np.float32)


# ---------------- deterministic parameter init ----------------
def init_params(key):
    ks = jax.random.split(key, 8)

    def unif(k, shape, fan_in):
        bound = 1.0 / math.sqrt(fan_in)
        return jax.random.uniform(k, shape, jnp.float32, -bound, bound)

    return dict(
        w_ftr=unif(ks[0], (NUM_LAYERS, NUM_FREQ, HIDDEN_DIM), NUM_FREQ),
        b_ftr=unif(ks[1], (NUM_LAYERS, HIDDEN_DIM), NUM_FREQ),
        w_fwd=unif(ks[2], (DEPTH, HIDDEN_DIM, HIDDEN_DIM), HIDDEN_DIM),
        b_fwd=unif(ks[3], (DEPTH, HIDDEN_DIM), HIDDEN_DIM),
        w_code=unif(ks[4], (DEPTH, STATE_DIM, CODE_DIM, HIDDEN_DIM), CODE_DIM),
        b_code=unif(ks[5], (DEPTH, STATE_DIM, HIDDEN_DIM), CODE_DIM),
        gamma=jnp.ones((DEPTH, HIDDEN_DIM), jnp.float32),
        beta=jnp.zeros((DEPTH, HIDDEN_DIM), jnp.float32),
        w_out=unif(ks[6], (NUM_LAYERS, HIDDEN_DIM), HIDDEN_DIM),
        b_out=unif(ks[7], (NUM_LAYERS, 1), HIDDEN_DIM),
    )


# ---------------- Pallas kernel ----------------
def _sinr_kernel(ys_ref, amp_ref, wftr_ref, wfwd_ref, gb_ref, woutc_ref,
                 bsum_ref, out_ref, fall_ref):
    f32 = jnp.float32
    H = HIDDEN_DIM
    S = STATE_DIM

    # All (depth+1) spherical-filter linears fused into one lane-dense matmul:
    # (L1*H, FPAD) @ (FPAD, P) -> (L1*H, P). Biases folded in via the ones row.
    fall_ref[...] = jnp.dot(wftr_ref[...], ys_ref[0],
                            preferred_element_type=f32)

    # Layer 0: z = filter-0 output, broadcast over both states (stacked on sublanes).
    fl0 = fall_ref[0:H, :]                                   # (H, P)
    z = jnp.concatenate([fl0] * S, axis=0)                   # (S*H, P)
    acc = z * woutc_ref[0]                                   # wout-weighted accumulator

    for l in range(DEPTH):
        # Forward linear for both states at once (block-diagonal weight) plus the
        # hoisted (code-linear + forward-bias) column broadcast over pixels/lanes.
        zz = (jnp.dot(wfwd_ref[l], z, preferred_element_type=f32)
              + amp_ref[0, l])                               # (S*H, P)

        # LayerNorm over hidden (sublane groups of H) per state and pixel.
        zn_parts = []
        for s in range(S):
            zs = zz[s * H:(s + 1) * H, :]                    # (H, P)
            mu = jnp.mean(zs, axis=0, keepdims=True)
            var = jnp.mean((zs - mu) ** 2, axis=0, keepdims=True)
            zn_parts.append((zs - mu) * jax.lax.rsqrt(var + LN_EPS))
        zn = jnp.concatenate(zn_parts, axis=0)               # (S*H, P)
        zn = zn * gb_ref[l, :, 0:1] + gb_ref[l, :, 1:2]

        # Multiply by the layer-(l+1) filter output (shared across states).
        fl = fall_ref[(l + 1) * H:(l + 2) * H, :]            # (H, P)
        z = zn * jnp.concatenate([fl] * S, axis=0)

        # Accumulate the out_linears[l+1]-weighted contribution.
        acc = acc + z * woutc_ref[l + 1]

    # Per-state reduction over hidden + summed output biases; lane-dense store.
    o = jnp.concatenate(
        [jnp.sum(acc[s * H:(s + 1) * H, :], axis=0, keepdims=True)
         for s in range(S)], axis=0) + bsum_ref[...]         # (S, P)
    out_ref[0] = o


def sinr_v13_forward(ys, a, params):
    """ys: (depth+1, B, P, F) spherical-harmonic features; a: (B, S, C).
    Returns (B, P, S)."""
    L1, Bn, Pn, F = ys.shape
    S, C = a.shape[1], a.shape[2]
    H = HIDDEN_DIM
    SH = S * H

    # ---- host-side packing (layout plumbing + pixel-independent matmuls) ----
    # Pixels-last features with a bias row of ones, zero-padded to FPAD rows.
    ysp = jnp.transpose(ys, (1, 0, 3, 2)).reshape(Bn, L1 * F, Pn)
    ysp = jnp.concatenate(
        [ysp, jnp.ones((Bn, 1, Pn), ys.dtype),
         jnp.zeros((Bn, FPAD - L1 * F - 1, Pn), ys.dtype)], axis=1)   # (B, FPAD, P)

    # Block-diagonal fused filter weight, biases folded into column L1*F.
    wftr_bd = jnp.zeros((L1 * H, FPAD), jnp.float32)
    for l in range(L1):
        wftr_bd = wftr_bd.at[l * H:(l + 1) * H, l * F:(l + 1) * F].set(
            params['w_ftr'][l].T)
        wftr_bd = wftr_bd.at[l * H:(l + 1) * H, L1 * F].set(params['b_ftr'][l])

    # Per-layer forward weights, block-diagonal over states, transposed for (H, P).
    wfwd_bd = jnp.zeros((DEPTH, SH, SH), jnp.float32)
    for l in range(DEPTH):
        wT = params['w_fwd'][l].T
        for s in range(S):
            wfwd_bd = wfwd_bd.at[l, s * H:(s + 1) * H, s * H:(s + 1) * H].set(wT)

    # Code-linear ("amplitude shift") + forward bias, hoisted out of the kernel:
    # pixel-independent, so it is computed once per batch element here.
    amp = (jnp.einsum('bsc,lsch->blsh', a, params['w_code'])
           + params['b_code'][None] + params['b_fwd'][None, :, None, :])
    amp_col = amp.reshape(Bn, DEPTH, SH, 1)                  # (B, depth, S*H, 1)

    gb = jnp.stack([jnp.tile(params['gamma'], (1, S)),
                    jnp.tile(params['beta'], (1, S))], axis=-1)     # (depth, S*H, 2)
    woutc = jnp.tile(params['w_out'], (1, S))[..., None]            # (L1, S*H, 1)
    bsum = jnp.sum(params['b_out']).reshape(1, 1)                   # (1, 1)

    def full_spec(arr):
        nd = arr.ndim
        return pl.BlockSpec(tuple(arr.shape), lambda b, _nd=nd: (0,) * _nd)

    out = pl.pallas_call(
        _sinr_kernel,
        out_shape=jax.ShapeDtypeStruct((Bn, S, Pn), jnp.float32),
        grid_spec=pltpu.PrefetchScalarGridSpec(
            num_scalar_prefetch=0,
            grid=(Bn,),
            in_specs=[
                pl.BlockSpec((1, FPAD, Pn), lambda b: (b, 0, 0)),
                pl.BlockSpec((1, DEPTH, SH, 1), lambda b: (b, 0, 0, 0)),
                full_spec(wftr_bd), full_spec(wfwd_bd),
                full_spec(gb), full_spec(woutc), full_spec(bsum),
            ],
            out_specs=pl.BlockSpec((1, S, Pn), lambda b: (b, 0, 0)),
            scratch_shapes=[pltpu.VMEM((L1 * H, Pn), jnp.float32)],
        ),
        compiler_params=pltpu.CompilerParams(
            dimension_semantics=("parallel",)),
    )(ysp, amp_col, wftr_bd, wfwd_bd, gb, woutc, bsum)

    return jnp.transpose(out, (0, 2, 1))                     # (B, P, S)


# ---------------- pure-JAX reference (for verification) ----------------
def sinr_v13_reference(ys, a, params):
    z = jnp.einsum('bpf,fh->bph', ys[0], params['w_ftr'][0]) + params['b_ftr'][0]
    z = z[:, :, None, :]                                               # (B,P,1,H)
    out = (jnp.einsum('bpsh,h->bps', z, params['w_out'][0])[..., None]
           + params['b_out'][0])                                       # (B,P,1,1)
    for l in range(DEPTH):
        zf = jnp.einsum('bpsh,hk->bpsk', z, params['w_fwd'][l]) + params['b_fwd'][l]
        amp = jnp.einsum('bsc,sch->bsh', a, params['w_code'][l]) + params['b_code'][l]
        zz = zf + amp[:, None, :, :]
        mu = zz.mean(-1, keepdims=True)
        var = ((zz - mu) ** 2).mean(-1, keepdims=True)
        zn = (zz - mu) / jnp.sqrt(var + LN_EPS) * params['gamma'][l] + params['beta'][l]
        fl = (jnp.einsum('bpf,fh->bph', ys[l + 1], params['w_ftr'][l + 1])
              + params['b_ftr'][l + 1])
        z = zn * fl[:, :, None, :]
        o = (jnp.einsum('bpsh,h->bps', z, params['w_out'][l + 1])[..., None]
             + params['b_out'][l + 1])
        out = out + o
    return out[..., 0]                                                  # (B,P,S)


if __name__ == "__main__":
    key = jax.random.PRNGKey(0)
    k_x, k_a, k_p = jax.random.split(key, 3)

    # coord_latlon x: (..., h, w, 1, 2) with azimuth in [0,2pi), polar in [0,pi]
    theta = jax.random.uniform(k_x, (B, H_SP, W_SP, 1), jnp.float32,
                               0.0, 2.0 * math.pi)
    phi = jax.random.uniform(jax.random.fold_in(k_x, 1), (B, H_SP, W_SP, 1),
                             jnp.float32, 0.0, math.pi)
    x = jnp.stack([theta, phi], axis=-1)                   # (B, h, w, 1, 2)

    # latent code a: (..., 1, 1, state_dim, code_dim)
    a = jax.random.normal(k_a, (B, 1, 1, STATE_DIM, CODE_DIM), jnp.float32)

    params = init_params(k_p)

    # host glue: spherical-harmonic features + flatten latent code
    ys = jnp.asarray(compute_sph_features(np.asarray(x)))  # (depth+1, B, P, F)
    a_flat = a.reshape(B, STATE_DIM, CODE_DIM)

    out = sinr_v13_forward(ys, a_flat, params)              # (B, P, S)
    out = jax.block_until_ready(out)
    out_bhws = out.reshape(B, H_SP, W_SP, STATE_DIM)        # == torch out[..., 0]

    ref = jax.block_until_ready(sinr_v13_reference(ys, a_flat, params))
    # Tolerance accounts for TPU default (reduced-precision) matmul paths that may
    # differ between the MXU kernel and the XLA reference einsums.
    np.testing.assert_allclose(np.asarray(out), np.asarray(ref),
                               rtol=2e-2, atol=2e-2)
    assert out_bhws.shape == (B, H_SP, W_SP, STATE_DIM)
    print("KERNEL_OK")
</pallas_src>

<mosaic_0001>
module attributes {stable_mosaic.version = 11 : i64} {
  func.func @_sinr_kernel(%arg0: i32, %arg1: memref<1x64x128xf32, #tpu.memory_space<vmem>>, %arg2: memref<1x5x64x1xf32, #tpu.memory_space<vmem>>, %arg3: memref<192x64xf32, #tpu.memory_space<vmem>>, %arg4: memref<5x64x64xf32, #tpu.memory_space<vmem>>, %arg5: memref<5x64x2xf32, #tpu.memory_space<vmem>>, %arg6: memref<6x64x1xf32, #tpu.memory_space<vmem>>, %arg7: memref<1x1xf32, #tpu.memory_space<vmem>>, %arg8: memref<1x2x128xf32, #tpu.memory_space<vmem>>, %arg9: memref<192x128xf32, #tpu.memory_space<vmem>>) attributes {dimension_semantics = [#tpu.dimension_semantics<parallel>], iteration_bounds = array<i64: 2>, scalar_prefetch = 0 : i64, scratch_operands = 1 : i64, tpu.core_type = #tpu.core_type<tc>, window_params = [{transform_indices = @transform_0, window_bounds = array<i64: 1, 64, 128>}, {transform_indices = @transform_1, window_bounds = array<i64: 1, 5, 64, 1>}, {pipeline_mode = #tpu.pipeline_mode<synchronous>, transform_indices = @transform_2, window_bounds = array<i64: 192, 64>}, {pipeline_mode = #tpu.pipeline_mode<synchronous>, transform_indices = @transform_3, window_bounds = array<i64: 5, 64, 64>}, {pipeline_mode = #tpu.pipeline_mode<synchronous>, transform_indices = @transform_4, window_bounds = array<i64: 5, 64, 2>}, {pipeline_mode = #tpu.pipeline_mode<synchronous>, transform_indices = @transform_5, window_bounds = array<i64: 6, 64, 1>}, {pipeline_mode = #tpu.pipeline_mode<synchronous>, transform_indices = @transform_6, window_bounds = array<i64: 1, 1>}, {transform_indices = @transform_7, window_bounds = array<i64: 1, 2, 128>}]} {
    %c0 = arith.constant 0 : index
    %c0_0 = arith.constant 0 : index
    %0 = vector.load %arg3[%c0, %c0_0] : memref<192x64xf32, #tpu.memory_space<vmem>>, vector<192x64xf32>
    %c0_1 = arith.constant 0 : index
    %c0_2 = arith.constant 0 : index
    %c0_3 = arith.constant 0 : index
    %1 = vector.load %arg1[%c0_1, %c0_2, %c0_3] : memref<1x64x128xf32, #tpu.memory_space<vmem>>, vector<1x64x128xf32>
    %2 = vector.shape_cast %1 : vector<1x64x128xf32> to vector<64x128xf32>
    %cst = arith.constant dense<0.000000e+00> : vector<192x128xf32>
    %3 = tpu.matmul %0, %2, %cst {dimension_numbers = #tpu.dot_dimension_numbers<[1], [0], [0], [1], [0, 0, 1, 1], [], []>} : vector<192x64xf32>, vector<64x128xf32>, vector<192x128xf32> -> vector<192x128xf32>
    %c0_4 = arith.constant 0 : index
    %c0_5 = arith.constant 0 : index
    %4 = vector.load %arg9[%c0_4, %c0_5] : memref<192x128xf32, #tpu.memory_space<vmem>>, vector<192x128xf32>
    tpu.vector_store %arg9[%c0_4, %c0_5], %3 {strides = array<i32>} : memref<192x128xf32, #tpu.memory_space<vmem>>, vector<192x128xf32>,
    %c0_6 = arith.constant 0 : index
    %c0_7 = arith.constant 0 : index
    %5 = vector.load %arg9[%c0_6, %c0_7] : memref<192x128xf32, #tpu.memory_space<vmem>>, vector<32x128xf32>
    %6 = tpu.concatenate %5, %5 in 0 : vector<32x128xf32>, vector<32x128xf32> -> vector<64x128xf32>
    %c0_8 = arith.constant 0 : index
    %c0_9 = arith.constant 0 : index
    %c0_10 = arith.constant 0 : index
    %7 = vector.load %arg6[%c0_8, %c0_9, %c0_10] : memref<6x64x1xf32, #tpu.memory_space<vmem>>, vector<1x64x1xf32>
    %8 = vector.shape_cast %7 : vector<1x64x1xf32> to vector<64x1xf32>
    %9 = vector.broadcast %8 : vector<64x1xf32> to vector<64x128xf32>
    %10 = arith.mulf %6, %9 : vector<64x128xf32>
    %c0_11 = arith.constant 0 : index
    %c0_12 = arith.constant 0 : index
    %c0_13 = arith.constant 0 : index
    %11 = vector.load %arg4[%c0_11, %c0_12, %c0_13] : memref<5x64x64xf32, #tpu.memory_space<vmem>>, vector<1x64x64xf32>
    %12 = vector.shape_cast %11 : vector<1x64x64xf32> to vector<64x64xf32>
    %cst_14 = arith.constant dense<0.000000e+00> : vector<64x128xf32>
    %13 = tpu.matmul %12, %6, %cst_14 {dimension_numbers = #tpu.dot_dimension_numbers<[1], [0], [0], [1], [0, 0, 1, 1], [], []>} : vector<64x64xf32>, vector<64x128xf32>, vector<64x128xf32> -> vector<64x128xf32>
    %c0_15 = arith.constant 0 : index
    %c0_16 = arith.constant 0 : index
    %c0_17 = arith.constant 0 : index
    %c0_18 = arith.constant 0 : index
    %14 = vector.load %arg2[%c0_15, %c0_16, %c0_17, %c0_18] : memref<1x5x64x1xf32, #tpu.memory_space<vmem>>, vector<1x1x64x1xf32>
    %15 = vector.shape_cast %14 : vector<1x1x64x1xf32> to vector<64x1xf32>
    %16 = vector.broadcast %15 : vector<64x1xf32> to vector<64x128xf32>
    %17 = arith.addf %13, %16 : vector<64x128xf32>
    %18 = vector.extract_strided_slice %17 {offsets = [0, 0], sizes = [32, 128], strides = [1, 1]} : vector<64x128xf32> to vector<32x128xf32>
    %cst_19 = arith.constant dense<0.000000e+00> : vector<128xf32>
    %19 = vector.multi_reduction <add>, %18, %cst_19 [0] : vector<32x128xf32> to vector<128xf32>
    %20 = vector.shape_cast %19 : vector<128xf32> to vector<1x128xf32>
    %cst_20 = arith.constant 3.200000e+01 : f32
    %21 = vector.broadcast %cst_20 : f32 to vector<1x128xf32>
    %22 = arith.divf %20, %21 : vector<1x128xf32>
    %23 = vector.broadcast %22 : vector<1x128xf32> to vector<32x128xf32>
    %24 = arith.subf %18, %23 : vector<32x128xf32>
    %25 = arith.mulf %24, %24 : vector<32x128xf32>
    %cst_21 = arith.constant dense<0.000000e+00> : vector<128xf32>
    %26 = vector.multi_reduction <add>, %25, %cst_21 [0] : vector<32x128xf32> to vector<128xf32>
    %27 = vector.shape_cast %26 : vector<128xf32> to vector<1x128xf32>
    %cst_22 = arith.constant 3.200000e+01 : f32
    %28 = vector.broadcast %cst_22 : f32 to vector<1x128xf32>
    %29 = arith.divf %27, %28 : vector<1x128xf32>
    %30 = vector.broadcast %22 : vector<1x128xf32> to vector<32x128xf32>
    %31 = arith.subf %18, %30 : vector<32x128xf32>
    %cst_23 = arith.constant 9.99999974E-6 : f32
    %32 = vector.broadcast %cst_23 : f32 to vector<1x128xf32>
    %33 = arith.addf %29, %32 : vector<1x128xf32>
    %34 = math.rsqrt %33 : vector<1x128xf32>
    %35 = vector.broadcast %34 : vector<1x128xf32> to vector<32x128xf32>
    %36 = arith.mulf %31, %35 : vector<32x128xf32>
    %37 = vector.extract_strided_slice %17 {offsets = [32, 0], sizes = [32, 128], strides = [1, 1]} : vector<64x128xf32> to vector<32x128xf32>
    %cst_24 = arith.constant dense<0.000000e+00> : vector<128xf32>
    %38 = vector.multi_reduction <add>, %37, %cst_24 [0] : vector<32x128xf32> to vector<128xf32>
    %39 = vector.shape_cast %38 : vector<128xf32> to vector<1x128xf32>
    %cst_25 = arith.constant 3.200000e+01 : f32
    %40 = vector.broadcast %cst_25 : f32 to vector<1x128xf32>
    %41 = arith.divf %39, %40 : vector<1x128xf32>
    %42 = vector.broadcast %41 : vector<1x128xf32> to vector<32x128xf32>
    %43 = arith.subf %37, %42 : vector<32x128xf32>
    %44 = arith.mulf %43, %43 : vector<32x128xf32>
    %cst_26 = arith.constant dense<0.000000e+00> : vector<128xf32>
    %45 = vector.multi_reduction <add>, %44, %cst_26 [0] : vector<32x128xf32> to vector<128xf32>
    %46 = vector.shape_cast %45 : vector<128xf32> to vector<1x128xf32>
    %cst_27 = arith.constant 3.200000e+01 : f32
    %47 = vector.broadcast %cst_27 : f32 to vector<1x128xf32>
    %48 = arith.divf %46, %47 : vector<1x128xf32>
    %49 = vector.broadcast %41 : vector<1x128xf32> to vector<32x128xf32>
    %50 = arith.subf %37, %49 : vector<32x128xf32>
    %cst_28 = arith.constant 9.99999974E-6 : f32
    %51 = vector.broadcast %cst_28 : f32 to vector<1x128xf32>
    %52 = arith.addf %48, %51 : vector<1x128xf32>
    %53 = math.rsqrt %52 : vector<1x128xf32>
    %54 = vector.broadcast %53 : vector<1x128xf32> to vector<32x128xf32>
    %55 = arith.mulf %50, %54 : vector<32x128xf32>
    %56 = tpu.concatenate %36, %55 in 0 : vector<32x128xf32>, vector<32x128xf32> -> vector<64x128xf32>
    %c0_29 = arith.constant 0 : index
    %c0_30 = arith.constant 0 : index
    %c0_31 = arith.constant 0 : index
    %57 = vector.load %arg5[%c0_29, %c0_30, %c0_31] : memref<5x64x2xf32, #tpu.memory_space<vmem>>, vector<1x64x1xf32>
    %58 = vector.shape_cast %57 : vector<1x64x1xf32> to vector<64x1xf32>
    %59 = vector.broadcast %58 : vector<64x1xf32> to vector<64x128xf32>
    %60 = arith.mulf %56, %59 : vector<64x128xf32>
    %c0_32 = arith.constant 0 : index
    %c0_33 = arith.constant 0 : index
    %c1 = arith.constant 1 : index
    %61 = vector.load %arg5[%c0_32, %c0_33, %c1] : memref<5x64x2xf32, #tpu.memory_space<vmem>>, vector<1x64x1xf32>
    %62 = vector.shape_cast %61 : vector<1x64x1xf32> to vector<64x1xf32>
    %63 = vector.broadcast %62 : vector<64x1xf32> to vector<64x128xf32>
    %64 = arith.addf %60, %63 : vector<64x128xf32>
    %c32 = arith.constant 32 : index
    %c0_34 = arith.constant 0 : index
    %65 = vector.load %arg9[%c32, %c0_34] : memref<192x128xf32, #tpu.memory_space<vmem>>, vector<32x128xf32>
    %66 = tpu.concatenate %65, %65 in 0 : vector<32x128xf32>, vector<32x128xf32> -> vector<64x128xf32>
    %67 = arith.mulf %64, %66 : vector<64x128xf32>
    %c1_35 = arith.constant 1 : index
    %c0_36 = arith.constant 0 : index
    %c0_37 = arith.constant 0 : index
    %68 = vector.load %arg6[%c1_35, %c0_36, %c0_37] : memref<6x64x1xf32, #tpu.memory_space<vmem>>, vector<1x64x1xf32>
    %69 = vector.shape_cast %68 : vector<1x64x1xf32> to vector<64x1xf32>
    %70 = vector.broadcast %69 : vector<64x1xf32> to vector<64x128xf32>
    %71 = arith.mulf %67, %70 : vector<64x128xf32>
    %72 = arith.addf %10, %71 : vector<64x128xf32>
    %c1_38 = arith.constant 1 : index
    %c0_39 = arith.constant 0 : index
    %c0_40 = arith.constant 0 : index
    %73 = vector.load %arg4[%c1_38, %c0_39, %c0_40] : memref<5x64x64xf32, #tpu.memory_space<vmem>>, vector<1x64x64xf32>
    %74 = vector.shape_cast %73 : vector<1x64x64xf32> to vector<64x64xf32>
    %cst_41 = arith.constant dense<0.000000e+00> : vector<64x128xf32>
    %75 = tpu.matmul %74, %67, %cst_41 {dimension_numbers = #tpu.dot_dimension_numbers<[1], [0], [0], [1], [0, 0, 1, 1], [], []>} : vector<64x64xf32>, vector<64x128xf32>, vector<64x128xf32> -> vector<64x128xf32>
    %c0_42 = arith.constant 0 : index
    %c1_43 = arith.constant 1 : index
    %c0_44 = arith.constant 0 : index
    %c0_45 = arith.constant 0 : index
    %76 = vector.load %arg2[%c0_42, %c1_43, %c0_44, %c0_45] : memref<1x5x64x1xf32, #tpu.memory_space<vmem>>, vector<1x1x64x1xf32>
    %77 = vector.shape_cast %76 : vector<1x1x64x1xf32> to vector<64x1xf32>
    %78 = vector.broadcast %77 : vector<64x1xf32> to vector<64x128xf32>
    %79 = arith.addf %75, %78 : vector<64x128xf32>
    %80 = vector.extract_strided_slice %79 {offsets = [0, 0], sizes = [32, 128], strides = [1, 1]} : vector<64x128xf32> to vector<32x128xf32>
    %cst_46 = arith.constant dense<0.000000e+00> : vector<128xf32>
    %81 = vector.multi_reduction <add>, %80, %cst_46 [0] : vector<32x128xf32> to vector<128xf32>
    %82 = vector.shape_cast %81 : vector<128xf32> to vector<1x128xf32>
    %cst_47 = arith.constant 3.200000e+01 : f32
    %83 = vector.broadcast %cst_47 : f32 to vector<1x128xf32>
    %84 = arith.divf %82, %83 : vector<1x128xf32>
    %85 = vector.broadcast %84 : vector<1x128xf32> to vector<32x128xf32>
    %86 = arith.subf %80, %85 : vector<32x128xf32>
    %87 = arith.mulf %86, %86 : vector<32x128xf32>
    %cst_48 = arith.constant dense<0.000000e+00> : vector<128xf32>
    %88 = vector.multi_reduction <add>, %87, %cst_48 [0] : vector<32x128xf32> to vector<128xf32>
    %89 = vector.shape_cast %88 : vector<128xf32> to vector<1x128xf32>
    %cst_49 = arith.constant 3.200000e+01 : f32
    %90 = vector.broadcast %cst_49 : f32 to vector<1x128xf32>
    %91 = arith.divf %89, %90 : vector<1x128xf32>
    %92 = vector.broadcast %84 : vector<1x128xf32> to vector<32x128xf32>
    %93 = arith.subf %80, %92 : vector<32x128xf32>
    %cst_50 = arith.constant 9.99999974E-6 : f32
    %94 = vector.broadcast %cst_50 : f32 to vector<1x128xf32>
    %95 = arith.addf %91, %94 : vector<1x128xf32>
    %96 = math.rsqrt %95 : vector<1x128xf32>
    %97 = vector.broadcast %96 : vector<1x128xf32> to vector<32x128xf32>
    %98 = arith.mulf %93, %97 : vector<32x128xf32>
    %99 = vector.extract_strided_slice %79 {offsets = [32, 0], sizes = [32, 128], strides = [1, 1]} : vector<64x128xf32> to vector<32x128xf32>
    %cst_51 = arith.constant dense<0.000000e+00> : vector<128xf32>
    %100 = vector.multi_reduction <add>, %99, %cst_51 [0] : vector<32x128xf32> to vector<128xf32>
    %101 = vector.shape_cast %100 : vector<128xf32> to vector<1x128xf32>
    %cst_52 = arith.constant 3.200000e+01 : f32
    %102 = vector.broadcast %cst_52 : f32 to vector<1x128xf32>
    %103 = arith.divf %101, %102 : vector<1x128xf32>
    %104 = vector.broadcast %103 : vector<1x128xf32> to vector<32x128xf32>
    %105 = arith.subf %99, %104 : vector<32x128xf32>
    %106 = arith.mulf %105, %105 : vector<32x128xf32>
    %cst_53 = arith.constant dense<0.000000e+00> : vector<128xf32>
    %107 = vector.multi_reduction <add>, %106, %cst_53 [0] : vector<32x128xf32> to vector<128xf32>
    %108 = vector.shape_cast %107 : vector<128xf32> to vector<1x128xf32>
    %cst_54 = arith.constant 3.200000e+01 : f32
    %109 = vector.broadcast %cst_54 : f32 to vector<1x128xf32>
    %110 = arith.divf %108, %109 : vector<1x128xf32>
    %111 = vector.broadcast %103 : vector<1x128xf32> to vector<32x128xf32>
    %112 = arith.subf %99, %111 : vector<32x128xf32>
    %cst_55 = arith.constant 9.99999974E-6 : f32
    %113 = vector.broadcast %cst_55 : f32 to vector<1x128xf32>
    %114 = arith.addf %110, %113 : vector<1x128xf32>
    %115 = math.rsqrt %114 : vector<1x128xf32>
    %116 = vector.broadcast %115 : vector<1x128xf32> to vector<32x128xf32>
    %117 = arith.mulf %112, %116 : vector<32x128xf32>
    %118 = tpu.concatenate %98, %117 in 0 : vector<32x128xf32>, vector<32x128xf32> -> vector<64x128xf32>
    %c1_56 = arith.constant 1 : index
    %c0_57 = arith.constant 0 : index
    %c0_58 = arith.constant 0 : index
    %119 = vector.load %arg5[%c1_56, %c0_57, %c0_58] : memref<5x64x2xf32, #tpu.memory_space<vmem>>, vector<1x64x1xf32>
    %120 = vector.shape_cast %119 : vector<1x64x1xf32> to vector<64x1xf32>
    %121 = vector.broadcast %120 : vector<64x1xf32> to vector<64x128xf32>
    %122 = arith.mulf %118, %121 : vector<64x128xf32>
    %c1_59 = arith.constant 1 : index
    %c0_60 = arith.constant 0 : index
    %c1_61 = arith.constant 1 : index
    %123 = vector.load %arg5[%c1_59, %c0_60, %c1_61] : memref<5x64x2xf32, #tpu.memory_space<vmem>>, vector<1x64x1xf32>
    %124 = vector.shape_cast %123 : vector<1x64x1xf32> to vector<64x1xf32>
    %125 = vector.broadcast %124 : vector<64x1xf32> to vector<64x128xf32>
    %126 = arith.addf %122, %125 : vector<64x128xf32>
    %c64 = arith.constant 64 : index
    %c0_62 = arith.constant 0 : index
    %127 = vector.load %arg9[%c64, %c0_62] : memref<192x128xf32, #tpu.memory_space<vmem>>, vector<32x128xf32>
    %128 = tpu.concatenate %127, %127 in 0 : vector<32x128xf32>, vector<32x128xf32> -> vector<64x128xf32>
    %129 = arith.mulf %126, %128 : vector<64x128xf32>
    %c2 = arith.constant 2 : index
    %c0_63 = arith.constant 0 : index
    %c0_64 = arith.constant 0 : index
    %130 = vector.load %arg6[%c2, %c0_63, %c0_64] : memref<6x64x1xf32, #tpu.memory_space<vmem>>, vector<1x64x1xf32>
    %131 = vector.shape_cast %130 : vector<1x64x1xf32> to vector<64x1xf32>
    %132 = vector.broadcast %131 : vector<64x1xf32> to vector<64x128xf32>
    %133 = arith.mulf %129, %132 : vector<64x128xf32>
    %134 = arith.addf %72, %133 : vector<64x128xf32>
    %c2_65 = arith.constant 2 : index
    %c0_66 = arith.constant 0 : index
    %c0_67 = arith.constant 0 : index
    %135 = vector.load %arg4[%c2_65, %c0_66, %c0_67] : memref<5x64x64xf32, #tpu.memory_space<vmem>>, vector<1x64x64xf32>
    %136 = vector.shape_cast %135 : vector<1x64x64xf32> to vector<64x64xf32>
    %cst_68 = arith.constant dense<0.000000e+00> : vector<64x128xf32>
    %137 = tpu.matmul %136, %129, %cst_68 {dimension_numbers = #tpu.dot_dimension_numbers<[1], [0], [0], [1], [0, 0, 1, 1], [], []>} : vector<64x64xf32>, vector<64x128xf32>, vector<64x128xf32> -> vector<64x128xf32>
    %c0_69 = arith.constant 0 : index
    %c2_70 = arith.constant 2 : index
    %c0_71 = arith.constant 0 : index
    %c0_72 = arith.constant 0 : index
    %138 = vector.load %arg2[%c0_69, %c2_70, %c0_71, %c0_72] : memref<1x5x64x1xf32, #tpu.memory_space<vmem>>, vector<1x1x64x1xf32>
    %139 = vector.shape_cast %138 : vector<1x1x64x1xf32> to vector<64x1xf32>
    %140 = vector.broadcast %139 : vector<64x1xf32> to vector<64x128xf32>
    %141 = arith.addf %137, %140 : vector<64x128xf32>
    %142 = vector.extract_strided_slice %141 {offsets = [0, 0], sizes = [32, 128], strides = [1, 1]} : vector<64x128xf32> to vector<32x128xf32>
    %cst_73 = arith.constant dense<0.000000e+00> : vector<128xf32>
    %143 = vector.multi_reduction <add>, %142, %cst_73 [0] : vector<32x128xf32> to vector<128xf32>
    %144 = vector.shape_cast %143 : vector<128xf32> to vector<1x128xf32>
    %cst_74 = arith.constant 3.200000e+01 : f32
    %145 = vector.broadcast %cst_74 : f32 to vector<1x128xf32>
    %146 = arith.divf %144, %145 : vector<1x128xf32>
    %147 = vector.broadcast %146 : vector<1x128xf32> to vector<32x128xf32>
    %148 = arith.subf %142, %147 : vector<32x128xf32>
    %149 = arith.mulf %148, %148 : vector<32x128xf32>
    %cst_75 = arith.constant dense<0.000000e+00> : vector<128xf32>
    %150 = vector.multi_reduction <add>, %149, %cst_75 [0] : vector<32x128xf32> to vector<128xf32>
    %151 = vector.shape_cast %150 : vector<128xf32> to vector<1x128xf32>
    %cst_76 = arith.constant 3.200000e+01 : f32
    %152 = vector.broadcast %cst_76 : f32 to vector<1x128xf32>
    %153 = arith.divf %151, %152 : vector<1x128xf32>
    %154 = vector.broadcast %146 : vector<1x128xf32> to vector<32x128xf32>
    %155 = arith.subf %142, %154 : vector<32x128xf32>
    %cst_77 = arith.constant 9.99999974E-6 : f32
    %156 = vector.broadcast %cst_77 : f32 to vector<1x128xf32>
    %157 = arith.addf %153, %156 : vector<1x128xf32>
    %158 = math.rsqrt %157 : vector<1x128xf32>
    %159 = vector.broadcast %158 : vector<1x128xf32> to vector<32x128xf32>
    %160 = arith.mulf %155, %159 : vector<32x128xf32>
    %161 = vector.extract_strided_slice %141 {offsets = [32, 0], sizes = [32, 128], strides = [1, 1]} : vector<64x128xf32> to vector<32x128xf32>
    %cst_78 = arith.constant dense<0.000000e+00> : vector<128xf32>
    %162 = vector.multi_reduction <add>, %161, %cst_78 [0] : vector<32x128xf32> to vector<128xf32>
    %163 = vector.shape_cast %162 : vector<128xf32> to vector<1x128xf32>
    %cst_79 = arith.constant 3.200000e+01 : f32
    %164 = vector.broadcast %cst_79 : f32 to vector<1x128xf32>
    %165 = arith.divf %163, %164 : vector<1x128xf32>
    %166 = vector.broadcast %165 : vector<1x128xf32> to vector<32x128xf32>
    %167 = arith.subf %161, %166 : vector<32x128xf32>
    %168 = arith.mulf %167, %167 : vector<32x128xf32>
    %cst_80 = arith.constant dense<0.000000e+00> : vector<128xf32>
    %169 = vector.multi_reduction <add>, %168, %cst_80 [0] : vector<32x128xf32> to vector<128xf32>
    %170 = vector.shape_cast %169 : vector<128xf32> to vector<1x128xf32>
    %cst_81 = arith.constant 3.200000e+01 : f32
    %171 = vector.broadcast %cst_81 : f32 to vector<1x128xf32>
    %172 = arith.divf %170, %171 : vector<1x128xf32>
    %173 = vector.broadcast %165 : vector<1x128xf32> to vector<32x128xf32>
    %174 = arith.subf %161, %173 : vector<32x128xf32>
    %cst_82 = arith.constant 9.99999974E-6 : f32
    %175 = vector.broadcast %cst_82 : f32 to vector<1x128xf32>
    %176 = arith.addf %172, %175 : vector<1x128xf32>
    %177 = math.rsqrt %176 : vector<1x128xf32>
    %178 = vector.broadcast %177 : vector<1x128xf32> to vector<32x128xf32>
    %179 = arith.mulf %174, %178 : vector<32x128xf32>
    %180 = tpu.concatenate %160, %179 in 0 : vector<32x128xf32>, vector<32x128xf32> -> vector<64x128xf32>
    %c2_83 = arith.constant 2 : index
    %c0_84 = arith.constant 0 : index
    %c0_85 = arith.constant 0 : index
    %181 = vector.load %arg5[%c2_83, %c0_84, %c0_85] : memref<5x64x2xf32, #tpu.memory_space<vmem>>, vector<1x64x1xf32>
    %182 = vector.shape_cast %181 : vector<1x64x1xf32> to vector<64x1xf32>
    %183 = vector.broadcast %182 : vector<64x1xf32> to vector<64x128xf32>
    %184 = arith.mulf %180, %183 : vector<64x128xf32>
    %c2_86 = arith.constant 2 : index
    %c0_87 = arith.constant 0 : index
    %c1_88 = arith.constant 1 : index
    %185 = vector.load %arg5[%c2_86, %c0_87, %c1_88] : memref<5x64x2xf32, #tpu.memory_space<vmem>>, vector<1x64x1xf32>
    %186 = vector.shape_cast %185 : vector<1x64x1xf32> to vector<64x1xf32>
    %187 = vector.broadcast %186 : vector<64x1xf32> to vector<64x128xf32>
    %188 = arith.addf %184, %187 : vector<64x128xf32>
    %c96 = arith.constant 96 : index
    %c0_89 = arith.constant 0 : index
    %189 = vector.load %arg9[%c96, %c0_89] : memref<192x128xf32, #tpu.memory_space<vmem>>, vector<32x128xf32>
    %190 = tpu.concatenate %189, %189 in 0 : vector<32x128xf32>, vector<32x128xf32> -> vector<64x128xf32>
    %191 = arith.mulf %188, %190 : vector<64x128xf32>
    %c3 = arith.constant 3 : index
    %c0_90 = arith.constant 0 : index
    %c0_91 = arith.constant 0 : index
    %192 = vector.load %arg6[%c3, %c0_90, %c0_91] : memref<6x64x1xf32, #tpu.memory_space<vmem>>, vector<1x64x1xf32>
    %193 = vector.shape_cast %192 : vector<1x64x1xf32> to vector<64x1xf32>
    %194 = vector.broadcast %193 : vector<64x1xf32> to vector<64x128xf32>
    %195 = arith.mulf %191, %194 : vector<64x128xf32>
    %196 = arith.addf %134, %195 : vector<64x128xf32>
    %c3_92 = arith.constant 3 : index
    %c0_93 = arith.constant 0 : index
    %c0_94 = arith.constant 0 : index
    %197 = vector.load %arg4[%c3_92, %c0_93, %c0_94] : memref<5x64x64xf32, #tpu.memory_space<vmem>>, vector<1x64x64xf32>
    %198 = vector.shape_cast %197 : vector<1x64x64xf32> to vector<64x64xf32>
    %cst_95 = arith.constant dense<0.000000e+00> : vector<64x128xf32>
    %199 = tpu.matmul %198, %191, %cst_95 {dimension_numbers = #tpu.dot_dimension_numbers<[1], [0], [0], [1], [0, 0, 1, 1], [], []>} : vector<64x64xf32>, vector<64x128xf32>, vector<64x128xf32> -> vector<64x128xf32>
    %c0_96 = arith.constant 0 : index
    %c3_97 = arith.constant 3 : index
    %c0_98 = arith.constant 0 : index
    %c0_99 = arith.constant 0 : index
    %200 = vector.load %arg2[%c0_96, %c3_97, %c0_98, %c0_99] : memref<1x5x64x1xf32, #tpu.memory_space<vmem>>, vector<1x1x64x1xf32>
    %201 = vector.shape_cast %200 : vector<1x1x64x1xf32> to vector<64x1xf32>
    %202 = vector.broadcast %201 : vector<64x1xf32> to vector<64x128xf32>
    %203 = arith.addf %199, %202 : vector<64x128xf32>
    %204 = vector.extract_strided_slice %203 {offsets = [0, 0], sizes = [32, 128], strides = [1, 1]} : vector<64x128xf32> to vector<32x128xf32>
    %cst_100 = arith.constant dense<0.000000e+00> : vector<128xf32>
    %205 = vector.multi_reduction <add>, %204, %cst_100 [0] : vector<32x128xf32> to vector<128xf32>
    %206 = vector.shape_cast %205 : vector<128xf32> to vector<1x128xf32>
    %cst_101 = arith.constant 3.200000e+01 : f32
    %207 = vector.broadcast %cst_101 : f32 to vector<1x128xf32>
    %208 = arith.divf %206, %207 : vector<1x128xf32>
    %209 = vector.broadcast %208 : vector<1x128xf32> to vector<32x128xf32>
    %210 = arith.subf %204, %209 : vector<32x128xf32>
    %211 = arith.mulf %210, %210 : vector<32x128xf32>
    %cst_102 = arith.constant dense<0.000000e+00> : vector<128xf32>
    %212 = vector.multi_reduction <add>, %211, %cst_102 [0] : vector<32x128xf32> to vector<128xf32>
    %213 = vector.shape_cast %212 : vector<128xf32> to vector<1x128xf32>
    %cst_103 = arith.constant 3.200000e+01 : f32
    %214 = vector.broadcast %cst_103 : f32 to vector<1x128xf32>
    %215 = arith.divf %213, %214 : vector<1x128xf32>
    %216 = vector.broadcast %208 : vector<1x128xf32> to vector<32x128xf32>
    %217 = arith.subf %204, %216 : vector<32x128xf32>
    %cst_104 = arith.constant 9.99999974E-6 : f32
    %218 = vector.broadcast %cst_104 : f32 to vector<1x128xf32>
    %219 = arith.addf %215, %218 : vector<1x128xf32>
    %220 = math.rsqrt %219 : vector<1x128xf32>
    %221 = vector.broadcast %220 : vector<1x128xf32> to vector<32x128xf32>
    %222 = arith.mulf %217, %221 : vector<32x128xf32>
    %223 = vector.extract_strided_slice %203 {offsets = [32, 0], sizes = [32, 128], strides = [1, 1]} : vector<64x128xf32> to vector<32x128xf32>
    %cst_105 = arith.constant dense<0.000000e+00> : vector<128xf32>
    %224 = vector.multi_reduction <add>, %223, %cst_105 [0] : vector<32x128xf32> to vector<128xf32>
    %225 = vector.shape_cast %224 : vector<128xf32> to vector<1x128xf32>
    %cst_106 = arith.constant 3.200000e+01 : f32
    %226 = vector.broadcast %cst_106 : f32 to vector<1x128xf32>
    %227 = arith.divf %225, %226 : vector<1x128xf32>
    %228 = vector.broadcast %227 : vector<1x128xf32> to vector<32x128xf32>
    %229 = arith.subf %223, %228 : vector<32x128xf32>
    %230 = arith.mulf %229, %229 : vector<32x128xf32>
    %cst_107 = arith.constant dense<0.000000e+00> : vector<128xf32>
    %231 = vector.multi_reduction <add>, %230, %cst_107 [0] : vector<32x128xf32> to vector<128xf32>
    %232 = vector.shape_cast %231 : vector<128xf32> to vector<1x128xf32>
    %cst_108 = arith.constant 3.200000e+01 : f32
    %233 = vector.broadcast %cst_108 : f32 to vector<1x128xf32>
    %234 = arith.divf %232, %233 : vector<1x128xf32>
    %235 = vector.broadcast %227 : vector<1x128xf32> to vector<32x128xf32>
    %236 = arith.subf %223, %235 : vector<32x128xf32>
    %cst_109 = arith.constant 9.99999974E-6 : f32
    %237 = vector.broadcast %cst_109 : f32 to vector<1x128xf32>
    %238 = arith.addf %234, %237 : vector<1x128xf32>
    %239 = math.rsqrt %238 : vector<1x128xf32>
    %240 = vector.broadcast %239 : vector<1x128xf32> to vector<32x128xf32>
    %241 = arith.mulf %236, %240 : vector<32x128xf32>
    %242 = tpu.concatenate %222, %241 in 0 : vector<32x128xf32>, vector<32x128xf32> -> vector<64x128xf32>
    %c3_110 = arith.constant 3 : index
    %c0_111 = arith.constant 0 : index
    %c0_112 = arith.constant 0 : index
    %243 = vector.load %arg5[%c3_110, %c0_111, %c0_112] : memref<5x64x2xf32, #tpu.memory_space<vmem>>, vector<1x64x1xf32>
    %244 = vector.shape_cast %243 : vector<1x64x1xf32> to vector<64x1xf32>
    %245 = vector.broadcast %244 : vector<64x1xf32> to vector<64x128xf32>
    %246 = arith.mulf %242, %245 : vector<64x128xf32>
    %c3_113 = arith.constant 3 : index
    %c0_114 = arith.constant 0 : index
    %c1_115 = arith.constant 1 : index
    %247 = vector.load %arg5[%c3_113, %c0_114, %c1_115] : memref<5x64x2xf32, #tpu.memory_space<vmem>>, vector<1x64x1xf32>
    %248 = vector.shape_cast %247 : vector<1x64x1xf32> to vector<64x1xf32>
    %249 = vector.broadcast %248 : vector<64x1xf32> to vector<64x128xf32>
    %250 = arith.addf %246, %249 : vector<64x128xf32>
    %c128 = arith.constant 128 : index
    %c0_116 = arith.constant 0 : index
    %251 = vector.load %arg9[%c128, %c0_116] : memref<192x128xf32, #tpu.memory_space<vmem>>, vector<32x128xf32>
    %252 = tpu.concatenate %251, %251 in 0 : vector<32x128xf32>, vector<32x128xf32> -> vector<64x128xf32>
    %253 = arith.mulf %250, %252 : vector<64x128xf32>
    %c4 = arith.constant 4 : index
    %c0_117 = arith.constant 0 : index
    %c0_118 = arith.constant 0 : index
    %254 = vector.load %arg6[%c4, %c0_117, %c0_118] : memref<6x64x1xf32, #tpu.memory_space<vmem>>, vector<1x64x1xf32>
    %255 = vector.shape_cast %254 : vector<1x64x1xf32> to vector<64x1xf32>
    %256 = vector.broadcast %255 : vector<64x1xf32> to vector<64x128xf32>
    %257 = arith.mulf %253, %256 : vector<64x128xf32>
    %258 = arith.addf %196, %257 : vector<64x128xf32>
    %c4_119 = arith.constant 4 : index
    %c0_120 = arith.constant 0 : index
    %c0_121 = arith.constant 0 : index
    %259 = vector.load %arg4[%c4_119, %c0_120, %c0_121] : memref<5x64x64xf32, #tpu.memory_space<vmem>>, vector<1x64x64xf32>
    %260 = vector.shape_cast %259 : vector<1x64x64xf32> to vector<64x64xf32>
    %cst_122 = arith.constant dense<0.000000e+00> : vector<64x128xf32>
    %261 = tpu.matmul %260, %253, %cst_122 {dimension_numbers = #tpu.dot_dimension_numbers<[1], [0], [0], [1], [0, 0, 1, 1], [], []>} : vector<64x64xf32>, vector<64x128xf32>, vector<64x128xf32> -> vector<64x128xf32>
    %c0_123 = arith.constant 0 : index
    %c4_124 = arith.constant 4 : index
    %c0_125 = arith.constant 0 : index
    %c0_126 = arith.constant 0 : index
    %262 = vector.load %arg2[%c0_123, %c4_124, %c0_125, %c0_126] : memref<1x5x64x1xf32, #tpu.memory_space<vmem>>, vector<1x1x64x1xf32>
    %263 = vector.shape_cast %262 : vector<1x1x64x1xf32> to vector<64x1xf32>
    %264 = vector.broadcast %263 : vector<64x1xf32> to vector<64x128xf32>
    %265 = arith.addf %261, %264 : vector<64x128xf32>
    %266 = vector.extract_strided_slice %265 {offsets = [0, 0], sizes = [32, 128], strides = [1, 1]} : vector<64x128xf32> to vector<32x128xf32>
    %cst_127 = arith.constant dense<0.000000e+00> : vector<128xf32>
    %267 = vector.multi_reduction <add>, %266, %cst_127 [0] : vector<32x128xf32> to vector<128xf32>
    %268 = vector.shape_cast %267 : vector<128xf32> to vector<1x128xf32>
    %cst_128 = arith.constant 3.200000e+01 : f32
    %269 = vector.broadcast %cst_128 : f32 to vector<1x128xf32>
    %270 = arith.divf %268, %269 : vector<1x128xf32>
    %271 = vector.broadcast %270 : vector<1x128xf32> to vector<32x128xf32>
    %272 = arith.subf %266, %271 : vector<32x128xf32>
    %273 = arith.mulf %272, %272 : vector<32x128xf32>
    %cst_129 = arith.constant dense<0.000000e+00> : vector<128xf32>
    %274 = vector.multi_reduction <add>, %273, %cst_129 [0] : vector<32x128xf32> to vector<128xf32>
    %275 = vector.shape_cast %274 : vector<128xf32> to vector<1x128xf32>
    %cst_130 = arith.constant 3.200000e+01 : f32
    %276 = vector.broadcast %cst_130 : f32 to vector<1x128xf32>
    %277 = arith.divf %275, %276 : vector<1x128xf32>
    %278 = vector.broadcast %270 : vector<1x128xf32> to vector<32x128xf32>
    %279 = arith.subf %266, %278 : vector<32x128xf32>
    %cst_131 = arith.constant 9.99999974E-6 : f32
    %280 = vector.broadcast %cst_131 : f32 to vector<1x128xf32>
    %281 = arith.addf %277, %280 : vector<1x128xf32>
    %282 = math.rsqrt %281 : vector<1x128xf32>
    %283 = vector.broadcast %282 : vector<1x128xf32> to vector<32x128xf32>
    %284 = arith.mulf %279, %283 : vector<32x128xf32>
    %285 = vector.extract_strided_slice %265 {offsets = [32, 0], sizes = [32, 128], strides = [1, 1]} : vector<64x128xf32> to vector<32x128xf32>
    %cst_132 = arith.constant dense<0.000000e+00> : vector<128xf32>
    %286 = vector.multi_reduction <add>, %285, %cst_132 [0] : vector<32x128xf32> to vector<128xf32>
    %287 = vector.shape_cast %286 : vector<128xf32> to vector<1x128xf32>
    %cst_133 = arith.constant 3.200000e+01 : f32
    %288 = vector.broadcast %cst_133 : f32 to vector<1x128xf32>
    %289 = arith.divf %287, %288 : vector<1x128xf32>
    %290 = vector.broadcast %289 : vector<1x128xf32> to vector<32x128xf32>
    %291 = arith.subf %285, %290 : vector<32x128xf32>
    %292 = arith.mulf %291, %291 : vector<32x128xf32>
    %cst_134 = arith.constant dense<0.000000e+00> : vector<128xf32>
    %293 = vector.multi_reduction <add>, %292, %cst_134 [0] : vector<32x128xf32> to vector<128xf32>
    %294 = vector.shape_cast %293 : vector<128xf32> to vector<1x128xf32>
    %cst_135 = arith.constant 3.200000e+01 : f32
    %295 = vector.broadcast %cst_135 : f32 to vector<1x128xf32>
    %296 = arith.divf %294, %295 : vector<1x128xf32>
    %297 = vector.broadcast %289 : vector<1x128xf32> to vector<32x128xf32>
    %298 = arith.subf %285, %297 : vector<32x128xf32>
    %cst_136 = arith.constant 9.99999974E-6 : f32
    %299 = vector.broadcast %cst_136 : f32 to vector<1x128xf32>
    %300 = arith.addf %296, %299 : vector<1x128xf32>
    %301 = math.rsqrt %300 : vector<1x128xf32>
    %302 = vector.broadcast %301 : vector<1x128xf32> to vector<32x128xf32>
    %303 = arith.mulf %298, %302 : vector<32x128xf32>
    %304 = tpu.concatenate %284, %303 in 0 : vector<32x128xf32>, vector<32x128xf32> -> vector<64x128xf32>
    %c4_137 = arith.constant 4 : index
    %c0_138 = arith.constant 0 : index
    %c0_139 = arith.constant 0 : index
    %305 = vector.load %arg5[%c4_137, %c0_138, %c0_139] : memref<5x64x2xf32, #tpu.memory_space<vmem>>, vector<1x64x1xf32>
    %306 = vector.shape_cast %305 : vector<1x64x1xf32> to vector<64x1xf32>
    %307 = vector.broadcast %306 : vector<64x1xf32> to vector<64x128xf32>
    %308 = arith.mulf %304, %307 : vector<64x128xf32>
    %c4_140 = arith.constant 4 : index
    %c0_141 = arith.constant 0 : index
    %c1_142 = arith.constant 1 : index
    %309 = vector.load %arg5[%c4_140, %c0_141, %c1_142] : memref<5x64x2xf32, #tpu.memory_space<vmem>>, vector<1x64x1xf32>
    %310 = vector.shape_cast %309 : vector<1x64x1xf32> to vector<64x1xf32>
    %311 = vector.broadcast %310 : vector<64x1xf32> to vector<64x128xf32>
    %312 = arith.addf %308, %311 : vector<64x128xf32>
    %c160 = arith.constant 160 : index
    %c0_143 = arith.constant 0 : index
    %313 = vector.load %arg9[%c160, %c0_143] : memref<192x128xf32, #tpu.memory_space<vmem>>, vector<32x128xf32>
    %314 = tpu.concatenate %313, %313 in 0 : vector<32x128xf32>, vector<32x128xf32> -> vector<64x128xf32>
    %315 = arith.mulf %312, %314 : vector<64x128xf32>
    %c5 = arith.constant 5 : index
    %c0_144 = arith.constant 0 : index
    %c0_145 = arith.constant 0 : index
    %316 = vector.load %arg6[%c5, %c0_144, %c0_145] : memref<6x64x1xf32, #tpu.memory_space<vmem>>, vector<1x64x1xf32>
    %317 = vector.shape_cast %316 : vector<1x64x1xf32> to vector<64x1xf32>
    %318 = vector.broadcast %317 : vector<64x1xf32> to vector<64x128xf32>
    %319 = arith.mulf %315, %318 : vector<64x128xf32>
    %320 = arith.addf %258, %319 : vector<64x128xf32>
    %321 = vector.extract_strided_slice %320 {offsets = [0, 0], sizes = [32, 128], strides = [1, 1]} : vector<64x128xf32> to vector<32x128xf32>
    %cst_146 = arith.constant dense<0.000000e+00> : vector<128xf32>
    %322 = vector.multi_reduction <add>, %321, %cst_146 [0] : vector<32x128xf32> to vector<128xf32>
    %323 = vector.shape_cast %322 : vector<128xf32> to vector<1x128xf32>
    %324 = vector.extract_strided_slice %320 {offsets = [32, 0], sizes = [32, 128], strides = [1, 1]} : vector<64x128xf32> to vector<32x128xf32>
    %cst_147 = arith.constant dense<0.000000e+00> : vector<128xf32>
    %325 = vector.multi_reduction <add>, %324, %cst_147 [0] : vector<32x128xf32> to vector<128xf32>
    %326 = vector.shape_cast %325 : vector<128xf32> to vector<1x128xf32>
    %327 = tpu.concatenate %323, %326 in 0 : vector<1x128xf32>, vector<1x128xf32> -> vector<2x128xf32>
    %c0_148 = arith.constant 0 : index
    %c0_149 = arith.constant 0 : index
    %328 = vector.load %arg7[%c0_148, %c0_149] : memref<1x1xf32, #tpu.memory_space<vmem>>, vector<1x1xf32>
    %329 = vector.broadcast %328 : vector<1x1xf32> to vector<2x128xf32>
    %330 = arith.addf %327, %329 : vector<2x128xf32>
    %c0_150 = arith.constant 0 : index
    %c0_151 = arith.constant 0 : index
    %c0_152 = arith.constant 0 : index
    %331 = vector.load %arg8[%c0_150, %c0_151, %c0_152] : memref<1x2x128xf32, #tpu.memory_space<vmem>>, vector<1x2x128xf32>
    %332 = vector.shape_cast %331 : vector<1x2x128xf32> to vector<2x128xf32>
    %333 = vector.shape_cast %330 : vector<2x128xf32> to vector<1x2x128xf32>
    tpu.vector_store %arg8[%c0_150, %c0_151, %c0_152], %333 {strides = array<i32>} : memref<1x2x128xf32, #tpu.memory_space<vmem>>, vector<1x2x128xf32>,
    return
  }
  func.func @transform_0(%arg0: i32) -> (i32, i32, i32) {
    %c0_i32 = arith.constant 0 : i32
    %c0_i32_0 = arith.constant 0 : i32
    %c0_i32_1 = arith.constant 0 : i32
    return %arg0, %c0_i32, %c0_i32_0 : i32, i32, i32
  }
  func.func @transform_1(%arg0: i32) -> (i32, i32, i32, i32) {
    %c0_i32 = arith.constant 0 : i32
    %c0_i32_0 = arith.constant 0 : i32
    %c0_i32_1 = arith.constant 0 : i32
    %c0_i32_2 = arith.constant 0 : i32
    return %arg0, %c0_i32, %c0_i32_0, %c0_i32_1 : i32, i32, i32, i32
  }
  func.func @transform_2(%arg0: i32) -> (i32, i32) {
    %c0_i32 = arith.constant 0 : i32
    %c0_i32_0 = arith.constant 0 : i32
    %c0_i32_1 = arith.constant 0 : i32
    return %c0_i32, %c0_i32_0 : i32, i32
  }
  func.func @transform_3(%arg0: i32) -> (i32, i32, i32) {
    %c0_i32 = arith.constant 0 : i32
    %c0_i32_0 = arith.constant 0 : i32
    %c0_i32_1 = arith.constant 0 : i32
    %c0_i32_2 = arith.constant 0 : i32
    return %c0_i32, %c0_i32_0, %c0_i32_1 : i32, i32, i32
  }
  func.func @transform_4(%arg0: i32) -> (i32, i32, i32) {
    %c0_i32 = arith.constant 0 : i32
    %c0_i32_0 = arith.constant 0 : i32
    %c0_i32_1 = arith.constant 0 : i32
    %c0_i32_2 = arith.constant 0 : i32
    return %c0_i32, %c0_i32_0, %c0_i32_1 : i32, i32, i32
  }
  func.func @transform_5(%arg0: i32) -> (i32, i32, i32) {
    %c0_i32 = arith.constant 0 : i32
    %c0_i32_0 = arith.constant 0 : i32
    %c0_i32_1 = arith.constant 0 : i32
    %c0_i32_2 = arith.constant 0 : i32
    return %c0_i32, %c0_i32_0, %c0_i32_1 : i32, i32, i32
  }
  func.func @transform_6(%arg0: i32) -> (i32, i32) {
    %c0_i32 = arith.constant 0 : i32
    %c0_i32_0 = arith.constant 0 : i32
    %c0_i32_1 = arith.constant 0 : i32
    return %c0_i32, %c0_i32_0 : i32, i32
  }
  func.func @transform_7(%arg0: i32) -> (i32, i32, i32) {
    %c0_i32 = arith.constant 0 : i32
    %c0_i32_0 = arith.constant 0 : i32
    %c0_i32_1 = arith.constant 0 : i32
    return %arg0, %c0_i32, %c0_i32_0 : i32, i32, i32
  }
}

</mosaic_0001>

<bundles_post_ra>
// kernel: tpu_custom_call.1
= control target key start
LH: loop header
LB: loop body
LE: loop exit
PB: predicated region body
PF: predicated region fallthrough
CT: control target
= control target key end

     0   :  { %s5088_s0 = inlined_call_operand.vmem [shape: f32[2,64,128], index: 0, kind: input, shape index: {}]   ;;  %s5089_s1 = inlined_call_operand.vmem [shape: f32[2,5,64,1], index: 1, kind: input, shape index: {}]   ;;  %s5090_s2 = inlined_call_operand.vmem [shape: f32[192,64], index: 2, kind: input, shape index: {}]   ;;  %s5091_s3 = inlined_call_operand.vmem [shape: f32[5,64,64], index: 3, kind: input, shape index: {}]   ;;  %s5092_s4 = inlined_call_operand.vmem [shape: f32[5,64,2], index: 4, kind: input, shape index: {}]   ;;  %s5093_s5 = inlined_call_operand.vmem [shape: f32[6,64,1], index: 5, kind: input, shape index: {}]   ;;  %s5094_s6 = inlined_call_operand.<no memory space> [shape: f32[1,1], index: 6, kind: input, shape index: {}]   ;;  %s5095_s7 = inlined_call_operand.hbm [shape: f32[2,2,128], index: 7, kind: output, shape index: {}]  }
   0x1   :  { %v12_v0 = vstv %s5094_s6 }
   0x2   :  { %13 = vst [vmem:[#allocation3] sm:$0x1] %v12_v0 }
   0x3   :  { %14 = vsyncpa [#allocation5], 0 }
   0x4   :  { %16 = vsyncpa [#allocation5 + $0x1], 0  ;;  %s3767_s26 = smov 0   ;;  %s3769_s27 = smov 0  }
   0x5   :  { %s3771_s28 = smov 0   ;;  %s3773_s29 = smov 0  }
   0x6 LB: > { %s3788_s6 = sadd.s32 4294967295, %s3719_s29   ;;  %s2933_s30 = sadd.s32 4294967294, %s3719_s29   ;;  %s3719_s29 = sphi %s3773_s29, %s5247_s29   ;;  %s3715_s28 = sphi %s3771_s28, %s5246_s28   ;;  %s3711_s27 = sphi %s3769_s27, %s5245_s27   ;;  %s3707_s26 = sphi %s3767_s26, %s5244_s26  }
   0x7   : > { %s3792_s8 = sadd.s32 1, %s3719_s29   ;;  %s186_s9 = sadd.s32 1, %s3715_s28 }
   0x8   : > { %s183_s10 = ssub.s32 %s3719_s29, %s3792_s8  ;;  %p196_p0 = scmp.ne.s32.totalorder %s3715_s28, %s3711_s27 }
   0x9   : > { %p184_p1 = scmp.eq.s32.totalorder %s183_s10, 0  ;;  %p197_p2 = scmp.eq.s32.totalorder %s3788_s6, 1 }
   0xa   : > { %p202_p3 = scmp.ne.s32.totalorder %s3711_s27, %s3707_s26  ;;  %p203_p4 = scmp.eq.s32.totalorder %s2933_s30, 1 }
   0xb   : > { %s3803_s11 = scalar_select %p184_p1, %s3715_s28, %s186_s9  }
   0xc   : > { %p3805_p5 = por %p197_p2, %p196_p0  ;;  %p3809_p6 = por %p203_p4, %p202_p3 }
   0xd   : > { %p2936_p7 = scmp.ge.s32.totalorder %s3719_s29, 1  ;;  %p252_p8 = scmp.lt.s32.totalorder %s3719_s29, 3 }
   0xf   : > { %p253_p9 = pnand %p2936_p7, %p252_p8 }
  0x11   : > { %256 = sbr.rel (%p253_p9) target bundleno = 1815 (0x717), region = 48 }
  0x18   : > { %p289_p10 = scmp.lt.s32.totalorder %s3788_s6, 1  ;;  %v299_v1 = vld [vmem:[%s5090_s2] sm:$0xff]  ;;  %vm331_vm0 = vcmask 523264   ;;  %v5098_v2 = vmov 0   ;;  %v928_v23 = vld [vmem:[%s5092_s4 + $0x8] sm:$0xff]  ;;  %v301_v26 = vld [vmem:[%s5090_s2 + $0x10] sm:$0xff] }
  0x19   : > { %3590 = vset.pattern.permute.xlu1 %v5098_v2  ;;  %3589 = vset.pattern.permute.xlu0 %v5098_v2  ;;  %v927_v24 = vld [vmem:[%s5092_s4] sm:$0xff]  ;;  %v300_v25 = vld [vmem:[%s5090_s2 + $0x8] sm:$0xff]  ;;  %v5096_v27 = vmov 1   ;;  %v302_v29 = vld [vmem:[%s5090_s2 + $0x18] sm:$0xff]  ;;  %s286_s10 = sand.u32 1, %s3711_s27   ;;  %vm2834_vm1 = vcmask 1040384  }
  0x1a   : > { %s290_s16 = scalar_select %p289_p10, %s3788_s6, 1  ;;  %3275 = vmatprep.mubr.msk.f32.mxu0 %vm331_vm0, %v299_v1  ;;  %v931_v28 = vld [vmem:[%s5092_s4 + $0x20] sm:$0xff]  ;;  %v929_v30 = vld [vmem:[%s5092_s4 + $0x10] sm:$0xff]  ;;  %v930_v31 = vld [vmem:[%s5092_s4 + $0x18] sm:$0xff] }
  0x1b   : > { %v934_v32 = vld [vmem:[%s5092_s4 + $0x38] sm:$0xff]  ;;  %v932_v33 = vld [vmem:[%s5092_s4 + $0x28] sm:$0xff]  ;;  %v933_v36 = vld [vmem:[%s5092_s4 + $0x30] sm:$0xff]  ;;  %s2937_s14 = sshll.u32 %s286_s10, 1  ;;  %s3143_s15 = sshll.u32 %s3788_s6, 5 }
  0x1c   : > { %s3547_s17 = smul.u32 320, %s290_s16  ;;  %s3146_s18 = sshll.u32 %s290_s16, 6  ;;  %v3005_v39 = vld [vmem:[%s5092_s4 + $0x40] sm:$0xff]  ;;  %v3008_v44 = vld [vmem:[%s5092_s4 + $0x58] sm:$0xff]  ;;  %v3006_v46 = vld [vmem:[%s5092_s4 + $0x48] sm:$0xff] }
  0x1d   : > { %s293_s21 = scalar_lea.vmem %s5088_s0, %s3146_s18  ;;  %v3009_v40 = vld [vmem:[%s5092_s4 + $0x60] sm:$0xff]  ;;  %v3012_v47 = vld [vmem:[%s5092_s4 + $0x78] sm:$0xff]  ;;  %v3007_v50 = vld [vmem:[%s5092_s4 + $0x50] sm:$0xff]  ;;  %s288_s16 = scalar_lea.vmem [#allocation4], %s2937_s14 }
  0x1e   : > { %s3829_s24 = scalar_lea.vmem %s5089_s1, %s3547_s17  ;;  %v323_v3 = vld [vmem:[%s293_s21] sm:$0xff]  ;;  %v324_v4 = vld [vmem:[%s293_s21 + $0x8] sm:$0xff]  ;;  %v325_v5 = vld [vmem:[%s293_s21 + $0x10] sm:$0xff]  ;;  %s2862_s17 = sshll.u32 %s288_s16, 4  ;;  %s5048_s17 = int_to_ptr.vmem [resolvable:$true] %s2862_s17 }
  0x1f   : > { %v683_v6 = vld [vmem:[%s3829_s24 + $0x10] sm:$0xff]  ;;  %v681_v7 = vld [vmem:[%s3829_s24] sm:$0xff]  ;;  %v3451_v8 = vpack.c.bf16 %v324_v4, %v323_v3  ;;  %v684_v9 = vld [vmem:[%s3829_s24 + $0x18] sm:$0xff]  ;;  %s2849_s20 = scalar_lea.sflag [#allocation5], %s286_s10  ;;  %s3723_s6 = smov [#allocation4]  }
  0x20   : > { %701 = vperm.xlu1 %3590, %v683_v6   ;;  %691 = vperm.xlu0 %3589, %v681_v7   ;;  %v326_v10 = vld [vmem:[%s293_s21 + $0x18] sm:$0xff]  ;;  %v682_v11 = vld [vmem:[%s3829_s24 + $0x8] sm:$0xff]  ;;  %v327_v13 = vld [vmem:[%s293_s21 + $0x20] sm:$0xff]  ;;  %s3661_s22 = sshll.u32 %s3723_s6, 4  ;;  %s3662_s22 = int_to_ptr.vmem [resolvable:$false] %s3661_s22 }
  0x21   : > { %3452 = vmatprep.subr.bf16.mxu0 %v3451_v8  ;;  %v3455_v12 = vpack.c.bf16 %v326_v10, %v325_v5  ;;  %v328_v14 = vld [vmem:[%s293_s21 + $0x28] sm:$0xff]  ;;  %v329_v16 = vld [vmem:[%s293_s21 + $0x30] sm:$0xff]  ;;  %v330_v17 = vld [vmem:[%s293_s21 + $0x38] sm:$0xff]  ;;  %s3657_s21 = scalar_lea.vmem %s5048_s17, 32  ;;  %s3663_s23 = scalar_lea.vmem %s3662_s22, 64 }
  0x22   : > { %3454 = vmatpush3.bf16.msra.mxu0 %v3451_v8  ;;  %v3459_v15 = vpack.c.bf16 %v328_v14, %v327_v13  ;;  %v686_v18 = vld [vmem:[%s3829_s24 + $0x28] sm:$0xff]  ;;  %v685_v19 = vld [vmem:[%s3829_s24 + $0x20] sm:$0xff]  ;;  %v3463_v20 = vpack.c.bf16 %v330_v17, %v329_v16  ;;  %v688_v21 = vld [vmem:[%s3829_s24 + $0x38] sm:$0xff]  ;;  %p3658_p11 = scmp.ne.s32.totalorder %s5048_s17, %s3657_s21  ;;  %p3664_p0 = scmp.lt.s32.totalorder %s5048_s17, %s3662_s22 }
  0x23   : > { %3456 = vmatprep.subr.bf16.mxu0 %v3455_v12  ;;  %v687_v22 = vld [vmem:[%s3829_s24 + $0x30] sm:$0xff]  ;;  %v2989_v34 = vld [vmem:[%s3829_s24 + $0x40] sm:$0xff]  ;;  %v2990_v41 = vld [vmem:[%s3829_s24 + $0x48] sm:$0xff]  ;;  %p3665_p1 = scmp.lt.s32.totalorder %s3663_s23, %s3657_s21 }
  0x24   : > { %706 = vperm.xlu1 %3590, %v684_v9   ;;  %696 = vperm.xlu0 %3589, %v682_v11   ;;  %v2991_v35 = vld [vmem:[%s3829_s24 + $0x50] sm:$0xff]  ;;  %v2993_v37 = vld [vmem:[%s3829_s24 + $0x60] sm:$0xff]  ;;  %v2992_v42 = vld [vmem:[%s3829_s24 + $0x58] sm:$0xff]  ;;  %p3659_p12 = pnand %p3658_p11, %p3805_p5 }
  0x25   : > { %v2995_v38 = vld [vmem:[%s3829_s24 + $0x70] sm:$0xff]  ;;  %v2994_v43 = vld [vmem:[%s3829_s24 + $0x68] sm:$0xff]  ;;  %v2996_v45 = vld [vmem:[%s3829_s24 + $0x78] sm:$0xff]  ;;  %p3666_p2 = por %p3665_p1, %p3664_p0 }
  0x26   : > { %3458 = vmatpush3.bf16.msra.mxu0 %v3455_v12  ;;  %v3029_v48 = vld [vmem:[%s3829_s24 + $0x80] sm:$0xff]  ;;  %v3031_v49 = vld [vmem:[%s3829_s24 + $0x90] sm:$0xff]  ;;  %v3010_v54 = vld [vmem:[%s5092_s4 + $0x68] sm:$0xff]  ;;  %p3660_p13 = pneg %p3659_p12 }
  0x27   : > { %3460 = vmatprep.subr.bf16.mxu0 %v3459_v15  ;;  %v3033_v51 = vld [vmem:[%s3829_s24 + $0xa0] sm:$0xff]  ;;  %v3035_v52 = vld [vmem:[%s3829_s24 + $0xb0] sm:$0xff]  ;;  %v3939_v57 = vld [vmem:[%s5092_s4 + $0x98] sm:$0xff] }
  0x28   : > { %716 = vperm.xlu1 %3590, %v686_v18   ;;  %711 = vperm.xlu0 %3589, %v685_v19   ;;  %v3045_v53 = vld [vmem:[%s5092_s4 + $0x80] sm:$0xff]  ;;  %v3011_v56 = vld [vmem:[%s5092_s4 + $0x70] sm:$0xff]  ;;  %v3950_v59 = vld [vmem:[%s5092_s4 + $0xb8] sm:$0xff]  ;;  %p3667_p3 = pnand %p3666_p2, %p3660_p13 }
  0x29   : > { %v3049_v55 = vld [vmem:[%s5092_s4 + $0xa0] sm:$0xff]  ;;  %v3030_v61 = vld [vmem:[%s3829_s24 + $0x88] sm:$0xff]  ;;  %v3071_v62 = vld [vmem:[%s3829_s24 + $0xd0] sm:$0xff] }
  0x2a   : > { %3462 = vmatpush3.bf16.msra.mxu0 %v3459_v15  ;;  %v673_v58 = vld [vmem:[%s5091_s3] sm:$0xff]  ;;  %v3032_v1 = vld [vmem:[%s3829_s24 + $0x98] sm:$0xff]  ;;  %v3034_v6 = vld [vmem:[%s3829_s24 + $0xa8] sm:$0xff] }
  0x2b   : > { %3464 = vmatprep.subr.bf16.mxu0 %v3463_v20  ;;  %3327 = vmatprep.mubr.msk.f32.mxu1 %vm331_vm0, %v673_v58  ;;  %v3069_v60 = vld [vmem:[%s3829_s24 + $0xc0] sm:$0xff]  ;;  %v3075_v7 = vld [vmem:[%s3829_s24 + $0xf0] sm:$0xff]  ;;  %v3036_v10 = vld [vmem:[%s3829_s24 + $0xb8] sm:$0xff] }
  0x2c   : > { %726 = vperm.xlu1 %3590, %v688_v21   ;;  %721 = vperm.xlu0 %3589, %v687_v22   ;;  %v3073_v3 = vld [vmem:[%s3829_s24 + $0xe0] sm:$0xff]  ;;  %v3046_v14 = vld [vmem:[%s5092_s4 + $0x88] sm:$0xff]  ;;  %v4006_v21 = vld [vmem:[%s5092_s4 + $0xd8] sm:$0xff] }
  0x2d   : > { %v3085_v13 = vld [vmem:[%s5092_s4 + $0xc0] sm:$0xff] }
  0x2e   : > { %3466 = vmatpush3.bf16.msra.mxu0 %v3463_v20  ;;  %v3089_v16 = vld [vmem:[%s5092_s4 + $0xe0] sm:$0xff]  ;;  %v3047_v20 = vld [vmem:[%s5092_s4 + $0x90] sm:$0xff] }
  0x30   : > { %942 = vperm.xlu1 %3590, %v928_v23   ;;  %3591 = vset.pattern.permute.xlu0 %v5096_v27 }
  0x31   : > { %984 = vperm.xlu0 %3591, %v927_v24   ;;  %3276 = vmatmul.mubr.msk.f32.vlgmr.msra.gmra.mrb[0].mxu0 %vm331_vm0, %v300_v25 }
  0x32   : > { %3278 = vmatprep.mubr.msk.f32.mxu0 %vm331_vm0, %v301_v26  ;;  %v4021_v26 = vld [vmem:[%s5092_s4 + $0xf8] sm:$0xff] }
  0x34   : > { %3592 = vset.pattern.permute.xlu1 %v5096_v27 }
  0x35   : > { %988 = vperm.xlu1 %3592, %v928_v23   ;;  %1000 = vperm.xlu0 %3591, %v931_v28  }
  0x36   : > { %3279 = vmatmul.mubr.msk.f32.gmra.mrb[2].mxu0 %vm331_vm0, %v302_v29 }
  0x39   : > { %3593 = vset.pattern.permute.xlu1 %v5098_v2  ;;  %3596 = vset.pattern.permute.xlu0 %v5098_v2 }
  0x3a   : > { %947 = vperm.xlu1 %3593, %v929_v30   ;;  %937 = vperm.xlu0 %3596, %v927_v24  }
  0x3e   : > { %3594 = vset.pattern.permute.xlu1 %v5096_v27  ;;  %952 = vperm.xlu0 %3596, %v930_v31  }
  0x3f   : > { %992 = vperm.xlu1 %3594, %v929_v30   ;;  %v3050_v30 = vld [vmem:[%s5092_s4 + $0xa8] sm:$0xff] }
  0x42   : > { %957 = vperm.xlu0 %3596, %v931_v28  }
  0x43   : > { %996 = vperm.xlu1 %3594, %v930_v31   ;;  %v617_v31 = vld [vmem:[%s5093_s5] sm:$0xff] }
  0x46   : > { %972 = vperm.xlu0 %3596, %v934_v32  }
  0x47   : > { %3595 = vset.pattern.permute.xlu1 %v5098_v2 }
  0x48   : > { %962 = vperm.xlu1 %3595, %v932_v33  }
  0x4a   : > { %1120 = vperm.xlu0 %3596, %v2989_v34   ;;  %v619_v34 = vld [vmem:[%s5093_s5 + $0x10] sm:$0xff] }
  0x4c   : > { %3597 = vset.pattern.permute.xlu1 %v5096_v27 }
  0x4d   : > { %1004 = vperm.xlu1 %3597, %v932_v33  }
  0x4e   : > { %1130 = vperm.xlu0 %3596, %v2991_v35  }
  0x51   : > { %3598 = vset.pattern.permute.xlu1 %v5098_v2 }
  0x52   : > { %967 = vperm.xlu1 %3598, %v933_v36   ;;  %1140 = vperm.xlu0 %3596, %v2993_v37   ;;  %v621_v37 = vld [vmem:[%s5093_s5 + $0x20] sm:$0xff] }
  0x56   : > { %3599 = vset.pattern.permute.xlu1 %v5096_v27  ;;  %1150 = vperm.xlu0 %3596, %v2995_v38  }
  0x57   : > { %1008 = vperm.xlu1 %3599, %v933_v36  }
  0x5a   : > { %3601 = vset.pattern.permute.xlu0 %v5096_v27 }
  0x5b   : > { %1012 = vperm.xlu1 %3599, %v934_v32   ;;  %1413 = vperm.xlu0 %3601, %v3005_v39  }
  0x5f   : > { %3600 = vset.pattern.permute.xlu1 %v5098_v2  ;;  %1429 = vperm.xlu0 %3601, %v3009_v40  }
  0x60   : > { %1125 = vperm.xlu1 %3600, %v2990_v41  }
  0x63   : > { %3606 = vset.pattern.permute.xlu0 %v5098_v2 }
  0x64   : > { %1135 = vperm.xlu1 %3600, %v2992_v42   ;;  %1366 = vperm.xlu0 %3606, %v3005_v39   ;;  %v3051_v39 = vld [vmem:[%s5092_s4 + $0xb0] sm:$0xff] }
  0x68   : > { %1145 = vperm.xlu1 %3600, %v2994_v43   ;;  %1381 = vperm.xlu0 %3606, %v3008_v44   ;;  %v303_v43 = vld [vmem:[%s5090_s2 + $0x20] sm:$0xff] }
  0x69   : > { %3281 = vmatprep.mubr.msk.f32.mxu0 %vm331_vm0, %v303_v43  ;;  %v3090_v43 = vld [vmem:[%s5092_s4 + $0xe8] sm:$0xff] }
  0x6c   : > { %1155 = vperm.xlu1 %3600, %v2996_v45   ;;  %1386 = vperm.xlu0 %3606, %v3009_v40   ;;  %v623_v40 = vld [vmem:[%s5093_s5 + $0x30] sm:$0xff] }
  0x6d   : > { %v305_v45 = vld [vmem:[%s5090_s2 + $0x30] sm:$0xff] }
  0x70   : > { %1371 = vperm.xlu1 %3600, %v3006_v46   ;;  %1401 = vperm.xlu0 %3606, %v3012_v47  }
  0x74   : > { %3602 = vset.pattern.permute.xlu1 %v5096_v27  ;;  %1549 = vperm.xlu0 %3606, %v3029_v48   ;;  %v306_v48 = vld [vmem:[%s5090_s2 + $0x38] sm:$0xff] }
  0x75   : > { %1417 = vperm.xlu1 %3602, %v3006_v46  }
  0x78   : > { %1559 = vperm.xlu0 %3606, %v3031_v49  }
  0x79   : > { %3603 = vset.pattern.permute.xlu1 %v5098_v2 }
  0x7a   : > { %1376 = vperm.xlu1 %3603, %v3007_v50  }
  0x7c   : > { %1569 = vperm.xlu0 %3606, %v3033_v51   ;;  %v3070_v51 = vld [vmem:[%s3829_s24 + $0xc8] sm:$0xff] }
  0x7e   : > { %3604 = vset.pattern.permute.xlu1 %v5096_v27 }
  0x7f   : > { %1421 = vperm.xlu1 %3604, %v3007_v50  }
  0x80   : > { %1579 = vperm.xlu0 %3606, %v3035_v52  }
  0x83   : > { %1425 = vperm.xlu1 %3604, %v3008_v44   ;;  %v304_v44 = vld [vmem:[%s5090_s2 + $0x28] sm:$0xff] }
  0x84   : > { %3611 = vset.pattern.permute.xlu0 %v5096_v27  ;;  %3282 = vmatmul.mubr.msk.f32.gmra.mrb[4].mxu0 %vm331_vm0, %v304_v44 }
  0x85   : > { %1842 = vperm.xlu0 %3611, %v3045_v53   ;;  %3284 = vmatprep.mubr.msk.f32.mxu0 %vm331_vm0, %v305_v45 }
  0x87   : > { %3605 = vset.pattern.permute.xlu1 %v5098_v2 }
  0x88   : > { %1391 = vperm.xlu1 %3605, %v3010_v54   ;;  %3285 = vmatmul.mubr.msk.f32.gmra.mrb[6].mxu0 %vm331_vm0, %v306_v48 }
  0x89   : > { %1858 = vperm.xlu0 %3611, %v3049_v55  }
  0x8c   : > { %3607 = vset.pattern.permute.xlu1 %v5096_v27 }
  0x8d   : > { %1433 = vperm.xlu1 %3607, %v3010_v54   ;;  %3616 = vset.pattern.permute.xlu0 %v5098_v2  ;;  %v3072_v54 = vld [vmem:[%s3829_s24 + $0xd8] sm:$0xff] }
  0x8e   : > { %1795 = vperm.xlu0 %3616, %v3045_v53  }
  0x91   : > { %3608 = vset.pattern.permute.xlu1 %v5098_v2 }
  0x92   : > { %1396 = vperm.xlu1 %3608, %v3011_v56   ;;  %1810 = vperm.xlu0 %3616, %v3939_v57  }
  0x96   : > { %3609 = vset.pattern.permute.xlu1 %v5096_v27  ;;  %1815 = vperm.xlu0 %3616, %v3049_v55  }
  0x97   : > { %1437 = vperm.xlu1 %3609, %v3011_v56  }
  0x9a   : > { %1830 = vperm.xlu0 %3616, %v3950_v59  }
  0x9b   : > { %1441 = vperm.xlu1 %3609, %v3012_v47  }
  0x9e   : > { %1978 = vperm.xlu0 %3616, %v3069_v60  }
  0x9f   : > { %3610 = vset.pattern.permute.xlu1 %v5098_v2  ;;  %v3958_v63 = vpop.permute.xlu0 %691  ;;  %v3960_v0 = vpop.permute.xlu1 %701 }
  0xa0   : > { %1554 = vperm.xlu1 %3610, %v3030_v61  }
  0xa2   : > { %1988 = vperm.xlu0 %3616, %v3071_v62  }
  0xa3   : > { %v3964_v4 = vpop.permute.xlu0 %696  ;;  %v3966_v5 = vpop.permute.xlu1 %706 }
  0xa4   : > { %1564 = vperm.xlu1 %3610, %v3032_v1   ;;  %v3086_v1 = vld [vmem:[%s5092_s4 + $0xc8] sm:$0xff] }
  0xa6   : > { %1998 = vperm.xlu0 %3616, %v3073_v3  }
  0xa7   : > { %v3970_v8 = vpop.permute.xlu0 %711  ;;  %v3972_v9 = vpop.permute.xlu1 %716 }
  0xa8   : > { %1574 = vperm.xlu1 %3610, %v3034_v6  }
  0xaa   : > { %2008 = vperm.xlu0 %3616, %v3075_v7  }
  0xab   : > { %v3975_v11 = vpop.permute.xlu0 %721  ;;  %v3977_v12 = vpop.permute.xlu1 %726 }
  0xac   : > { %1584 = vperm.xlu1 %3610, %v3036_v10  }
  0xae   : > { %3621 = vset.pattern.permute.xlu0 %v5096_v27 }
  0xaf   : > { %2271 = vperm.xlu0 %3621, %v3085_v13   ;;  %v3986_v15 = vpop.permute.xlu1 %942 }
  0xb0   : > { %1800 = vperm.xlu1 %3610, %v3046_v14   ;;  %v3991_v17 = vpop.permute.xlu0 %984 }
  0xb3   : > { %2287 = vperm.xlu0 %3621, %v3089_v16  }
  0xb4   : > { %3612 = vset.pattern.permute.xlu1 %v5096_v27  ;;  %v3994_v18 = vpop.permute.xlu0 %1000  ;;  %v3996_v19 = vpop.permute.xlu1 %988 }
  0xb5   : > { %1846 = vperm.xlu1 %3612, %v3046_v14  }
  0xb7   : > { %3626 = vset.pattern.permute.xlu0 %v5098_v2 }
  0xb8   : > { %2224 = vperm.xlu0 %3626, %v3085_v13   ;;  %v3087_v13 = vld [vmem:[%s5092_s4 + $0xd0] sm:$0xff] }
  0xb9   : > { %3613 = vset.pattern.permute.xlu1 %v5098_v2  ;;  %v4008_v22 = vpop.permute.xlu0 %937  ;;  %v4010_v23 = vpop.permute.xlu1 %947 }
  0xba   : > { %1805 = vperm.xlu1 %3613, %v3047_v20  }
  0xbc   : > { %2239 = vperm.xlu0 %3626, %v4006_v21  }
  0xbd   : > { %v4013_v24 = vpop.permute.xlu0 %952 }
  0xbe   : > { %3614 = vset.pattern.permute.xlu1 %v5096_v27  ;;  %v4016_v25 = vpop.permute.xlu1 %992 }
  0xbf   : > { %1850 = vperm.xlu1 %3614, %v3047_v20  }
  0xc0   : > { %2244 = vperm.xlu0 %3626, %v3089_v16  }
  0xc1   : > { %v4023_v28 = vpop.permute.xlu0 %957 }
  0xc2   : > { %v4025_v29 = vpop.permute.xlu1 %996 }
  0xc3   : > { %1854 = vperm.xlu1 %3614, %v3939_v57   ;;  %v3074_v57 = vld [vmem:[%s3829_s24 + $0xe8] sm:$0xff] }
  0xc4   : > { %2259 = vperm.xlu0 %3626, %v4021_v26  }
  0xc5   : > { %v4035_v32 = vpop.permute.xlu0 %972 }
  0xc7   : > { %3615 = vset.pattern.permute.xlu1 %v5098_v2  ;;  %v4038_v33 = vpop.permute.xlu1 %962 }
  0xc8   : > { %1820 = vperm.xlu1 %3615, %v3050_v30   ;;  %627 = vperm.xlu0 %3626, %v617_v31  }
  0xc9   : > { %v4043_v35 = vpop.permute.xlu0 %1120 }
  0xcc   : > { %3617 = vset.pattern.permute.xlu1 %v5096_v27  ;;  %637 = vperm.xlu0 %3626, %v619_v34   ;;  %v4046_v36 = vpop.permute.xlu1 %1004 }
  0xcd   : > { %1862 = vperm.xlu1 %3617, %v3050_v30   ;;  %v4051_v38 = vpop.permute.xlu0 %1130 }
  0xd0   : > { %647 = vperm.xlu0 %3626, %v621_v37  }
  0xd1   : > { %3618 = vset.pattern.permute.xlu1 %v5098_v2  ;;  %v4060_v41 = vpop.permute.xlu0 %1140  ;;  %v4062_v42 = vpop.permute.xlu1 %967 }
  0xd2   : > { %5102 = vst [vmem:[#allocation7_spill] sm:$0xff] %v4060_v41  ;;  %1825 = vperm.xlu1 %3618, %v3051_v39  }
  0xd4   : > { %657 = vperm.xlu0 %3626, %v623_v40  }
  0xd5   : > { %v4073_v46 = vpop.permute.xlu0 %1150 }
  0xd6   : > { %5103 = vst [vmem:[#allocation8_spill] sm:$0xff] %v4073_v46  ;;  %3619 = vset.pattern.permute.xlu1 %v5096_v27  ;;  %v4077_v47 = vpop.permute.xlu1 %1008 }
  0xd7   : > { %1866 = vperm.xlu1 %3619, %v3051_v39  }
  0xda   : > { %v4084_v49 = vpop.permute.xlu0 %1413  ;;  %v4086_v50 = vpop.permute.xlu1 %1012 }
  0xdb   : > { %5104 = vst [vmem:[#allocation9_spill] sm:$0xff] %v4084_v49  ;;  %1870 = vperm.xlu1 %3619, %v3950_v59   ;;  %v3076_v59 = vld [vmem:[%s3829_s24 + $0xf8] sm:$0xff] }
  0xde   : > { %v4091_v52 = vpop.permute.xlu0 %1429 }
  0xdf   : > { %5105 = vst [vmem:[#allocation10_spill] sm:$0xff] %v4091_v52  ;;  %3620 = vset.pattern.permute.xlu1 %v5098_v2  ;;  %v4094_v53 = vpop.permute.xlu1 %1125  ;;  %v3015_v52 = vld [vmem:[%s5093_s5 + $0x90] sm:$0xff] }
  0xe0   : > { %1983 = vperm.xlu1 %3620, %v3070_v51  }
  0xe3   : > { %v4097_v55 = vpop.permute.xlu0 %1366  ;;  %v4099_v56 = vpop.permute.xlu1 %1135 }
  0xe4   : > { %5106 = vst [vmem:[#allocation11_spill] sm:$0xff] %v4097_v55  ;;  %5107 = vst [vmem:[#allocation12_spill] sm:$0xff] %v4099_v56  ;;  %1993 = vperm.xlu1 %3620, %v3072_v54  }
  0xe7   : > { %v4102_v58 = vpop.permute.xlu0 %1381  ;;  %v4104_v60 = vpop.permute.xlu1 %1145 }
  0xe8   : > { %5108 = vst [vmem:[#allocation13_spill] sm:$0xff] %v4102_v58  ;;  %5109 = vst [vmem:[#allocation14_spill] sm:$0xff] %v4104_v60  ;;  %2003 = vperm.xlu1 %3620, %v3074_v57  }
  0xeb   : > { %v4107_v61 = vpop.permute.xlu0 %1386  ;;  %v4109_v62 = vpop.permute.xlu1 %1155 }
  0xec   : > { %5110 = vst [vmem:[#allocation15_spill] sm:$0xff] %v4107_v61  ;;  %5111 = vst [vmem:[#allocation16_spill] sm:$0xff] %v4109_v62  ;;  %2013 = vperm.xlu1 %3620, %v3076_v59  }
  0xef   : > { %v4114_v3 = vpop.permute.xlu0 %1401  ;;  %v4116_v6 = vpop.permute.xlu1 %1371 }
  0xf0   : > { %5112 = vst [vmem:[#allocation17_spill] sm:$0xff] %v4114_v3  ;;  %5113 = vst [vmem:[#allocation18_spill] sm:$0xff] %v4116_v6  ;;  %2229 = vperm.xlu1 %3620, %v3086_v1  }
  0xf3   : > { %v4118_v7 = vpop.permute.xlu0 %1549 }
  0xf4   : > { %5114 = vst [vmem:[#allocation19_spill] sm:$0xff] %v4118_v7  ;;  %3622 = vset.pattern.permute.xlu1 %v5096_v27  ;;  %v4121_v10 = vpop.permute.xlu1 %1417 }
  0xf5   : > { %5115 = vst [vmem:[#allocation20_spill] sm:$0xff] %v4121_v10  ;;  %2275 = vperm.xlu1 %3622, %v3086_v1   ;;  %v3091_v1 = vld [vmem:[%s5092_s4 + $0xf0] sm:$0xff] }
  0xf7   : > { %v4126_v14 = vpop.permute.xlu0 %1559 }
  0xf8   : > { %5116 = vst [vmem:[#allocation21_spill] sm:$0xff] %v4126_v14 }
  0xf9   : > { %3623 = vset.pattern.permute.xlu1 %v5098_v2  ;;  %v4129_v16 = vpop.permute.xlu1 %1376 }
  0xfa   : > { %5117 = vst [vmem:[#allocation22_spill] sm:$0xff] %v4129_v16  ;;  %2234 = vperm.xlu1 %3623, %v3087_v13  }
  0xfb   : > { %v4131_v20 = vpop.permute.xlu0 %1569 }
  0xfc   : > { %5118 = vst [vmem:[#allocation23_spill] sm:$0xff] %v4131_v20 }
  0xfe   : > { %3624 = vset.pattern.permute.xlu1 %v5096_v27  ;;  %v4134_v30 = vpop.permute.xlu1 %1421 }
  0xff   : > { %5119 = vst [vmem:[#allocation24_spill] sm:$0xff] %v4134_v30  ;;  %2279 = vperm.xlu1 %3624, %v3087_v13   ;;  %v4136_v31 = vpop.permute.xlu0 %1579 }
 0x100   : > { %5120 = vst [vmem:[#allocation25_spill] sm:$0xff] %v4136_v31 }
 0x102   : > { %v4138_v34 = vpop.permute.xlu1 %1425 }
 0x103   : > { %5121 = vst [vmem:[#allocation26_spill] sm:$0xff] %v4138_v34  ;;  %2283 = vperm.xlu1 %3624, %v4006_v21  }
 0x104   : > { %v4141_v37 = vpop.f32.mrb[0].mxu0  ;;  %v4143_v39 = vpop.permute.xlu0 %1842 }
 0x105   : > { %5122 = vst [vmem:[#allocation27_spill] sm:$0xff] %v4143_v39  ;;  %v4145_v40 = vpop.f32.mrb[1].mxu0  ;;  %v674_v39 = vld [vmem:[%s5091_s3 + $0x8] sm:$0xff] }
 0x106   : > { %v3467_v44 = vpack.c.bf16 %v4141_v37, %v4145_v40 }
 0x107   : > { %3625 = vset.pattern.permute.xlu1 %v5098_v2  ;;  %v4153_v45 = vpop.permute.xlu1 %1391 }
 0x108   : > { %5123 = vst [vmem:[#allocation28_spill] sm:$0xff] %v4153_v45  ;;  %2249 = vperm.xlu1 %3625, %v3090_v43   ;;  %3468 = vmatprep.subr.bf16.mxu1 %v3467_v44  ;;  %v4155_v21 = vpop.permute.xlu0 %1858 }
 0x109   : > { %5124 = vst [vmem:[#allocation29_spill] sm:$0xff] %v4155_v21  ;;  %v4157_v48 = vpop.f32.mrb[2].mxu0  ;;  %3470 = vmatpush3.bf16.msra.mxu1 %v3467_v44 }
 0x10a   : > { %v4159_v51 = vpop.f32.mrb[3].mxu0 }
 0x10b   : > { %v3471_v54 = vpack.c.bf16 %v4157_v48, %v4159_v51 }
 0x10c   : > { %3627 = vset.pattern.permute.xlu1 %v5096_v27  ;;  %v4164_v57 = vpop.permute.xlu1 %1433 }
 0x10d   : > { %5125 = vst [vmem:[#allocation30_spill] sm:$0xff] %v4164_v57  ;;  %3472 = vmatprep.subr.bf16.mxu1 %v3471_v54  ;;  %2291 = vperm.xlu1 %3627, %v3090_v43   ;;  %v4166_v59 = vpop.permute.xlu0 %1795  ;;  %v5130_v43 = vmov 1  }
 0x10e   : > { %5126 = vst [vmem:[#allocation31_spill] sm:$0xff] %v4166_v59  ;;  %3474 = vmatpush3.bf16.msra.mxu1 %v3471_v54 }
 0x10f   : > { %3476 = vmatprep.subr.bf16.mxu1 %v3467_v44 }
 0x111   : > { %3628 = vset.pattern.permute.xlu1 %v5098_v2  ;;  %v4172_v13 = vpop.permute.xlu0 %1810  ;;  %v4174_v21 = vpop.permute.xlu1 %1396  ;;  %v675_v2 = vld [vmem:[%s5091_s3 + $0x10] sm:$0xff] }
 0x112   : > { %5127 = vst [vmem:[#allocation32_spill] sm:$0xff] %v4172_v13  ;;  %5128 = vst [vmem:[#allocation33_spill] sm:$0xff] %v4174_v21  ;;  %3478 = vmatpush3.bf16.msra.mxu1 %v3467_v44  ;;  %2254 = vperm.xlu1 %3628, %v3091_v1  }
 0x113   : > { %3480 = vmatprep.subr.bf16.mxu1 %v3471_v54 }
 0x115   : > { %v4176_v27 = vpop.permute.xlu0 %1815 }
 0x116   : > { %5129 = vst [vmem:[#allocation34_spill] sm:$0xff] %v4176_v27  ;;  %3482 = vmatpush3.bf16.msra.mxu1 %v3471_v54  ;;  %3629 = vset.pattern.permute.xlu1 %v5130_v43  ;;  %v4182_v59 = vpop.permute.xlu1 %1437  ;;  %v676_v54 = vld [vmem:[%s5091_s3 + $0x18] sm:$0xff] }
 0x117   : > { %5131 = vst [vmem:[#allocation35_spill] sm:$0xff] %v4182_v59  ;;  %2295 = vperm.xlu1 %3629, %v3091_v1   ;;  %v677_v1 = vld [vmem:[%s5091_s3 + $0x20] sm:$0xff] }
 0x119   : > { %3328 = vmatmul.mubr.msk.f32.vlgmr.msra.gmra.mrb[0].mxu1 %vm331_vm0, %v674_v39  ;;  %v4188_v44 = vpop.permute.xlu0 %1830  ;;  %v678_v39 = vld [vmem:[%s5091_s3 + $0x28] sm:$0xff] }
 0x11a   : > { %5132 = vst [vmem:[#allocation36_spill] sm:$0xff] %v4188_v44  ;;  %3330 = vmatprep.mubr.msk.f32.mxu1 %vm331_vm0, %v675_v2  ;;  %v4194_v27 = vpop.permute.xlu1 %1441  ;;  %v618_v2 = vld [vmem:[%s5093_s5 + $0x8] sm:$0xff]  ;;  %v5135_v44 = vmov 0  }
 0x11b   : > { %5133 = vst [vmem:[#allocation37_spill] sm:$0xff] %v4194_v27  ;;  %2299 = vperm.xlu1 %3629, %v4021_v26   ;;  %v679_v26 = vld [vmem:[%s5091_s3 + $0x30] sm:$0xff]  ;;  %v310_v27 = vld [vmem:[%s5090_s2 + $0x58] sm:$0xff] }
 0x11d   : > { %3331 = vmatmul.mubr.msk.f32.gmra.mrb[2].mxu1 %vm331_vm0, %v676_v54  ;;  %v4201_v13 = vpop.permute.xlu0 %1978 }
 0x11e   : > { %5134 = vst [vmem:[#allocation38_spill] sm:$0xff] %v4201_v13  ;;  %3333 = vmatprep.mubr.msk.f32.mxu1 %vm331_vm0, %v677_v1  ;;  %v620_v1 = vld [vmem:[%s5093_s5 + $0x18] sm:$0xff] }
 0x11f   : > { %3630 = vset.pattern.permute.xlu1 %v5135_v44  ;;  %v4214_v31 = vpop.permute.xlu1 %1554  ;;  %v680_v13 = vld [vmem:[%s5091_s3 + $0x38] sm:$0xff] }
 0x120   : > { %5136 = vst [vmem:[#allocation39_spill] sm:$0xff] %v4214_v31  ;;  %632 = vperm.xlu1 %3630, %v618_v2  }
 0x121   : > { %3334 = vmatmul.mubr.msk.f32.gmra.mrb[4].mxu1 %vm331_vm0, %v678_v39  ;;  %v4217_v54 = vpop.permute.xlu0 %1988  ;;  %v622_v39 = vld [vmem:[%s5093_s5 + $0x28] sm:$0xff] }
 0x122   : > { %5137 = vst [vmem:[#allocation40_spill] sm:$0xff] %v4217_v54  ;;  %3336 = vmatprep.mubr.msk.f32.mxu1 %vm331_vm0, %v679_v26  ;;  %v624_v26 = vld [vmem:[%s5093_s5 + $0x38] sm:$0xff] }
 0x123   : > { %v4226_v20 = vpop.permute.xlu1 %1564 }
 0x124   : > { %5138 = vst [vmem:[#allocation41_spill] sm:$0xff] %v4226_v20  ;;  %642 = vperm.xlu1 %3630, %v620_v1   ;;  %v2974_v1 = vld [vmem:[%s5093_s5 + $0x48] sm:$0xff] }
 0x125   : > { %3337 = vmatmul.mubr.msk.f32.gmra.mrb[6].mxu1 %vm331_vm0, %v680_v13  ;;  %v4229_v2 = vpop.permute.xlu0 %1998  ;;  %v2973_v13 = vld [vmem:[%s5093_s5 + $0x40] sm:$0xff] }
 0x126   : > { %5139 = vst [vmem:[#allocation42_spill] sm:$0xff] %v4229_v2  ;;  %1046 = vperm.xlu0 %3626, %v2973_v13   ;;  %v2977_v13 = vld [vmem:[%s5093_s5 + $0x60] sm:$0xff] }
 0x127   : > { %v4234_v54 = vpop.permute.xlu1 %1574 }
 0x128   : > { %5140 = vst [vmem:[#allocation43_spill] sm:$0xff] %v4234_v54  ;;  %652 = vperm.xlu1 %3630, %v622_v39   ;;  %v2975_v39 = vld [vmem:[%s5093_s5 + $0x50] sm:$0xff] }
 0x129   : > { %v4236_v44 = vpop.permute.xlu0 %2008 }
 0x12a   : > { %5141 = vst [vmem:[#allocation44_spill] sm:$0xff] %v4236_v44  ;;  %1056 = vperm.xlu0 %3626, %v2975_v39  }
 0x12b   : > { %v4241_v14 = vpop.permute.xlu1 %1584 }
 0x12c   : > { %5142 = vst [vmem:[#allocation45_spill] sm:$0xff] %v4241_v14  ;;  %662 = vperm.xlu1 %3630, %v624_v26   ;;  %v2976_v26 = vld [vmem:[%s5093_s5 + $0x58] sm:$0xff] }
 0x12e   : > { %v4249_v2 = vpop.permute.xlu0 %2271  ;;  %1066 = vperm.xlu0 %3626, %v2977_v13  }
 0x12f   : > { %5143 = vst [vmem:[#allocation46_spill] sm:$0xff] %v4249_v2  ;;  %v4254_v44 = vpop.permute.xlu1 %1800  ;;  %v2978_v2 = vld [vmem:[%s5093_s5 + $0x68] sm:$0xff] }
 0x130   : > { %5144 = vst [vmem:[#allocation47_spill] sm:$0xff] %v4254_v44  ;;  %1051 = vperm.xlu1 %3630, %v2974_v1   ;;  %v2979_v1 = vld [vmem:[%s5093_s5 + $0x70] sm:$0xff] }
 0x132   : > { %v4259_v14 = vpop.permute.xlu0 %2287  ;;  %1076 = vperm.xlu0 %3626, %v2979_v1  }
 0x133   : > { %5145 = vst [vmem:[#allocation48_spill] sm:$0xff] %v4259_v14  ;;  %v2980_v14 = vld [vmem:[%s5093_s5 + $0x78] sm:$0xff] }
 0x134   : > { %v4264_v54 = vpop.permute.xlu1 %1846  ;;  %1061 = vperm.xlu1 %3630, %v2976_v26  }
 0x135   : > { %5146 = vst [vmem:[#allocation49_spill] sm:$0xff] %v4264_v54 }
 0x137   : > { %v4272_v44 = vpop.permute.xlu0 %2224 }
 0x138   : > { %5147 = vst [vmem:[#allocation50_spill] sm:$0xff] %v4272_v44  ;;  %1071 = vperm.xlu1 %3630, %v2978_v2  }
 0x139   : > { %v4274_v39 = vpop.permute.xlu1 %1805 }
 0x13a   : > { %5148 = vst [vmem:[#allocation51_spill] sm:$0xff] %v4274_v39 }
 0x13b   : > { %v4279_v26 = vpop.permute.xlu0 %2239 }
 0x13c   : > { %5149 = vst [vmem:[#allocation52_spill] sm:$0xff] %v4279_v26  ;;  %1081 = vperm.xlu1 %3630, %v2980_v14  }
 0x13e   : > { %v4281_v54 = vpop.permute.xlu1 %1850 }
 0x13f   : > { %5150 = vst [vmem:[#allocation53_spill] sm:$0xff] %v4281_v54  ;;  %v4283_v13 = vpop.permute.xlu0 %2244 }
 0x140   : > { %5151 = vst [vmem:[#allocation54_spill] sm:$0xff] %v4283_v13 }
 0x142   : > { %v4285_v20 = vpop.permute.xlu1 %1854 }
 0x143   : > { %5152 = vst [vmem:[#allocation55_spill] sm:$0xff] %v4285_v20  ;;  %v4287_v7 = vpop.permute.xlu0 %2259 }
 0x144   : > { %5153 = vst [vmem:[#allocation56_spill] sm:$0xff] %v4287_v7 }
 0x147   : > { %v628_v44 = vpop.permute.xlu0 %627  ;;  %v4289_v2 = vpop.permute.xlu1 %1820 }
 0x148   : > { %5154 = vst [vmem:[#allocation57_spill] sm:$0xff] %v4289_v2  ;;  %v4292_v39 = vmul.f32 %v628_v44, %v4145_v40 }
 0x14b   : > { %v638_v31 = vpop.permute.xlu0 %637 }
 0x14c   : > { %v4295_v1 = vmul.f32 %v638_v31, %v4159_v51  ;;  %v4297_v26 = vpop.permute.xlu1 %1862 }
 0x14d   : > { %5155 = vst [vmem:[#allocation58_spill] sm:$0xff] %v4297_v26 }
 0x14f   : > { %v648_v14 = vpop.permute.xlu0 %647 }
 0x150   : > { %v4300_v54 = vmul.f32 %v648_v14, %v4145_v40 }
 0x151   : > { %v4302_v13 = vpop.permute.xlu1 %1825 }
 0x152   : > { %5156 = vst [vmem:[#allocation59_spill] sm:$0xff] %v4302_v13 }
 0x156   : > { %v4304_v20 = vpop.permute.xlu1 %1866 }
 0x157   : > { %5157 = vst [vmem:[#allocation60_spill] sm:$0xff] %v4304_v20 }
 0x15a   : > { %v4306_v7 = vpop.permute.xlu1 %1870 }
 0x15b   : > { %5158 = vst [vmem:[#allocation61_spill] sm:$0xff] %v4306_v7 }
 0x15f   : > { %v4308_v2 = vpop.permute.xlu1 %1983 }
 0x160   : > { %5159 = vst [vmem:[#allocation62_spill] sm:$0xff] %v4308_v2 }
 0x163   : > { %v4310_v44 = vpop.permute.xlu1 %1993 }
 0x164   : > { %5160 = vst [vmem:[#allocation63_spill] sm:$0xff] %v4310_v44 }
 0x167   : > { %v4312_v43 = vpop.permute.xlu1 %2003 }
 0x168   : > { %5161 = vst [vmem:[#allocation64_spill] sm:$0xff] %v4312_v43 }
 0x16b   : > { %v4314_v31 = vpop.permute.xlu1 %2013 }
 0x16c   : > { %5162 = vst [vmem:[#allocation65_spill] sm:$0xff] %v4314_v31 }
 0x16f   : > { %v4316_v59 = vpop.permute.xlu1 %2229 }
 0x170   : > { %5163 = vst [vmem:[#allocation66_spill] sm:$0xff] %v4316_v59 }
 0x174   : > { %v4318_v26 = vpop.permute.xlu1 %2275 }
 0x175   : > { %5164 = vst [vmem:[#allocation67_spill] sm:$0xff] %v4318_v26 }
 0x179   : > { %v4320_v40 = vpop.permute.xlu1 %2234 }
 0x17a   : > { %5165 = vst [vmem:[#allocation68_spill] sm:$0xff] %v4320_v40 }
 0x17e   : > { %v4322_v14 = vpop.permute.xlu1 %2279 }
 0x17f   : > { %5166 = vst [vmem:[#allocation69_spill] sm:$0xff] %v4322_v14 }
 0x182   : > { %v4324_v13 = vpop.permute.xlu1 %2283 }
 0x183   : > { %5167 = vst [vmem:[#allocation70_spill] sm:$0xff] %v4324_v13 }
 0x187   : > { %v4326_v20 = vpop.permute.xlu1 %2249 }
 0x188   : > { %5168 = vst [vmem:[#allocation71_spill] sm:$0xff] %v4326_v20 }
 0x18c   : > { %v4328_v7 = vpop.permute.xlu1 %2291 }
 0x18d   : > { %5169 = vst [vmem:[#allocation72_spill] sm:$0xff] %v4328_v7 }
 0x191   : > { %v4330_v2 = vpop.permute.xlu1 %2254 }
 0x192   : > { %5170 = vst [vmem:[#allocation73_spill] sm:$0xff] %v4330_v2  ;;  %v4348_v2 = vpop.f32.mrb[4].mxu0 }
 0x196   : > { %v4332_v44 = vpop.permute.xlu1 %2295 }
 0x197   : > { %5171 = vst [vmem:[#allocation74_spill] sm:$0xff] %v4332_v44  ;;  %v4350_v44 = vpop.f32.mrb[5].mxu0 }
 0x19a   : > { %v4334_v43 = vpop.permute.xlu1 %2299 }
 0x19b   : > { %5172 = vst [vmem:[#allocation75_spill] sm:$0xff] %v4334_v43  ;;  %v4352_v43 = vpop.f32.mrb[6].mxu0 }
 0x19f   : > { %v633_v31 = vpop.permute.xlu1 %632 }
 0x1a0   : > { %v4337_v59 = vmul.f32 %v4141_v37, %v633_v31  ;;  %v4354_v31 = vpop.f32.mrb[7].mxu0 }
 0x1a3   : > { %v643_v26 = vpop.permute.xlu1 %642 }
 0x1a4   : > { %v4340_v40 = vmul.f32 %v4157_v48, %v643_v26  ;;  %v2981_v26 = vld [vmem:[%s5091_s3 + $0x40] sm:$0xff] }
 0x1a5   : > { %3355 = vmatprep.mubr.msk.f32.mxu1 %vm331_vm0, %v2981_v26  ;;  %v3013_v26 = vld [vmem:[%s5093_s5 + $0x80] sm:$0xff] }
 0x1a6   : > { %1475 = vperm.xlu0 %3626, %v3013_v26  }
 0x1a7   : > { %v653_v14 = vpop.permute.xlu1 %652 }
 0x1a8   : > { %v4343_v13 = vmul.f32 %v4141_v37, %v653_v14  ;;  %v307_v37 = vld [vmem:[%s5090_s2 + $0x40] sm:$0xff]  ;;  %v3014_v14 = vld [vmem:[%s5093_s5 + $0x88] sm:$0xff] }
 0x1a9   : > { %3287 = vmatprep.mubr.msk.f32.mxu0 %vm331_vm0, %v307_v37  ;;  %1480 = vperm.xlu1 %3630, %v3014_v14   ;;  %v3016_v37 = vld [vmem:[%s5093_s5 + $0x98] sm:$0xff] }
 0x1aa   : > { %1485 = vperm.xlu0 %3626, %v3015_v52   ;;  %v3020_v14 = vld [vmem:[%s5093_s5 + $0xb8] sm:$0xff] }
 0x1ab   : > { %v663_v20 = vpop.permute.xlu1 %662 }
 0x1ac   : > { %v4346_v7 = vmul.f32 %v4157_v48, %v663_v20  ;;  %v308_v20 = vld [vmem:[%s5090_s2 + $0x48] sm:$0xff]  ;;  %v309_v48 = vld [vmem:[%s5090_s2 + $0x50] sm:$0xff] }
 0x1ad   : > { %3288 = vmatmul.mubr.msk.f32.gmra.mrb[8].mxu0 %vm331_vm0, %v308_v20  ;;  %1490 = vperm.xlu1 %3630, %v3016_v37   ;;  %v3018_v20 = vld [vmem:[%s5093_s5 + $0xa8] sm:$0xff] }
 0x1ae   : > { %3290 = vmatprep.mubr.msk.f32.mxu0 %vm331_vm0, %v309_v48  ;;  %v3017_v48 = vld [vmem:[%s5093_s5 + $0xa0] sm:$0xff] }
 0x1af   : > { %1495 = vperm.xlu0 %3626, %v3017_v48  }
 0x1b1   : > { %3291 = vmatmul.mubr.msk.f32.gmra.mrb[10].mxu0 %vm331_vm0, %v310_v27  ;;  %1500 = vperm.xlu1 %3630, %v3018_v20   ;;  %v3019_v27 = vld [vmem:[%s5093_s5 + $0xb0] sm:$0xff] }
 0x1b3   : > { %1505 = vperm.xlu0 %3626, %v3019_v27  }
 0x1b5   : > { %1510 = vperm.xlu1 %3630, %v3020_v14  }
 0x1ec   : > { %v3329_v52 = vpop.f32.mrb[0].mxu1 }
 0x1ed   : > { %v825_v26 = vadd.f32 %v3329_v52, %v3964_v4  ;;  %v819_v37 = vpop.f32.mrb[1].mxu1 }
 0x1ee   : > { %v820_v57 = vadd.f32 %v819_v37, %v3958_v63 }
 0x1f0   : > { %v858_v21 = vadd.f32 %v825_v26, %v820_v57  ;;  %v3332_v3 = vpop.f32.mrb[2].mxu1 }
 0x1f1   : > { %v829_v20 = vpop.f32.mrb[3].mxu1  ;;  %v835_v61 = vadd.f32 %v3332_v3, %v3966_v5 }
 0x1f2   : > { %v830_v48 = vadd.f32 %v829_v20, %v3960_v0 }
 0x1f4   : > { %v859_v45 = vadd.f32 %v858_v21, %v830_v48  ;;  %v3335_v30 = vpop.f32.mrb[4].mxu1 }
 0x1f5   : > { %v845_v34 = vadd.f32 %v3335_v30, %v3972_v9  ;;  %v839_v49 = vpop.f32.mrb[5].mxu1 }
 0x1f6   : > { %v860_v14 = vadd.f32 %v859_v45, %v835_v61  ;;  %v840_v27 = vadd.f32 %v839_v49, %v3970_v8 }
 0x1f8   : > { %v861_v10 = vrot.slane %v860_v14, 4  ;;  %v893_v4 = vadd.f32 %v845_v34, %v840_v27  ;;  %v3338_v52 = vpop.f32.mrb[6].mxu1 }
 0x1f9   : > { %v849_v16 = vpop.f32.mrb[7].mxu1  ;;  %v855_v0 = vadd.f32 %v3338_v52, %v3977_v12 }
 0x1fa   : > { %v862_v63 = vadd.f32 %v861_v10, %v860_v14  ;;  %v850_v37 = vadd.f32 %v849_v16, %v3975_v11 }
 0x1fc   : > { %v863_v58 = vrot.slane %v862_v63, 2  ;;  %v894_v20 = vadd.f32 %v893_v4, %v850_v37 }
 0x1fe   : > { %v864_v5 = vadd.f32 %v863_v58, %v862_v63  ;;  %v895_v3 = vadd.f32 %v894_v20, %v855_v0 }
 0x200   : > { %v865_v21 = vrot.slane %v864_v5, 1  ;;  %v896_v55 = vrot.slane %v895_v3, 4 }
 0x202   : > { %v866_v9 = vadd.f32 %v865_v21, %v864_v5  ;;  %v897_v30 = vadd.f32 %v896_v55, %v895_v3 }
 0x204   : > { %v868_v45 = vmul.f32 0.03125, %v866_v9  ;;  %v898_v6 = vrot.slane %v897_v30, 2 }
 0x206   : > { %v869_v8 = vsub.f32 %v820_v57, %v868_v45  ;;  %v870_v49 = vsub.f32 %v825_v26, %v868_v45  ;;  %v871_v62 = vsub.f32 %v830_v48, %v868_v45  ;;  %v872_v46 = vsub.f32 %v835_v61, %v868_v45 }
 0x207   : > { %v899_v41 = vadd.f32 %v898_v6, %v897_v30 }
 0x208   : > { %v873_v10 = vmul.f32 %v869_v8, %v869_v8  ;;  %v874_v14 = vmul.f32 %v870_v49, %v870_v49  ;;  %v875_v16 = vmul.f32 %v871_v62, %v871_v62  ;;  %v876_v4 = vmul.f32 %v872_v46, %v872_v46 }
 0x209   : > { %v900_v11 = vrot.slane %v899_v41, 1 }
 0x20a   : > { %v877_v60 = vadd.f32 %v874_v14, %v873_v10 }
 0x20b   : > { %v901_v12 = vadd.f32 %v900_v11, %v899_v41 }
 0x20c   : > { %v878_v58 = vadd.f32 %v877_v60, %v875_v16 }
 0x20d   : > { %v902_v52 = vmul.f32 0.03125, %v901_v12 }
 0x20e   : > { %v879_v63 = vadd.f32 %v878_v58, %v876_v4  ;;  %v4408_v4 = vpop.permute.xlu0 %657 }
 0x20f   : > { %v903_v20 = vsub.f32 %v840_v27, %v902_v52  ;;  %v904_v5 = vsub.f32 %v845_v34, %v902_v52  ;;  %v905_v55 = vsub.f32 %v850_v37, %v902_v52  ;;  %v906_v3 = vsub.f32 %v855_v0, %v902_v52 }
 0x210   : > { %v880_v21 = vrot.slane %v879_v63, 4 }
 0x211   : > { %v907_v57 = vmul.f32 %v903_v20, %v903_v20  ;;  %v908_v26 = vmul.f32 %v904_v5, %v904_v5  ;;  %v909_v61 = vmul.f32 %v905_v55, %v905_v55  ;;  %v910_v30 = vmul.f32 %v906_v3, %v906_v3 }
 0x212   : > { %v881_v48 = vadd.f32 %v880_v21, %v879_v63  ;;  %v1052_v63 = vpop.permute.xlu1 %1051  ;;  %v1047_v21 = vpop.permute.xlu0 %1046 }
 0x213   : > { %v911_v6 = vadd.f32 %v908_v26, %v907_v57 }
 0x214   : > { %v882_v9 = vrot.slane %v881_v48, 2 }
 0x215   : > { %v912_v45 = vadd.f32 %v911_v6, %v909_v61 }
 0x216   : > { %v883_v56 = vadd.f32 %v882_v9, %v881_v48 }
 0x217   : > { %v913_v10 = vadd.f32 %v912_v45, %v910_v30 }
 0x218   : > { %v884_v41 = vrot.slane %v883_v56, 1 }
 0x219   : > { %v914_v14 = vrot.slane %v913_v10, 4 }
 0x21a   : > { %v885_v60 = vadd.f32 %v884_v41, %v883_v56  ;;  %v1057_v41 = vpop.permute.xlu0 %1056 }
 0x21b   : > { %v915_v11 = vadd.f32 %v914_v14, %v913_v10  ;;  %v1062_v10 = vpop.permute.xlu1 %1061 }
 0x21c   : > { %v886_v16 = vmul.f32 0.03125, %v885_v60 }
 0x21d   : > { %v916_v27 = vrot.slane %v915_v11, 2 }
 0x21e   : > { %v887_v34 = vadd.f32 1e-05, %v886_v16 }
 0x21f   : > { %v917_v37 = vadd.f32 %v916_v27, %v915_v11 }
 0x220   : > { %3637 = vrsqrt.f32 %v887_v34 }
 0x221   : > { %v918_v0 = vrot.slane %v917_v37, 1 }
 0x223   : > { %v919_v12 = vadd.f32 %v918_v0, %v917_v37  ;;  %v1067_v0 = vpop.permute.xlu0 %1066 }
 0x225   : > { %v920_v58 = vmul.f32 0.03125, %v919_v12 }
 0x227   : > { %v921_v52 = vadd.f32 1e-05, %v920_v58 }
 0x229   : > { %3639 = vrsqrt.f32 %v921_v52 }
 0x22a   : > { %v3638_v57 = vpop.eup %3637 }
 0x22b   : > { %v891_v26 = vmul.f32 %v3638_v57, %v871_v62  ;;  %v890_v48 = vmul.f32 %v3638_v57, %v870_v49  ;;  %v889_v61 = vmul.f32 %v3638_v57, %v869_v8  ;;  %v892_v56 = vmul.f32 %v3638_v57, %v872_v46 }
 0x22d   : > { %v976_v6 = vmul.f32 %v3986_v15, %v890_v48  ;;  %v975_v9 = vmul.f32 %v4008_v22, %v889_v61  ;;  %v978_v30 = vmul.f32 %v4013_v24, %v892_v56  ;;  %v977_v45 = vmul.f32 %v4010_v23, %v891_v26 }
 0x22f   : > { %v1016_v14 = vadd.f32 %v3996_v19, %v976_v6  ;;  %v1015_v60 = vadd.f32 %v3991_v17, %v975_v9  ;;  %v1018_v11 = vadd.f32 %v4025_v29, %v978_v30  ;;  %v1017_v62 = vadd.f32 %v4016_v25, %v977_v45  ;;  %v1072_v29 = vpop.permute.xlu1 %1071  ;;  %v2987_v6 = vld [vmem:[%s5091_s3 + $0x70] sm:$0xff]  ;;  %v2988_v9 = vld [vmem:[%s5091_s3 + $0x78] sm:$0xff] }
 0x231   : > { %v1028_v46 = vmul.f32 %v4348_v2, %v1016_v14  ;;  %v1027_v15 = vmul.f32 %v1015_v60, %v4350_v44  ;;  %v1030_v22 = vmul.f32 %v4352_v43, %v1018_v11  ;;  %v1029_v24 = vmul.f32 %v1017_v62, %v4354_v31  ;;  %v3021_v14 = vld [vmem:[%s5091_s3 + $0x80] sm:$0xff]  ;;  %v312_v11 = vld [vmem:[%s5090_s2 + $0x68] sm:$0xff]  ;;  %v313_v62 = vld [vmem:[%s5090_s2 + $0x70] sm:$0xff] }
 0x232   : > { %v311_v60 = vld [vmem:[%s5090_s2 + $0x60] sm:$0xff] }
 0x233   : > { %v3640_v8 = vpop.eup %3639  ;;  %v1085_v23 = vmul.f32 %v1052_v63, %v1028_v46  ;;  %v1084_v49 = vmul.f32 %v1047_v21, %v1027_v15  ;;  %v3483_v16 = vpack.c.bf16 %v1028_v46, %v1027_v15  ;;  %v3487_v27 = vpack.c.bf16 %v1030_v22, %v1029_v24  ;;  %v1082_v26 = vpop.permute.xlu1 %1081  ;;  %3293 = vmatprep.mubr.msk.f32.mxu0 %vm331_vm0, %v311_v60  ;;  %v3054_v46 = vld [vmem:[%s5093_s5 + $0xc8] sm:$0xff]  ;;  %v3053_v15 = vld [vmem:[%s5093_s5 + $0xc0] sm:$0xff] }
 0x234   : > { %v925_v19 = vmul.f32 %v3640_v8, %v905_v55  ;;  %v924_v34 = vmul.f32 %v3640_v8, %v904_v5  ;;  %v923_v17 = vmul.f32 %v3640_v8, %v903_v20  ;;  %v926_v37 = vmul.f32 %v3640_v8, %v906_v3  ;;  %3294 = vmatmul.mubr.msk.f32.gmra.mrb[12].mxu0 %vm331_vm0, %v312_v11  ;;  %v3055_v8 = vld [vmem:[%s5093_s5 + $0xd0] sm:$0xff] }
 0x235   : > { %v4423_v25 = vadd.f32 %v1085_v23, %v4337_v59  ;;  %v4426_v12 = vadd.f32 %v1084_v49, %v4292_v39  ;;  %v1087_v58 = vmul.f32 %v1062_v10, %v1030_v22  ;;  %v1086_v52 = vmul.f32 %v1057_v41, %v1029_v24  ;;  %3484 = vmatprep.subr.bf16.mxu1 %v3483_v16  ;;  %v314_v22 = vld [vmem:[%s5090_s2 + $0x78] sm:$0xff]  ;;  %v3058_v23 = vld [vmem:[%s5093_s5 + $0xe8] sm:$0xff]  ;;  %v3057_v49 = vld [vmem:[%s5093_s5 + $0xe0] sm:$0xff] }
 0x236   : > { %v980_v63 = vmul.f32 %v4038_v33, %v924_v34  ;;  %v979_v21 = vmul.f32 %v4023_v28, %v923_v17  ;;  %v982_v55 = vmul.f32 %v4035_v32, %v926_v37  ;;  %v981_v20 = vmul.f32 %v4062_v42, %v925_v19  ;;  %3486 = vmatpush3.bf16.msra.mxu1 %v3483_v16  ;;  %v3056_v24 = vld [vmem:[%s5093_s5 + $0xd8] sm:$0xff] }
 0x237   : > { %v4433_v5 = vadd.f32 %v1087_v58, %v4340_v40  ;;  %v4436_v59 = vadd.f32 %v1086_v52, %v4295_v1  ;;  %3488 = vmatprep.subr.bf16.mxu1 %v3487_v27  ;;  %v1077_v1 = vpop.permute.xlu0 %1076  ;;  %1909 = vperm.xlu1 %3630, %v3054_v46   ;;  %v3060_v16 = vld [vmem:[%s5093_s5 + $0xf8] sm:$0xff] }
 0x238   : > { %v1020_v39 = vadd.f32 %v4046_v36, %v980_v63  ;;  %v1019_v3 = vadd.f32 %v3994_v18, %v979_v21  ;;  %v1022_v33 = vadd.f32 %v4086_v50, %v982_v55  ;;  %v1021_v28 = vadd.f32 %v4077_v47, %v981_v20  ;;  %3296 = vmatprep.mubr.msk.f32.mxu0 %vm331_vm0, %v313_v62  ;;  %v5173_v63 = vld [vmem:[#allocation12_spill] sm:$0xff] }
 0x239   : > { %v671_v18 = vmul.f32 %v4408_v4, %v4159_v51  ;;  %v2982_v51 = vld [vmem:[%s5091_s3 + $0x48] sm:$0xff]  ;;  %1904 = vperm.xlu0 %3626, %v3053_v15   ;;  %3297 = vmatmul.mubr.msk.f32.gmra.mrb[14].mxu0 %vm331_vm0, %v314_v22 }
 0x23a   : > { %v1032_v32 = vmul.f32 %v4348_v2, %v1020_v39  ;;  %v1031_v42 = vmul.f32 %v1019_v3, %v4350_v44  ;;  %v1034_v57 = vmul.f32 %v4352_v43, %v1022_v33  ;;  %v1033_v40 = vmul.f32 %v1021_v28, %v4354_v31  ;;  %3490 = vmatpush3.bf16.msra.mxu1 %v3487_v27  ;;  %v2986_v4 = vld [vmem:[%s5091_s3 + $0x68] sm:$0xff]  ;;  %v3059_v27 = vld [vmem:[%s5093_s5 + $0xf0] sm:$0xff]  ;;  %v5174_v39 = vld [vmem:[#allocation14_spill] sm:$0xff] }
 0x23b   : > { %1919 = vperm.xlu1 %3630, %v3056_v24  }
 0x23c   : > { %v3491_v48 = vpack.c.bf16 %v1032_v32, %v1031_v42  ;;  %v3495_v61 = vpack.c.bf16 %v1034_v57, %v1033_v40  ;;  %v1089_v36 = vmul.f32 %v1072_v29, %v1032_v32  ;;  %v1088_v56 = vmul.f32 %v1067_v0, %v1031_v42  ;;  %v5175_v32 = vld [vmem:[#allocation7_spill] sm:$0xff] }
 0x23d   : > { %v1091_v50 = vmul.f32 %v1082_v26, %v1034_v57  ;;  %v1090_v47 = vmul.f32 %v1077_v1, %v1033_v40  ;;  %1914 = vperm.xlu0 %3626, %v3055_v8   ;;  %v5176_v1 = vld [vmem:[#allocation8_spill] sm:$0xff] }
 0x23e   : > { %v4449_v2 = vadd.f32 %v1089_v36, %v4343_v13  ;;  %v4452_v44 = vadd.f32 %v1088_v56, %v4300_v54  ;;  %3492 = vmatprep.subr.bf16.mxu1 %v3491_v48  ;;  %v2983_v13 = vld [vmem:[%s5091_s3 + $0x50] sm:$0xff]  ;;  %v2985_v54 = vld [vmem:[%s5091_s3 + $0x60] sm:$0xff] }
 0x23f   : > { %v4455_v43 = vadd.f32 %v1091_v50, %v4346_v7  ;;  %v4457_v31 = vadd.f32 %v1090_v47, %v671_v18  ;;  %3494 = vmatpush3.bf16.msra.mxu1 %v3491_v48  ;;  %v2984_v7 = vld [vmem:[%s5091_s3 + $0x58] sm:$0xff]  ;;  %1929 = vperm.xlu1 %3630, %v3058_v23   ;;  %v5177_v36 = vld [vmem:[#allocation16_spill] sm:$0xff] }
 0x240   : > { %3496 = vmatprep.subr.bf16.mxu1 %v3495_v61 }
 0x241   : > { %1924 = vperm.xlu0 %3626, %v3057_v49  }
 0x243   : > { %3498 = vmatpush3.bf16.msra.mxu1 %v3495_v61  ;;  %1939 = vperm.xlu1 %3630, %v3060_v16  }
 0x245   : > { %1934 = vperm.xlu0 %3626, %v3059_v27  }
 0x246   : > { %3356 = vmatmul.mubr.msk.f32.vlgmr.msra.gmra.mrb[8].mxu1 %vm331_vm0, %v2982_v51 }
 0x247   : > { %3358 = vmatprep.mubr.msk.f32.mxu1 %vm331_vm0, %v2983_v13 }
 0x24a   : > { %3359 = vmatmul.mubr.msk.f32.gmra.mrb[10].mxu1 %vm331_vm0, %v2984_v7 }
 0x24b   : > { %3361 = vmatprep.mubr.msk.f32.mxu1 %vm331_vm0, %v2985_v54 }
 0x24e   : > { %3362 = vmatmul.mubr.msk.f32.gmra.mrb[12].mxu1 %vm331_vm0, %v2986_v4 }
 0x24f   : > { %3364 = vmatprep.mubr.msk.f32.mxu1 %vm331_vm0, %v2987_v6 }
 0x252   : > { %3365 = vmatmul.mubr.msk.f32.gmra.mrb[14].mxu1 %vm331_vm0, %v2988_v9 }
 0x253   : > { %3383 = vmatprep.mubr.msk.f32.mxu1 %vm331_vm0, %v3021_v14 }
 0x280   : > { %v4487_v30 = vpop.f32.mrb[8].mxu0 }
 0x281   : > { %v4489_v45 = vpop.f32.mrb[9].mxu0 }
 0x284   : > { %v4491_v10 = vpop.f32.mrb[10].mxu0 }
 0x285   : > { %v4493_v41 = vpop.f32.mrb[11].mxu0 }
 0x319   : > { %v3357_v19 = vpop.f32.mrb[8].mxu1 }
 0x31a   : > { %v1254_v34 = vadd.f32 %v3357_v19, %v4094_v53  ;;  %v1248_v17 = vpop.f32.mrb[9].mxu1 }
 0x31b   : > { %v1249_v37 = vadd.f32 %v1248_v17, %v4043_v35 }
 0x31d   : > { %v1287_v29 = vadd.f32 %v1254_v34, %v1249_v37  ;;  %v3360_v0 = vpop.f32.mrb[10].mxu1 }
 0x31e   : > { %v1258_v58 = vpop.f32.mrb[11].mxu1  ;;  %v1264_v21 = vadd.f32 %v3360_v0, %v5173_v63 }
 0x31f   : > { %v1259_v52 = vadd.f32 %v1258_v58, %v4051_v38 }
 0x321   : > { %v1288_v55 = vadd.f32 %v1287_v29, %v1259_v52  ;;  %v3363_v20 = vpop.f32.mrb[12].mxu1 }
 0x322   : > { %v1274_v3 = vadd.f32 %v3363_v20, %v5174_v39  ;;  %v1268_v33 = vpop.f32.mrb[13].mxu1 }
 0x323   : > { %v1289_v28 = vadd.f32 %v1288_v55, %v1264_v21  ;;  %v1269_v42 = vadd.f32 %v1268_v33, %v5175_v32 }
 0x325   : > { %v1290_v57 = vrot.slane %v1289_v28, 4  ;;  %v1321_v53 = vadd.f32 %v1274_v3, %v1269_v42  ;;  %v3366_v40 = vpop.f32.mrb[14].mxu1 }
 0x326   : > { %v1278_v26 = vpop.f32.mrb[15].mxu1  ;;  %v1284_v38 = vadd.f32 %v3366_v40, %v5177_v36 }
 0x327   : > { %v1291_v35 = vadd.f32 %v1290_v57, %v1289_v28  ;;  %v1279_v48 = vadd.f32 %v1278_v26, %v5176_v1 }
 0x329   : > { %v1292_v61 = vrot.slane %v1291_v35, 2  ;;  %v1322_v56 = vadd.f32 %v1321_v53, %v1279_v48 }
 0x32b   : > { %v1293_v18 = vadd.f32 %v1292_v61, %v1291_v35  ;;  %v1323_v50 = vadd.f32 %v1322_v56, %v1284_v38  ;;  %v1476_v56 = vpop.permute.xlu0 %1475 }
 0x32d   : > { %v1294_v47 = vrot.slane %v1293_v18, 1  ;;  %v1324_v51 = vrot.slane %v1323_v50, 4 }
 0x32f   : > { %v1295_v13 = vadd.f32 %v1294_v47, %v1293_v18  ;;  %v1325_v7 = vadd.f32 %v1324_v51, %v1323_v50 }
 0x331   : > { %v1296_v54 = vmul.f32 0.03125, %v1295_v13  ;;  %v1326_v4 = vrot.slane %v1325_v7, 2 }
 0x333   : > { %v1297_v6 = vsub.f32 %v1249_v37, %v1296_v54  ;;  %v1298_v9 = vsub.f32 %v1254_v34, %v1296_v54  ;;  %v1299_v14 = vsub.f32 %v1259_v52, %v1296_v54  ;;  %v1300_v60 = vsub.f32 %v1264_v21, %v1296_v54 }
 0x334   : > { %v1327_v11 = vadd.f32 %v1326_v4, %v1325_v7  ;;  %v5178_v7 = vld [vmem:[#allocation18_spill] sm:$0xff]  ;;  %v5179_v4 = vld [vmem:[#allocation11_spill] sm:$0xff] }
 0x335   : > { %v1301_v62 = vmul.f32 %v1297_v6, %v1297_v6  ;;  %v1302_v46 = vmul.f32 %v1298_v9, %v1298_v9  ;;  %v1303_v22 = vmul.f32 %v1299_v14, %v1299_v14  ;;  %v1304_v23 = vmul.f32 %v1300_v60, %v1300_v60 }
 0x336   : > { %v1328_v15 = vrot.slane %v1327_v11, 1 }
 0x337   : > { %v1305_v24 = vadd.f32 %v1302_v46, %v1301_v62  ;;  %v5180_v62 = vld [vmem:[#allocation13_spill] sm:$0xff] }
 0x338   : > { %v1329_v8 = vadd.f32 %v1328_v15, %v1327_v11  ;;  %v5181_v15 = vld [vmem:[#allocation22_spill] sm:$0xff] }
 0x339   : > { %v1306_v49 = vadd.f32 %v1305_v24, %v1303_v22 }
 0x33a   : > { %v1330_v16 = vmul.f32 0.03125, %v1329_v8  ;;  %v1486_v8 = vpop.permute.xlu0 %1485 }
 0x33b   : > { %v1307_v27 = vadd.f32 %v1306_v49, %v1304_v23  ;;  %v5182_v23 = vld [vmem:[#allocation20_spill] sm:$0xff] }
 0x33c   : > { %v1331_v19 = vsub.f32 %v1269_v42, %v1330_v16  ;;  %v1332_v17 = vsub.f32 %v1274_v3, %v1330_v16  ;;  %v1333_v29 = vsub.f32 %v1279_v48, %v1330_v16  ;;  %v1334_v0 = vsub.f32 %v1284_v38, %v1330_v16  ;;  %v1481_v38 = vpop.permute.xlu1 %1480  ;;  %v5183_v16 = vld [vmem:[#allocation9_spill] sm:$0xff] }
 0x33d   : > { %v1308_v58 = vrot.slane %v1307_v27, 4 }
 0x33e   : > { %v1335_v37 = vmul.f32 %v1331_v19, %v1331_v19  ;;  %v1336_v34 = vmul.f32 %v1332_v17, %v1332_v17  ;;  %v1337_v63 = vmul.f32 %v1333_v29, %v1333_v29  ;;  %v1338_v20 = vmul.f32 %v1334_v0, %v1334_v0 }
 0x33f   : > { %v1309_v52 = vadd.f32 %v1308_v58, %v1307_v27  ;;  %v5184_v58 = vld [vmem:[#allocation26_spill] sm:$0xff] }
 0x340   : > { %v1339_v21 = vadd.f32 %v1336_v34, %v1335_v37  ;;  %v1491_v24 = vpop.permute.xlu1 %1490 }
 0x341   : > { %v1310_v55 = vrot.slane %v1309_v52, 2 }
 0x342   : > { %v1340_v39 = vadd.f32 %v1339_v21, %v1337_v63 }
 0x343   : > { %v1311_v33 = vadd.f32 %v1310_v55, %v1309_v52 }
 0x344   : > { %v1341_v28 = vadd.f32 %v1340_v39, %v1338_v20 }
 0x345   : > { %v1312_v32 = vrot.slane %v1311_v33, 1 }
 0x346   : > { %v1342_v57 = vrot.slane %v1341_v28, 4 }
 0x347   : > { %v1313_v53 = vadd.f32 %v1312_v32, %v1311_v33 }
 0x348   : > { %v1343_v40 = vadd.f32 %v1342_v57, %v1341_v28 }
 0x349   : > { %v1314_v26 = vmul.f32 0.03125, %v1313_v53  ;;  %v1501_v53 = vpop.permute.xlu1 %1500 }
 0x34a   : > { %v1344_v42 = vrot.slane %v1343_v40, 2 }
 0x34b   : > { %v1315_v3 = vadd.f32 1e-05, %v1314_v26 }
 0x34c   : > { %v1345_v35 = vadd.f32 %v1344_v42, %v1343_v40  ;;  %v1496_v40 = vpop.permute.xlu0 %1495 }
 0x34d   : > { %3641 = vrsqrt.f32 %v1315_v3 }
 0x34e   : > { %v1346_v1 = vrot.slane %v1345_v35, 1 }
 0x350   : > { %v1347_v48 = vadd.f32 %v1346_v1, %v1345_v35  ;;  %v5186_v1 = vld [vmem:[#allocation28_spill] sm:$0xff] }
 0x352   : > { %v1348_v61 = vmul.f32 0.03125, %v1347_v48 }
 0x354   : > { %v1349_v36 = vadd.f32 1e-05, %v1348_v61  ;;  %v5187_v61 = vld [vmem:[#allocation15_spill] sm:$0xff] }
 0x356   : > { %3643 = vrsqrt.f32 %v1349_v36 }
 0x357   : > { %v3642_v18 = vpop.eup %3641 }
 0x358   : > { %v1319_v50 = vmul.f32 %v3642_v18, %v1299_v14  ;;  %v1318_v47 = vmul.f32 %v3642_v18, %v1298_v9  ;;  %v1317_v51 = vmul.f32 %v3642_v18, %v1297_v6  ;;  %v1320_v13 = vmul.f32 %v3642_v18, %v1300_v60  ;;  %v5185_v14 = vld [vmem:[#allocation24_spill] sm:$0xff]  ;;  %v5191_v18 = vld [vmem:[#allocation10_spill] sm:$0xff] }
 0x35a   : > { %v1405_v54 = vmul.f32 %v5178_v7, %v1318_v47  ;;  %v1404_v11 = vmul.f32 %v5179_v4, %v1317_v51  ;;  %v1407_v46 = vmul.f32 %v5180_v62, %v1320_v13  ;;  %v1406_v22 = vmul.f32 %v5181_v15, %v1319_v50  ;;  %v5192_v47 = vld [vmem:[#allocation37_spill] sm:$0xff]  ;;  %v5193_v13 = vld [vmem:[#allocation35_spill] sm:$0xff]  ;;  %v1511_v62 = vpop.permute.xlu1 %1510 }
 0x35c   : > { %v1445_v49 = vadd.f32 %v5182_v23, %v1405_v54  ;;  %v1444_v27 = vadd.f32 %v5183_v16, %v1404_v11  ;;  %v1447_v37 = vadd.f32 %v5184_v58, %v1407_v46  ;;  %v1446_v9 = vadd.f32 %v5185_v14, %v1406_v22  ;;  %v3027_v16 = vld [vmem:[%s5091_s3 + $0xb0] sm:$0xff]  ;;  %v4623_v58 = vpop.f32.mrb[12].mxu0 }
 0x35e   : > { %v1457_v6 = vmul.f32 %v4487_v30, %v1445_v49  ;;  %v1456_v60 = vmul.f32 %v1444_v27, %v4489_v45  ;;  %v1459_v34 = vmul.f32 %v4491_v10, %v1447_v37  ;;  %v1458_v52 = vmul.f32 %v1446_v9, %v4493_v41  ;;  %v3028_v27 = vld [vmem:[%s5091_s3 + $0xb8] sm:$0xff]  ;;  %v4625_v37 = vpop.f32.mrb[13].mxu0 }
 0x35f   : > { %v4627_v14 = vpop.f32.mrb[14].mxu0 }
 0x360   : > { %v3644_v63 = vpop.eup %3643  ;;  %v1514_v21 = vmul.f32 %v1481_v38, %v1457_v6  ;;  %v1513_v55 = vmul.f32 %v1476_v56, %v1456_v60  ;;  %v3499_v20 = vpack.c.bf16 %v1457_v6, %v1456_v60  ;;  %v3503_v39 = vpack.c.bf16 %v1459_v34, %v1458_v52  ;;  %v5188_v38 = vld [vmem:[#allocation17_spill] sm:$0xff]  ;;  %v4629_v9 = vpop.f32.mrb[15].mxu0  ;;  %v315_v6 = vld [vmem:[%s5090_s2 + $0x80] sm:$0xff]  ;;  %v316_v60 = vld [vmem:[%s5090_s2 + $0x88] sm:$0xff] }
 0x361   : > { %v1353_v33 = vmul.f32 %v3644_v63, %v1333_v29  ;;  %v1352_v28 = vmul.f32 %v3644_v63, %v1332_v17  ;;  %v1351_v32 = vmul.f32 %v3644_v63, %v1331_v19  ;;  %v1354_v57 = vmul.f32 %v3644_v63, %v1334_v0  ;;  %v5189_v17 = vld [vmem:[#allocation33_spill] sm:$0xff]  ;;  %3299 = vmatprep.mubr.msk.f32.mxu0 %vm331_vm0, %v315_v6  ;;  %v319_v63 = vld [vmem:[%s5090_s2 + $0xa0] sm:$0xff] }
 0x362   : > { %v4560_v26 = vadd.f32 %v1514_v21, %v4423_v25  ;;  %v4563_v42 = vadd.f32 %v1513_v55, %v4426_v12  ;;  %v1516_v3 = vmul.f32 %v1491_v24, %v1459_v34  ;;  %v1515_v35 = vmul.f32 %v1486_v8, %v1458_v52  ;;  %3500 = vmatprep.subr.bf16.mxu1 %v3499_v20  ;;  %v5190_v12 = vld [vmem:[#allocation30_spill] sm:$0xff]  ;;  %v317_v34 = vld [vmem:[%s5090_s2 + $0x90] sm:$0xff]  ;;  %v320_v21 = vld [vmem:[%s5090_s2 + $0xa8] sm:$0xff] }
 0x363   : > { %v1409_v48 = vmul.f32 %v5186_v1, %v1352_v28  ;;  %v1408_v36 = vmul.f32 %v5187_v61, %v1351_v32  ;;  %v1411_v29 = vmul.f32 %v5188_v38, %v1354_v57  ;;  %v1410_v19 = vmul.f32 %v5189_v17, %v1353_v33  ;;  %3502 = vmatpush3.bf16.msra.mxu1 %v3499_v20  ;;  %v318_v52 = vld [vmem:[%s5090_s2 + $0x98] sm:$0xff]  ;;  %v321_v55 = vld [vmem:[%s5090_s2 + $0xb0] sm:$0xff]  ;;  %v3093_v33 = vld [vmem:[%s5093_s5 + $0x100] sm:$0xff] }
 0x364   : > { %v4570_v0 = vadd.f32 %v1516_v3, %v4433_v5  ;;  %v4573_v25 = vadd.f32 %v1515_v35, %v4436_v59  ;;  %3504 = vmatprep.subr.bf16.mxu1 %v3503_v39  ;;  %v1506_v59 = vpop.permute.xlu0 %1505  ;;  %3300 = vmatmul.mubr.msk.f32.gmra.mrb[16].mxu0 %vm331_vm0, %v316_v60  ;;  %v322_v20 = vld [vmem:[%s5090_s2 + $0xb8] sm:$0xff]  ;;  %v3094_v28 = vld [vmem:[%s5093_s5 + $0x108] sm:$0xff]  ;;  %v3109_v32 = vld [vmem:[%s3829_s24 + $0x100] sm:$0xff]  ;;  %v5194_v38 = vmov 1  }
 0x365   : > { %v1449_v56 = vadd.f32 %v5190_v12, %v1409_v48  ;;  %v1448_v50 = vadd.f32 %v5191_v18, %v1408_v36  ;;  %v1451_v51 = vadd.f32 %v5192_v47, %v1411_v29  ;;  %v1450_v7 = vadd.f32 %v5193_v13, %v1410_v19  ;;  %3302 = vmatprep.mubr.msk.f32.mxu0 %vm331_vm0, %v317_v34  ;;  %v3110_v57 = vld [vmem:[%s3829_s24 + $0x108] sm:$0xff]  ;;  %v3111_v3 = vld [vmem:[%s3829_s24 + $0x110] sm:$0xff]  ;;  %v3112_v1 = vld [vmem:[%s3829_s24 + $0x118] sm:$0xff] }
 0x366   : > { %2333 = vperm.xlu0 %3626, %v3093_v33   ;;  %2338 = vperm.xlu1 %3630, %v3094_v28   ;;  %v3115_v35 = vld [vmem:[%s3829_s24 + $0x130] sm:$0xff]  ;;  %v3116_v48 = vld [vmem:[%s3829_s24 + $0x138] sm:$0xff]  ;;  %v3125_v61 = vld [vmem:[%s5092_s4 + $0x100] sm:$0xff] }
 0x367   : > { %v1461_v54 = vmul.f32 %v4487_v30, %v1449_v56  ;;  %v1460_v4 = vmul.f32 %v1448_v50, %v4489_v45  ;;  %v1463_v11 = vmul.f32 %v4491_v10, %v1451_v51  ;;  %v1462_v5 = vmul.f32 %v1450_v7, %v4493_v41  ;;  %3506 = vmatpush3.bf16.msra.mxu1 %v3503_v39  ;;  %v3022_v41 = vld [vmem:[%s5091_s3 + $0x88] sm:$0xff]  ;;  %v3061_v39 = vld [vmem:[%s5091_s3 + $0xc0] sm:$0xff]  ;;  %v3096_v36 = vld [vmem:[%s5093_s5 + $0x118] sm:$0xff] }
 0x368   : > { %3303 = vmatmul.mubr.msk.f32.gmra.mrb[18].mxu0 %vm331_vm0, %v318_v52  ;;  %v4691_v29 = vld [vmem:[%s5092_s4 + $0x128] sm:$0xff]  ;;  %v4701_v50 = vld [vmem:[%s5092_s4 + $0x118] sm:$0xff] }
 0x369   : > { %v3507_v46 = vpack.c.bf16 %v1461_v54, %v1460_v4  ;;  %v3511_v15 = vpack.c.bf16 %v1463_v11, %v1462_v5  ;;  %v1518_v22 = vmul.f32 %v1501_v53, %v1461_v54  ;;  %v1517_v24 = vmul.f32 %v1496_v40, %v1460_v4  ;;  %3305 = vmatprep.mubr.msk.f32.mxu0 %vm331_vm0, %v319_v63  ;;  %v3113_v53 = vld [vmem:[%s3829_s24 + $0x120] sm:$0xff]  ;;  %v3114_v40 = vld [vmem:[%s3829_s24 + $0x128] sm:$0xff]  ;;  %v3100_v47 = vld [vmem:[%s5093_s5 + $0x138] sm:$0xff]  ;;  %s5046_s24 = scalar_lea.hbm %s5095_s7, %s3143_s15 }
 0x36a   : > { %v1520_v8 = vmul.f32 %v1511_v62, %v1463_v11  ;;  %v1519_v23 = vmul.f32 %v1506_v59, %v1462_v5  ;;  %2407 = vperm.xlu0 %3626, %v3109_v32   ;;  %2412 = vperm.xlu1 %3630, %v3110_v57   ;;  %v3098_v17 = vld [vmem:[%s5093_s5 + $0x128] sm:$0xff]  ;;  %v5197_v11 = vld [vmem:[#allocation21_spill] sm:$0xff] }
 0x36b   : > { %v4584_v49 = vadd.f32 %v1518_v22, %v4449_v2  ;;  %v4587_v30 = vadd.f32 %v1517_v24, %v4452_v44  ;;  %3508 = vmatprep.subr.bf16.mxu1 %v3507_v46  ;;  %v3023_v2 = vld [vmem:[%s5091_s3 + $0x90] sm:$0xff]  ;;  %v3024_v44 = vld [vmem:[%s5091_s3 + $0x98] sm:$0xff]  ;;  %v5195_v12 = vld [vmem:[#allocation39_spill] sm:$0xff]  ;;  %v5199_v24 = vmov 0  }
 0x36c   : > { %v4590_v45 = vadd.f32 %v1520_v8, %v4455_v43  ;;  %v4593_v10 = vadd.f32 %v1519_v23, %v4457_v31  ;;  %3510 = vmatpush3.bf16.msra.mxu1 %v3507_v46  ;;  %v3025_v43 = vld [vmem:[%s5091_s3 + $0xa0] sm:$0xff]  ;;  %v3026_v31 = vld [vmem:[%s5091_s3 + $0xa8] sm:$0xff]  ;;  %3306 = vmatmul.mubr.msk.f32.gmra.mrb[20].mxu0 %vm331_vm0, %v320_v21  ;;  %v3095_v62 = vld [vmem:[%s5093_s5 + $0x110] sm:$0xff] }
 0x36d   : > { %3512 = vmatprep.subr.bf16.mxu1 %v3511_v15  ;;  %3308 = vmatprep.mubr.msk.f32.mxu0 %vm331_vm0, %v321_v55  ;;  %v5196_v51 = vld [vmem:[#allocation19_spill] sm:$0xff]  ;;  %v5198_v59 = vld [vmem:[#allocation41_spill] sm:$0xff] }
 0x36e   : > { %2427 = vperm.xlu0 %3626, %v3113_v53   ;;  %2432 = vperm.xlu1 %3630, %v3114_v40   ;;  %v5200_v8 = vld [vmem:[#allocation43_spill] sm:$0xff]  ;;  %v5202_v52 = vld [vmem:[#allocation25_spill] sm:$0xff] }
 0x36f   : > { %v3099_v21 = vld [vmem:[%s5093_s5 + $0x130] sm:$0xff] }
 0x370   : > { %3514 = vmatpush3.bf16.msra.mxu1 %v3511_v15  ;;  %3309 = vmatmul.mubr.msk.f32.gmra.mrb[22].mxu0 %vm331_vm0, %v322_v20  ;;  %v5203_v20 = vld [vmem:[#allocation45_spill] sm:$0xff] }
 0x371   : > { %3411 = vmatprep.mubr.msk.f32.mxu0 %vm331_vm0, %v3061_v39 }
 0x372   : > { %2417 = vperm.xlu0 %3626, %v3111_v3   ;;  %2437 = vperm.xlu1 %3630, %v3115_v35  }
 0x373   : > { %3384 = vmatmul.mubr.msk.f32.vlgmr.msra.gmra.mrb[16].mxu1 %vm331_vm0, %v3022_v41 }
 0x374   : > { %3386 = vmatprep.mubr.msk.f32.mxu1 %vm331_vm0, %v3023_v2 }
 0x376   : > { %2422 = vperm.xlu0 %3626, %v3112_v1   ;;  %2442 = vperm.xlu1 %3630, %v3116_v48  }
 0x377   : > { %3387 = vmatmul.mubr.msk.f32.gmra.mrb[18].mxu1 %vm331_vm0, %v3024_v44  ;;  %v5201_v44 = vld [vmem:[#allocation23_spill] sm:$0xff] }
 0x378   : > { %3389 = vmatprep.mubr.msk.f32.mxu1 %vm331_vm0, %v3025_v43 }
 0x37a   : > { %3631 = vset.pattern.permute.xlu0 %v5194_v38  ;;  %2348 = vperm.xlu1 %3630, %v3096_v36  }
 0x37b   : > { %3390 = vmatmul.mubr.msk.f32.gmra.mrb[20].mxu1 %vm331_vm0, %v3026_v31  ;;  %2700 = vperm.xlu0 %3631, %v3125_v61   ;;  %v3097_v31 = vld [vmem:[%s5093_s5 + $0x120] sm:$0xff] }
 0x37c   : > { %3392 = vmatprep.mubr.msk.f32.mxu1 %vm331_vm0, %v3027_v16 }
 0x37e   : > { %2358 = vperm.xlu1 %3630, %v3098_v17  }
 0x37f   : > { %3393 = vmatmul.mubr.msk.f32.gmra.mrb[22].mxu1 %vm331_vm0, %v3028_v27  ;;  %2720 = vperm.xlu0 %3631, %v4691_v29  }
 0x382   : > { %2368 = vperm.xlu1 %3630, %v3100_v47  }
 0x383   : > { %2712 = vperm.xlu0 %3631, %v4701_v50  }
 0x387   : > { %3635 = vset.pattern.permute.xlu0 %v5199_v24 }
 0x388   : > { %2343 = vperm.xlu0 %3635, %v3095_v62  }
 0x38c   : > { %2353 = vperm.xlu0 %3635, %v3097_v31  }
 0x390   : > { %2363 = vperm.xlu0 %3635, %v3099_v21  }
 0x394   : > { %2653 = vperm.xlu0 %3635, %v3125_v61  }
 0x446   : > { %v3385_v19 = vpop.f32.mrb[16].mxu1 }
 0x447   : > { %v1683_v56 = vadd.f32 %v3385_v19, %v5195_v12  ;;  %v1677_v18 = vpop.f32.mrb[17].mxu1 }
 0x448   : > { %v1678_v13 = vadd.f32 %v1677_v18, %v5196_v51 }
 0x44a   : > { %v1716_v7 = vadd.f32 %v1683_v56, %v1678_v13  ;;  %v3388_v54 = vpop.f32.mrb[18].mxu1 }
 0x44b   : > { %v1687_v4 = vpop.f32.mrb[19].mxu1  ;;  %v1693_v46 = vadd.f32 %v3388_v54, %v5198_v59 }
 0x44c   : > { %v1688_v5 = vadd.f32 %v1687_v4, %v5197_v11 }
 0x44e   : > { %v1717_v15 = vadd.f32 %v1716_v7, %v1688_v5  ;;  %v3391_v22 = vpop.f32.mrb[20].mxu1 }
 0x44f   : > { %v1703_v23 = vadd.f32 %v3391_v22, %v5200_v8  ;;  %v1697_v41 = vpop.f32.mrb[21].mxu1 }
 0x450   : > { %v1718_v2 = vadd.f32 %v1717_v15, %v1693_v46  ;;  %v1698_v43 = vadd.f32 %v1697_v41, %v5201_v44 }
 0x452   : > { %v1719_v16 = vrot.slane %v1718_v2, 4  ;;  %v1750_v27 = vadd.f32 %v1703_v23, %v1698_v43  ;;  %v3394_v6 = vpop.f32.mrb[22].mxu1 }
 0x453   : > { %v1707_v60 = vpop.f32.mrb[23].mxu1  ;;  %v1713_v39 = vadd.f32 %v3394_v6, %v5203_v20 }
 0x454   : > { %v1720_v34 = vadd.f32 %v1719_v16, %v1718_v2  ;;  %v1708_v63 = vadd.f32 %v1707_v60, %v5202_v52 }
 0x456   : > { %v1721_v55 = vrot.slane %v1720_v34, 2  ;;  %v1751_v33 = vadd.f32 %v1750_v27, %v1708_v63 }
 0x458   : > { %v1722_v28 = vadd.f32 %v1721_v55, %v1720_v34  ;;  %v1752_v32 = vadd.f32 %v1751_v33, %v1713_v39 }
 0x45a   : > { %v1723_v57 = vrot.slane %v1722_v28, 1  ;;  %v1753_v53 = vrot.slane %v1752_v32, 4 }
 0x45c   : > { %v1724_v40 = vadd.f32 %v1723_v57, %v1722_v28  ;;  %v1754_v3 = vadd.f32 %v1753_v53, %v1752_v32  ;;  %v1910_v57 = vpop.permute.xlu1 %1909  ;;  %v1905_v53 = vpop.permute.xlu0 %1904 }
 0x45e   : > { %v1725_v35 = vmul.f32 0.03125, %v1724_v40  ;;  %v1755_v1 = vrot.slane %v1754_v3, 2 }
 0x460   : > { %v1726_v48 = vsub.f32 %v1678_v13, %v1725_v35  ;;  %v1727_v36 = vsub.f32 %v1683_v56, %v1725_v35  ;;  %v1728_v17 = vsub.f32 %v1688_v5, %v1725_v35  ;;  %v1729_v19 = vsub.f32 %v1693_v46, %v1725_v35 }
 0x461   : > { %v1756_v12 = vadd.f32 %v1755_v1, %v1754_v3 }
 0x462   : > { %v1730_v18 = vmul.f32 %v1726_v48, %v1726_v48  ;;  %v1731_v47 = vmul.f32 %v1727_v36, %v1727_v36  ;;  %v1732_v7 = vmul.f32 %v1728_v17, %v1728_v17  ;;  %v1733_v11 = vmul.f32 %v1729_v19, %v1729_v19 }
 0x463   : > { %v1757_v51 = vrot.slane %v1756_v12, 1 }
 0x464   : > { %v1734_v54 = vadd.f32 %v1731_v47, %v1730_v18  ;;  %v5204_v18 = vld [vmem:[#allocation47_spill] sm:$0xff] }
 0x465   : > { %v1758_v4 = vadd.f32 %v1757_v51, %v1756_v12  ;;  %v5205_v51 = vld [vmem:[#allocation31_spill] sm:$0xff] }
 0x466   : > { %v1735_v62 = vadd.f32 %v1734_v54, %v1732_v7  ;;  %v5206_v54 = vld [vmem:[#allocation32_spill] sm:$0xff] }
 0x467   : > { %v1759_v59 = vmul.f32 0.03125, %v1758_v4 }
 0x468   : > { %v1736_v15 = vadd.f32 %v1735_v62, %v1733_v11  ;;  %v5207_v11 = vld [vmem:[#allocation51_spill] sm:$0xff] }
 0x469   : > { %v1760_v61 = vsub.f32 %v1698_v43, %v1759_v59  ;;  %v1761_v22 = vsub.f32 %v1703_v23, %v1759_v59  ;;  %v1762_v8 = vsub.f32 %v1708_v63, %v1759_v59  ;;  %v1763_v41 = vsub.f32 %v1713_v39, %v1759_v59  ;;  %v1920_v59 = vpop.permute.xlu1 %1919 }
 0x46a   : > { %v1737_v2 = vrot.slane %v1736_v15, 4 }
 0x46b   : > { %v1764_v13 = vmul.f32 %v1760_v61, %v1760_v61  ;;  %v1765_v56 = vmul.f32 %v1761_v22, %v1761_v22  ;;  %v1766_v46 = vmul.f32 %v1762_v8, %v1762_v8  ;;  %v1767_v16 = vmul.f32 %v1763_v41, %v1763_v41 }
 0x46c   : > { %v1738_v5 = vadd.f32 %v1737_v2, %v1736_v15  ;;  %v1915_v15 = vpop.permute.xlu0 %1914  ;;  %v5208_v2 = vld [vmem:[#allocation49_spill] sm:$0xff] }
 0x46d   : > { %v1768_v44 = vadd.f32 %v1765_v56, %v1764_v13  ;;  %v5209_v56 = vld [vmem:[#allocation27_spill] sm:$0xff] }
 0x46e   : > { %v1739_v31 = vrot.slane %v1738_v5, 2 }
 0x46f   : > { %v1769_v27 = vadd.f32 %v1768_v44, %v1766_v46  ;;  %v5210_v46 = vld [vmem:[#allocation55_spill] sm:$0xff] }
 0x470   : > { %v1740_v6 = vadd.f32 %v1739_v31, %v1738_v5 }
 0x471   : > { %v1770_v60 = vadd.f32 %v1769_v27, %v1767_v16 }
 0x472   : > { %v1741_v34 = vrot.slane %v1740_v6, 1 }
 0x473   : > { %v1771_v52 = vrot.slane %v1770_v60, 4 }
 0x474   : > { %v1742_v21 = vadd.f32 %v1741_v34, %v1740_v6 }
 0x475   : > { %v1772_v55 = vadd.f32 %v1771_v52, %v1770_v60 }
 0x476   : > { %v1743_v20 = vmul.f32 0.03125, %v1742_v21 }
 0x477   : > { %v1773_v43 = vrot.slane %v1772_v55, 2 }
 0x478   : > { %v1744_v23 = vadd.f32 1e-05, %v1743_v20 }
 0x479   : > { %v1774_v63 = vadd.f32 %v1773_v43, %v1772_v55 }
 0x47a   : > { %3645 = vrsqrt.f32 %v1744_v23  ;;  %v1930_v23 = vpop.permute.xlu1 %1929 }
 0x47b   : > { %v1775_v39 = vrot.slane %v1774_v63, 1 }
 0x47d   : > { %v1776_v33 = vadd.f32 %v1775_v39, %v1774_v63  ;;  %v1925_v63 = vpop.permute.xlu0 %1924 }
 0x47f   : > { %v1777_v28 = vmul.f32 0.03125, %v1776_v33 }
 0x481   : > { %v1778_v32 = vadd.f32 1e-05, %v1777_v28 }
 0x483   : > { %3647 = vrsqrt.f32 %v1778_v32 }
 0x484   : > { %v3646_v40 = vpop.eup %3645 }
 0x485   : > { %v1748_v3 = vmul.f32 %v3646_v40, %v1728_v17  ;;  %v1747_v35 = vmul.f32 %v3646_v40, %v1727_v36  ;;  %v1746_v1 = vmul.f32 %v3646_v40, %v1726_v48  ;;  %v1749_v12 = vmul.f32 %v3646_v40, %v1729_v19  ;;  %v5211_v17 = vld [vmem:[#allocation53_spill] sm:$0xff] }
 0x486   : > { %v5212_v40 = vld [vmem:[#allocation57_spill] sm:$0xff] }
 0x487   : > { %v1834_v47 = vmul.f32 %v5204_v18, %v1747_v35  ;;  %v1833_v7 = vmul.f32 %v5205_v51, %v1746_v1  ;;  %v1836_v4 = vmul.f32 %v5206_v54, %v1749_v12  ;;  %v1835_v62 = vmul.f32 %v5207_v11, %v1748_v3  ;;  %v5214_v35 = vld [vmem:[#allocation36_spill] sm:$0xff]  ;;  %v5216_v1 = vld [vmem:[#allocation58_spill] sm:$0xff] }
 0x489   : > { %v1874_v13 = vadd.f32 %v5208_v2, %v1834_v47  ;;  %v1873_v5 = vadd.f32 %v5209_v56, %v1833_v7  ;;  %v1876_v44 = vadd.f32 %v5210_v46, %v1836_v4  ;;  %v1875_v36 = vadd.f32 %v5211_v17, %v1835_v62  ;;  %v5218_v47 = vld [vmem:[#allocation61_spill] sm:$0xff]  ;;  %v5219_v7 = vld [vmem:[#allocation60_spill] sm:$0xff] }
 0x48a   : > { %v3067_v17 = vld [vmem:[%s5091_s3 + $0xf0] sm:$0xff] }
 0x48b   : > { %v1886_v48 = vmul.f32 %v4623_v58, %v1874_v13  ;;  %v1885_v19 = vmul.f32 %v1873_v5, %v4625_v37  ;;  %v1888_v31 = vmul.f32 %v4627_v14, %v1876_v44  ;;  %v1887_v16 = vmul.f32 %v1875_v36, %v4629_v9  ;;  %v3068_v36 = vld [vmem:[%s5091_s3 + $0xf8] sm:$0xff] }
 0x48d   : > { %v3648_v27 = vpop.eup %3647  ;;  %v1943_v6 = vmul.f32 %v1910_v57, %v1886_v48  ;;  %v1942_v60 = vmul.f32 %v1905_v53, %v1885_v19  ;;  %v3515_v34 = vpack.c.bf16 %v1886_v48, %v1885_v19  ;;  %v3519_v52 = vpack.c.bf16 %v1888_v31, %v1887_v16  ;;  %v5213_v53 = vld [vmem:[#allocation34_spill] sm:$0xff]  ;;  %v4800_v48 = vpop.f32.mrb[16].mxu0 }
 0x48e   : > { %v1782_v21 = vmul.f32 %v3648_v27, %v1762_v8  ;;  %v1781_v55 = vmul.f32 %v3648_v27, %v1761_v22  ;;  %v1780_v20 = vmul.f32 %v3648_v27, %v1760_v61  ;;  %v1783_v43 = vmul.f32 %v3648_v27, %v1763_v41  ;;  %v5215_v22 = vld [vmem:[#allocation59_spill] sm:$0xff]  ;;  %v4802_v19 = vpop.f32.mrb[17].mxu0 }
 0x48f   : > { %v4737_v39 = vadd.f32 %v1943_v6, %v4560_v26  ;;  %v1945_v33 = vmul.f32 %v1920_v59, %v1888_v31  ;;  %v1944_v28 = vmul.f32 %v1915_v15, %v1887_v16  ;;  %3516 = vmatprep.subr.bf16.mxu0 %v3515_v34  ;;  %v4740_v32 = vadd.f32 %v1942_v60, %v4563_v42  ;;  %v5217_v42 = vld [vmem:[#allocation29_spill] sm:$0xff]  ;;  %v1940_v59 = vpop.permute.xlu1 %1939  ;;  %v4804_v31 = vpop.f32.mrb[18].mxu0 }
 0x490   : > { %v1838_v57 = vmul.f32 %v5212_v40, %v1781_v55  ;;  %v1837_v3 = vmul.f32 %v5213_v53, %v1780_v20  ;;  %v1840_v8 = vmul.f32 %v5214_v35, %v1783_v43  ;;  %v1839_v61 = vmul.f32 %v5215_v22, %v1782_v21  ;;  %3518 = vmatpush3.bf16.msra.mxu0 %v3515_v34  ;;  %v4806_v16 = vpop.f32.mrb[19].mxu0  ;;  %v3126_v21 = vld [vmem:[%s5092_s4 + $0x108] sm:$0xff]  ;;  %v3129_v55 = vld [vmem:[%s5092_s4 + $0x120] sm:$0xff]  ;;  %v3131_v20 = vld [vmem:[%s5092_s4 + $0x130] sm:$0xff] }
 0x491   : > { %v4747_v41 = vadd.f32 %v1945_v33, %v4570_v0  ;;  %v4750_v26 = vadd.f32 %v1944_v28, %v4573_v25  ;;  %3520 = vmatprep.subr.bf16.mxu0 %v3519_v52  ;;  %v1935_v25 = vpop.permute.xlu0 %1934  ;;  %v4808_v27 = vpop.f32.mrb[20].mxu0  ;;  %2658 = vperm.xlu1 %3630, %v3126_v21   ;;  %v3127_v43 = vld [vmem:[%s5092_s4 + $0x110] sm:$0xff]  ;;  %v3136_v33 = vld [vmem:[%s5093_s5 + $0x158] sm:$0xff]  ;;  %v3141_v28 = vld [vmem:[#allocation3] ss:$0 sm:$0xff] }
 0x492   : > { %v1878_v12 = vadd.f32 %v5216_v1, %v1838_v57  ;;  %v1877_v18 = vadd.f32 %v5217_v42, %v1837_v3  ;;  %v1880_v51 = vadd.f32 %v5218_v47, %v1840_v8  ;;  %v1879_v54 = vadd.f32 %v5219_v7, %v1839_v61  ;;  %v4810_v6 = vpop.f32.mrb[21].mxu0  ;;  %2673 = vperm.xlu0 %3635, %v3129_v55   ;;  %v5220_v57 = vld [vmem:[#allocation62_spill] sm:$0xff]  ;;  %v5222_v1 = vld [vmem:[#allocation40_spill] sm:$0xff]  ;;  %v5223_v42 = vld [vmem:[#allocation63_spill] sm:$0xff] }
 0x493   : > { %v4812_v60 = vpop.f32.mrb[22].mxu0  ;;  %v5221_v35 = vld [vmem:[#allocation38_spill] sm:$0xff]  ;;  %v5224_v7 = vld [vmem:[#allocation64_spill] sm:$0xff] }
 0x494   : > { %v1890_v4 = vmul.f32 %v4623_v58, %v1878_v12  ;;  %v1889_v11 = vmul.f32 %v1877_v18, %v4625_v37  ;;  %v1892_v62 = vmul.f32 %v4627_v14, %v1880_v51  ;;  %v1891_v0 = vmul.f32 %v1879_v54, %v4629_v9  ;;  %3522 = vmatpush3.bf16.msra.mxu0 %v3519_v52  ;;  %v3062_v9 = vld [vmem:[%s5091_s3 + $0xc8] sm:$0xff]  ;;  %v4814_v34 = vpop.f32.mrb[23].mxu0  ;;  %v3101_v52 = vld [vmem:[%s5091_s3 + $0x100] sm:$0xff] }
 0x495   : > { %3439 = vmatprep.mubr.msk.f32.mxu1 %vm331_vm0, %v3101_v52  ;;  %2678 = vperm.xlu1 %3630, %v4691_v29   ;;  %v3134_v29 = vld [vmem:[%s5093_s5 + $0x148] sm:$0xff]  ;;  %v3139_v52 = vld [vmem:[%s5093_s5 + $0x170] sm:$0xff] }
 0x496   : > { %v3523_v15 = vpack.c.bf16 %v1890_v4, %v1889_v11  ;;  %v3527_v2 = vpack.c.bf16 %v1892_v62, %v1891_v0  ;;  %v1947_v13 = vmul.f32 %v1930_v23, %v1890_v4  ;;  %v1946_v56 = vmul.f32 %v1925_v63, %v1889_v11  ;;  %2663 = vperm.xlu0 %3635, %v3127_v43   ;;  %v3132_v23 = vld [vmem:[%s5092_s4 + $0x138] sm:$0xff]  ;;  %v3135_v63 = vld [vmem:[%s5093_s5 + $0x150] sm:$0xff] }
 0x497   : > { %v1949_v5 = vmul.f32 %v1940_v59, %v1892_v62  ;;  %v1948_v46 = vmul.f32 %v1935_v25, %v1891_v0  ;;  %v5225_v62 = vld [vmem:[#allocation42_spill] sm:$0xff] }
 0x498   : > { %v4761_v44 = vadd.f32 %v1947_v13, %v4584_v49  ;;  %v4764_v58 = vadd.f32 %v1946_v56, %v4587_v30  ;;  %3524 = vmatprep.subr.bf16.mxu0 %v3523_v15  ;;  %v3063_v49 = vld [vmem:[%s5091_s3 + $0xd0] sm:$0xff]  ;;  %v3064_v30 = vld [vmem:[%s5091_s3 + $0xd8] sm:$0xff]  ;;  %v3137_v59 = vld [vmem:[%s5093_s5 + $0x160] sm:$0xff] }
 0x499   : > { %v4767_v37 = vadd.f32 %v1949_v5, %v4590_v45  ;;  %v4770_v14 = vadd.f32 %v1948_v46, %v4593_v10  ;;  %3526 = vmatpush3.bf16.msra.mxu0 %v3523_v15  ;;  %v3065_v45 = vld [vmem:[%s5091_s3 + $0xe0] sm:$0xff]  ;;  %v3066_v10 = vld [vmem:[%s5091_s3 + $0xe8] sm:$0xff]  ;;  %2683 = vperm.xlu1 %3630, %v3131_v20  }
 0x49a   : > { %3528 = vmatprep.subr.bf16.mxu0 %v3527_v2  ;;  %2688 = vperm.xlu0 %3635, %v3132_v23   ;;  %v5226_v5 = vld [vmem:[#allocation44_spill] sm:$0xff] }
 0x49d   : > { %3530 = vmatpush3.bf16.msra.mxu0 %v3527_v2  ;;  %3632 = vset.pattern.permute.xlu1 %v5194_v38 }
 0x49e   : > { %2704 = vperm.xlu1 %3632, %v3126_v21   ;;  %2767 = vperm.xlu0 %3635, %v3134_v29  }
 0x4a0   : > { %3412 = vmatmul.mubr.msk.f32.vlgmr.msra.gmra.mrb[24].mxu0 %vm331_vm0, %v3062_v9 }
 0x4a1   : > { %3414 = vmatprep.mubr.msk.f32.mxu0 %vm331_vm0, %v3063_v49  ;;  %v5227_v49 = vld [vmem:[#allocation65_spill] sm:$0xff] }
 0x4a2   : > { %2716 = vperm.xlu1 %3632, %v3129_v55   ;;  %2772 = vperm.xlu0 %3635, %v3135_v63  }
 0x4a4   : > { %3415 = vmatmul.mubr.msk.f32.gmra.mrb[26].mxu0 %vm331_vm0, %v3064_v30 }
 0x4a5   : > { %3417 = vmatprep.mubr.msk.f32.mxu0 %vm331_vm0, %v3065_v45 }
 0x4a6   : > { %3633 = vset.pattern.permute.xlu1 %v5199_v24  ;;  %2777 = vperm.xlu0 %3635, %v3136_v33  }
 0x4a7   : > { %2668 = vperm.xlu1 %3633, %v4701_v50  }
 0x4a8   : > { %3418 = vmatmul.mubr.msk.f32.gmra.mrb[28].mxu0 %vm331_vm0, %v3066_v10 }
 0x4a9   : > { %3420 = vmatprep.mubr.msk.f32.mxu0 %vm331_vm0, %v3067_v17 }
 0x4aa   : > { %2843 = vperm.xlu0 %3635, %v3141_v28  }
 0x4ab   : > { %3634 = vset.pattern.permute.xlu1 %v5194_v38  ;;  %v3133_v38 = vld [vmem:[%s5093_s5 + $0x140] sm:$0xff] }
 0x4ac   : > { %3421 = vmatmul.mubr.msk.f32.gmra.mrb[30].mxu0 %vm331_vm0, %v3068_v36  ;;  %2708 = vperm.xlu1 %3634, %v3127_v43   ;;  %v4867_v36 = vpop.permute.xlu0 %2333 }
 0x4b0   : > { %2724 = vperm.xlu1 %3634, %v3131_v20   ;;  %v4875_v33 = vpop.permute.xlu0 %2407 }
 0x4b4   : > { %2728 = vperm.xlu1 %3634, %v3132_v23   ;;  %v3140_v23 = vld [vmem:[%s5093_s5 + $0x178] sm:$0xff] }
 0x4b8   : > { %3636 = vset.pattern.permute.xlu1 %v5199_v24  ;;  %v3138_v24 = vld [vmem:[%s5093_s5 + $0x168] sm:$0xff] }
 0x4b9   : > { %2762 = vperm.xlu1 %3636, %v3133_v38  }
 0x4bd   : > { %2782 = vperm.xlu1 %3636, %v3137_v59  }
 0x4c1   : > { %2787 = vperm.xlu1 %3636, %v3138_v24  }
 0x4c5   : > { %2792 = vperm.xlu1 %3636, %v3139_v52  }
 0x4c9   : > { %2797 = vperm.xlu1 %3636, %v3140_v23  }
 0x573   : > { %v3413_v40 = vpop.f32.mrb[24].mxu0 }
 0x574   : > { %v2112_v53 = vadd.f32 %v3413_v40, %v5220_v57  ;;  %v2106_v3 = vpop.f32.mrb[25].mxu0 }
 0x575   : > { %v2107_v8 = vadd.f32 %v2106_v3, %v5221_v35 }
 0x577   : > { %v2145_v22 = vadd.f32 %v2112_v53, %v2107_v8  ;;  %v3416_v61 = vpop.f32.mrb[26].mxu0 }
 0x578   : > { %v2116_v50 = vpop.f32.mrb[27].mxu0  ;;  %v2122_v18 = vadd.f32 %v3416_v61, %v5223_v42  ;;  %v4877_v42 = vpop.permute.xlu0 %2427 }
 0x579   : > { %v2117_v12 = vadd.f32 %v2116_v50, %v5222_v1 }
 0x57b   : > { %v2146_v47 = vadd.f32 %v2145_v22, %v2117_v12  ;;  %v3419_v51 = vpop.f32.mrb[28].mxu0 }
 0x57c   : > { %v2132_v54 = vadd.f32 %v3419_v51, %v5224_v7  ;;  %v2126_v4 = vpop.f32.mrb[29].mxu0  ;;  %v4885_v59 = vpop.permute.xlu0 %2417 }
 0x57d   : > { %v2147_v11 = vadd.f32 %v2146_v47, %v2122_v18  ;;  %v2127_v0 = vadd.f32 %v2126_v4, %v5225_v62 }
 0x57f   : > { %v2148_v25 = vrot.slane %v2147_v11, 4  ;;  %v2179_v15 = vadd.f32 %v2132_v54, %v2127_v0  ;;  %v3422_v2 = vpop.f32.mrb[30].mxu0 }
 0x580   : > { %v2136_v13 = vpop.f32.mrb[31].mxu0  ;;  %v2142_v30 = vadd.f32 %v3422_v2, %v5227_v49  ;;  %v2339_v2 = vpop.permute.xlu1 %2338 }
 0x581   : > { %v2149_v56 = vadd.f32 %v2148_v25, %v2147_v11  ;;  %v2137_v46 = vadd.f32 %v2136_v13, %v5226_v5 }
 0x583   : > { %v2150_v9 = vrot.slane %v2149_v56, 2  ;;  %v2180_v45 = vadd.f32 %v2179_v15, %v2137_v46 }
 0x585   : > { %v2151_v10 = vadd.f32 %v2150_v9, %v2149_v56  ;;  %v2181_v17 = vadd.f32 %v2180_v45, %v2142_v30  ;;  %v4893_v9 = vpop.permute.xlu0 %2422 }
 0x587   : > { %v2152_v21 = vrot.slane %v2151_v10, 1  ;;  %v2182_v55 = vrot.slane %v2181_v17, 4 }
 0x589   : > { %v2153_v20 = vadd.f32 %v2152_v21, %v2151_v10  ;;  %v2183_v43 = vadd.f32 %v2182_v55, %v2181_v17  ;;  %v4897_v55 = vpop.permute.xlu0 %2700 }
 0x58b   : > { %v2154_v29 = vmul.f32 0.03125, %v2153_v20  ;;  %v2184_v63 = vrot.slane %v2183_v43, 2 }
 0x58d   : > { %v2155_v28 = vsub.f32 %v2107_v8, %v2154_v29  ;;  %v2156_v40 = vsub.f32 %v2112_v53, %v2154_v29  ;;  %v2157_v57 = vsub.f32 %v2117_v12, %v2154_v29  ;;  %v2158_v3 = vsub.f32 %v2122_v18, %v2154_v29 }
 0x58e   : > { %v2185_v35 = vadd.f32 %v2184_v63, %v2183_v43 }
 0x58f   : > { %v2159_v22 = vmul.f32 %v2155_v28, %v2155_v28  ;;  %v2160_v61 = vmul.f32 %v2156_v40, %v2156_v40  ;;  %v2161_v1 = vmul.f32 %v2157_v57, %v2157_v57  ;;  %v2162_v51 = vmul.f32 %v2158_v3, %v2158_v3 }
 0x590   : > { %v2186_v50 = vrot.slane %v2185_v35, 1 }
 0x591   : > { %v2163_v38 = vadd.f32 %v2160_v61, %v2159_v22 }
 0x592   : > { %v2187_v47 = vadd.f32 %v2186_v50, %v2185_v35  ;;  %v4901_v35 = vpop.permute.xlu0 %2720 }
 0x593   : > { %v2164_v7 = vadd.f32 %v2163_v38, %v2161_v1 }
 0x594   : > { %v2188_v4 = vmul.f32 0.03125, %v2187_v47 }
 0x595   : > { %v2165_v11 = vadd.f32 %v2164_v7, %v2162_v51 }
 0x596   : > { %v4879_v62 = vsub.f32 %v2127_v0, %v2188_v4  ;;  %v4881_v8 = vsub.f32 %v2132_v54, %v2188_v4  ;;  %v2191_v53 = vsub.f32 %v2137_v46, %v2188_v4  ;;  %v4883_v12 = vsub.f32 %v2142_v30, %v2188_v4  ;;  %v4895_v30 = vpop.permute.xlu1 %2412  ;;  %v4905_v38 = vpop.permute.xlu0 %2712 }
 0x597   : > { %v2166_v18 = vrot.slane %v2165_v11, 4 }
 0x598   : > { %v2193_v25 = vmul.f32 %v4879_v62, %v4879_v62  ;;  %v2194_v15 = vmul.f32 %v4881_v8, %v4881_v8  ;;  %v2195_v56 = vmul.f32 %v2191_v53, %v2191_v53  ;;  %v2196_v54 = vmul.f32 %v4883_v12, %v4883_v12 }
 0x599   : > { %v2167_v13 = vadd.f32 %v2166_v18, %v2165_v11 }
 0x59a   : > { %v2197_v5 = vadd.f32 %v2194_v15, %v2193_v25  ;;  %v4899_v43 = vpop.permute.xlu1 %2432  ;;  %v5228_v25 = vld [vmem:[#allocation50_spill] sm:$0xff] }
 0x59b   : > { %v2168_v0 = vrot.slane %v2167_v13, 2 }
 0x59c   : > { %v2198_v46 = vadd.f32 %v2197_v5, %v2195_v56  ;;  %v5230_v5 = vld [vmem:[#allocation52_spill] sm:$0xff] }
 0x59d   : > { %v2169_v24 = vadd.f32 %v2168_v0, %v2167_v13  ;;  %v5229_v13 = vld [vmem:[#allocation66_spill] sm:$0xff] }
 0x59e   : > { %v2199_v49 = vadd.f32 %v2198_v46, %v2196_v54  ;;  %v4903_v61 = vpop.permute.xlu1 %2437  ;;  %v5231_v54 = vld [vmem:[#allocation68_spill] sm:$0xff] }
 0x59f   : > { %v2170_v45 = vrot.slane %v2169_v24, 1 }
 0x5a0   : > { %v2200_v10 = vrot.slane %v2199_v49, 4 }
 0x5a1   : > { %v2171_v17 = vadd.f32 %v2170_v45, %v2169_v24  ;;  %v2344_v24 = vpop.permute.xlu0 %2343 }
 0x5a2   : > { %v2201_v52 = vadd.f32 %v2200_v10, %v2199_v49  ;;  %v4907_v47 = vpop.permute.xlu1 %2442  ;;  %v5232_v49 = vld [vmem:[#allocation46_spill] sm:$0xff]  ;;  %v5233_v10 = vld [vmem:[#allocation67_spill] sm:$0xff] }
 0x5a3   : > { %v2172_v21 = vmul.f32 0.03125, %v2171_v17 }
 0x5a4   : > { %v2202_v20 = vrot.slane %v2201_v52, 2 }
 0x5a5   : > { %v2173_v23 = vadd.f32 1e-05, %v2172_v21  ;;  %v5234_v21 = vld [vmem:[#allocation70_spill] sm:$0xff] }
 0x5a6   : > { %v2203_v29 = vadd.f32 %v2202_v20, %v2201_v52  ;;  %v2349_v52 = vpop.permute.xlu1 %2348 }
 0x5a7   : > { %3649 = vrsqrt.f32 %v2173_v23 }
 0x5a8   : > { %v2204_v63 = vrot.slane %v2203_v29, 1 }
 0x5aa   : > { %v2205_v22 = vadd.f32 %v2204_v63, %v2203_v29 }
 0x5ac   : > { %v2206_v50 = vmul.f32 0.03125, %v2205_v22 }
 0x5ae   : > { %v2207_v1 = vadd.f32 1e-05, %v2206_v50 }
 0x5b0   : > { %3651 = vrsqrt.f32 %v2207_v1 }
 0x5b1   : > { %v3650_v51 = vpop.eup %3649 }
 0x5b2   : > { %v2177_v7 = vmul.f32 %v3650_v51, %v2157_v57  ;;  %v2175_v4 = vmul.f32 %v3650_v51, %v2155_v28  ;;  %v2176_v11 = vmul.f32 %v3650_v51, %v2156_v40  ;;  %v2178_v18 = vmul.f32 %v3650_v51, %v2158_v3  ;;  %v5235_v57 = vld [vmem:[#allocation69_spill] sm:$0xff] }
 0x5b4   : > { %v2262_v15 = vmul.f32 %v5228_v25, %v2175_v4  ;;  %v2263_v56 = vmul.f32 %v5229_v13, %v2176_v11  ;;  %v2265_v0 = vmul.f32 %v5230_v5, %v2178_v18  ;;  %v2264_v46 = vmul.f32 %v5231_v54, %v2177_v7  ;;  %v2354_v18 = vpop.permute.xlu0 %2353 }
 0x5b6   : > { %v2302_v45 = vadd.f32 %v5232_v49, %v2262_v15  ;;  %v2303_v17 = vadd.f32 %v5233_v10, %v2263_v56  ;;  %v2305_v20 = vadd.f32 %v5234_v21, %v2265_v0  ;;  %v2304_v28 = vadd.f32 %v5235_v57, %v2264_v46  ;;  %v5240_v49 = vld [vmem:[#allocation48_spill] sm:$0xff]  ;;  %v5242_v10 = vld [vmem:[#allocation74_spill] sm:$0xff] }
 0x5b8   : > { %v2314_v40 = vmul.f32 %v2302_v45, %v4802_v19  ;;  %v2315_v3 = vmul.f32 %v4800_v48, %v2303_v17  ;;  %v2317_v23 = vmul.f32 %v4804_v31, %v2305_v20  ;;  %v2316_v29 = vmul.f32 %v2304_v28, %v4806_v16  ;;  %v5241_v45 = vld [vmem:[#allocation56_spill] sm:$0xff]  ;;  %v5243_v20 = vld [vmem:[#allocation75_spill] sm:$0xff]  ;;  %v2364_v28 = vpop.permute.xlu0 %2363 }
 0x5ba   : > { %v3652_v63 = vpop.eup %3651  ;;  %v2371_v22 = vmul.f32 %v4867_v36, %v2314_v40  ;;  %v2372_v50 = vmul.f32 %v2339_v2, %v2315_v3  ;;  %v2374_v1 = vmul.f32 %v2349_v52, %v2317_v23  ;;  %v2373_v51 = vmul.f32 %v2344_v24, %v2316_v29  ;;  %v2359_v2 = vpop.permute.xlu1 %2358 }
 0x5bb   : > { %v2211_v7 = vmul.f32 %v3652_v63, %v2191_v53  ;;  %v3531_v4 = vpack.c.bf16 %v2315_v3, %v2314_v40  ;;  %v2210_v11 = vmul.f32 %v3652_v63, %v4881_v8  ;;  %v2209_v25 = vmul.f32 %v3652_v63, %v4879_v62  ;;  %v5236_v53 = vld [vmem:[#allocation71_spill] sm:$0xff]  ;;  %v5237_v8 = vld [vmem:[#allocation54_spill] sm:$0xff] }
 0x5bc   : > { %v4925_v15 = vadd.f32 %v2371_v22, %v4740_v32  ;;  %v4928_v13 = vadd.f32 %v2372_v50, %v4737_v39  ;;  %v4931_v56 = vadd.f32 %v2374_v1, %v4747_v41  ;;  %v4934_v36 = vadd.f32 %v2373_v51, %v4750_v26  ;;  %v5238_v32 = vld [vmem:[#allocation73_spill] sm:$0xff]  ;;  %v5239_v39 = vld [vmem:[#allocation72_spill] sm:$0xff] }
 0x5bd   : > { %3532 = vmatprep.subr.bf16.mxu1 %v3531_v4  ;;  %v2267_v5 = vmul.f32 %v5236_v53, %v2210_v11  ;;  %v2266_v0 = vmul.f32 %v5237_v8, %v2209_v25  ;;  %v3535_v54 = vpack.c.bf16 %v2317_v23, %v2316_v29  ;;  %v2212_v62 = vmul.f32 %v3652_v63, %v4883_v12 }
 0x5be   : > { %3534 = vmatpush3.bf16.msra.mxu1 %v3531_v4  ;;  %v2268_v46 = vmul.f32 %v5238_v32, %v2211_v7  ;;  %v2369_v12 = vpop.permute.xlu1 %2368  ;;  %v3107_v7 = vld [vmem:[%s5091_s3 + $0x130] sm:$0xff]  ;;  %v3108_v4 = vld [vmem:[%s5091_s3 + $0x138] sm:$0xff] }
 0x5bf   : > { %v2307_v24 = vadd.f32 %v5239_v39, %v2267_v5  ;;  %v2306_v41 = vadd.f32 %v5240_v49, %v2266_v0  ;;  %3536 = vmatprep.subr.bf16.mxu1 %v3535_v54  ;;  %v2269_v26 = vmul.f32 %v5241_v45, %v2212_v62 }
 0x5c0   : > { %v2308_v17 = vadd.f32 %v5242_v10, %v2268_v46 }
 0x5c1   : > { %v2319_v52 = vmul.f32 %v4800_v48, %v2307_v24  ;;  %v2318_v21 = vmul.f32 %v2306_v41, %v4802_v19  ;;  %v2309_v57 = vadd.f32 %v5243_v20, %v2269_v26 }
 0x5c2   : > { %v2320_v40 = vmul.f32 %v2308_v17, %v4806_v16  ;;  %3538 = vmatpush3.bf16.msra.mxu1 %v3535_v54  ;;  %v4991_v53 = vpop.permute.xlu1 %2658 }
 0x5c3   : > { %v2376_v3 = vmul.f32 %v2359_v2, %v2319_v52  ;;  %v2375_v23 = vmul.f32 %v2354_v18, %v2318_v21  ;;  %v2321_v29 = vmul.f32 %v4804_v31, %v2309_v57  ;;  %v3539_v63 = vpack.c.bf16 %v2319_v52, %v2318_v21  ;;  %v3106_v31 = vld [vmem:[%s5091_s3 + $0x128] sm:$0xff] }
 0x5c4   : > { %v2377_v22 = vmul.f32 %v2364_v28, %v2320_v40 }
 0x5c5   : > { %v4950_v50 = vadd.f32 %v2376_v3, %v4761_v44  ;;  %v4953_v48 = vadd.f32 %v2375_v23, %v4764_v58  ;;  %v2378_v19 = vmul.f32 %v2369_v12, %v2321_v29  ;;  %3540 = vmatprep.subr.bf16.mxu1 %v3539_v63  ;;  %v3543_v1 = vpack.c.bf16 %v2321_v29, %v2320_v40  ;;  %v3102_v44 = vld [vmem:[%s5091_s3 + $0x108] sm:$0xff]  ;;  %v3103_v58 = vld [vmem:[%s5091_s3 + $0x110] sm:$0xff] }
 0x5c6   : > { %v4956_v51 = vadd.f32 %v2377_v22, %v4770_v14  ;;  %3542 = vmatpush3.bf16.msra.mxu1 %v3539_v63  ;;  %v3104_v14 = vld [vmem:[%s5091_s3 + $0x118] sm:$0xff]  ;;  %v4995_v39 = vpop.permute.xlu1 %2678 }
 0x5c7   : > { %v4959_v16 = vadd.f32 %v2378_v19, %v4767_v37  ;;  %3544 = vmatprep.subr.bf16.mxu1 %v3543_v1  ;;  %v3105_v37 = vld [vmem:[%s5091_s3 + $0x120] sm:$0xff] }
 0x5ca   : > { %3546 = vmatpush3.bf16.msra.mxu1 %v3543_v1 }
 0x5cd   : > { %3440 = vmatmul.mubr.msk.f32.vlgmr.msra.gmra.mrb[24].mxu1 %vm331_vm0, %v3102_v44 }
 0x5ce   : > { %3442 = vmatprep.mubr.msk.f32.mxu1 %vm331_vm0, %v3103_v58 }
 0x5d1   : > { %3443 = vmatmul.mubr.msk.f32.gmra.mrb[26].mxu1 %vm331_vm0, %v3104_v14 }
 0x5d2   : > { %3445 = vmatprep.mubr.msk.f32.mxu1 %vm331_vm0, %v3105_v37 }
 0x5d5   : > { %3446 = vmatmul.mubr.msk.f32.gmra.mrb[28].mxu1 %vm331_vm0, %v3106_v31 }
 0x5d6   : > { %3448 = vmatprep.mubr.msk.f32.mxu1 %vm331_vm0, %v3107_v7 }
 0x5d9   : > { %3449 = vmatmul.mubr.msk.f32.gmra.mrb[30].mxu1 %vm331_vm0, %v3108_v4 }
 0x6a0   : > { %v3441_v11 = vpop.f32.mrb[24].mxu1 }
 0x6a1   : > { %v2541_v18 = vadd.f32 %v3441_v11, %v4895_v30  ;;  %v2535_v25 = vpop.f32.mrb[25].mxu1 }
 0x6a2   : > { %v2536_v2 = vadd.f32 %v2535_v25, %v4875_v33 }
 0x6a4   : > { %v2574_v5 = vadd.f32 %v2541_v18, %v2536_v2  ;;  %v3444_v8 = vpop.f32.mrb[26].mxu1 }
 0x6a5   : > { %v2545_v0 = vpop.f32.mrb[27].mxu1  ;;  %v2551_v62 = vadd.f32 %v3444_v8, %v4893_v9 }
 0x6a6   : > { %v2546_v54 = vadd.f32 %v2545_v0, %v4885_v59  ;;  %v5000_v59 = vpop.permute.xlu1 %2683  ;;  %v2654_v0 = vpop.permute.xlu0 %2653 }
 0x6a8   : > { %v2575_v32 = vadd.f32 %v2574_v5, %v2546_v54  ;;  %v3447_v46 = vpop.f32.mrb[28].mxu1 }
 0x6a9   : > { %v2561_v24 = vadd.f32 %v3447_v46, %v4899_v43  ;;  %v2555_v49 = vpop.f32.mrb[29].mxu1 }
 0x6aa   : > { %v2576_v30 = vadd.f32 %v2575_v32, %v2551_v62  ;;  %v2556_v41 = vadd.f32 %v2555_v49, %v4877_v42  ;;  %v5003_v43 = vpop.permute.xlu1 %2704 }
 0x6ac   : > { %v2577_v33 = vrot.slane %v2576_v30, 4  ;;  %v2608_v45 = vadd.f32 %v2561_v24, %v2556_v41  ;;  %v3450_v26 = vpop.f32.mrb[30].mxu1 }
 0x6ad   : > { %v2565_v10 = vpop.f32.mrb[31].mxu1  ;;  %v2571_v21 = vadd.f32 %v3450_v26, %v4907_v47 }
 0x6ae   : > { %v2578_v17 = vadd.f32 %v2577_v33, %v2576_v30  ;;  %v2566_v52 = vadd.f32 %v2565_v10, %v4903_v61  ;;  %v5005_v63 = vpop.permute.xlu1 %2716 }
 0x6b0   : > { %v2579_v9 = vrot.slane %v2578_v17, 2  ;;  %v2609_v20 = vadd.f32 %v2608_v45, %v2566_v52 }
 0x6b2   : > { %v2580_v57 = vadd.f32 %v2579_v9, %v2578_v17  ;;  %v2610_v28 = vadd.f32 %v2609_v20, %v2571_v21  ;;  %v2669_v4 = vpop.permute.xlu1 %2668  ;;  %v2674_v17 = vpop.permute.xlu0 %2673 }
 0x6b4   : > { %v2581_v12 = vrot.slane %v2580_v57, 1  ;;  %v2611_v40 = vrot.slane %v2610_v28, 4 }
 0x6b6   : > { %v2582_v42 = vadd.f32 %v2581_v12, %v2580_v57  ;;  %v2612_v3 = vadd.f32 %v2611_v40, %v2610_v28  ;;  %v2664_v12 = vpop.permute.xlu0 %2663 }
 0x6b8   : > { %v2583_v23 = vmul.f32 0.03125, %v2582_v42  ;;  %v2613_v29 = vrot.slane %v2612_v3, 2 }
 0x6ba   : > { %v2584_v22 = vsub.f32 %v2536_v2, %v2583_v23  ;;  %v2585_v61 = vsub.f32 %v2541_v18, %v2583_v23  ;;  %v2586_v19 = vsub.f32 %v2546_v54, %v2583_v23  ;;  %v2587_v1 = vsub.f32 %v2551_v62, %v2583_v23  ;;  %v2709_v62 = vpop.permute.xlu1 %2708 }
 0x6bb   : > { %v2614_v44 = vadd.f32 %v2613_v29, %v2612_v3 }
 0x6bc   : > { %v2588_v58 = vmul.f32 %v2584_v22, %v2584_v22  ;;  %v2589_v47 = vmul.f32 %v2585_v61, %v2585_v61  ;;  %v2590_v37 = vmul.f32 %v2586_v19, %v2586_v19  ;;  %v2591_v11 = vmul.f32 %v2587_v1, %v2587_v1 }
 0x6bd   : > { %v2615_v14 = vrot.slane %v2614_v44, 1 }
 0x6be   : > { %v2592_v31 = vadd.f32 %v2589_v47, %v2588_v58  ;;  %v2689_v58 = vpop.permute.xlu0 %2688 }
 0x6bf   : > { %v2616_v7 = vadd.f32 %v2615_v14, %v2614_v44 }
 0x6c0   : > { %v2593_v25 = vadd.f32 %v2592_v31, %v2590_v37 }
 0x6c1   : > { %v2617_v5 = vmul.f32 0.03125, %v2616_v7 }
 0x6c2   : > { %v2594_v8 = vadd.f32 %v2593_v25, %v2591_v11  ;;  %v2768_v7 = vpop.permute.xlu0 %2767 }
 0x6c3   : > { %v5007_v32 = vsub.f32 %v2566_v52, %v2617_v5  ;;  %v2618_v46 = vsub.f32 %v2556_v41, %v2617_v5  ;;  %v5009_v2 = vsub.f32 %v2561_v24, %v2617_v5  ;;  %v2621_v18 = vsub.f32 %v2571_v21, %v2617_v5  ;;  %v2725_v24 = vpop.permute.xlu1 %2724 }
 0x6c4   : > { %v2595_v54 = vrot.slane %v2594_v8, 4 }
 0x6c5   : > { %v2622_v49 = vmul.f32 %v2618_v46, %v2618_v46  ;;  %v2623_v30 = vmul.f32 %v5009_v2, %v5009_v2  ;;  %v2624_v45 = vmul.f32 %v5007_v32, %v5007_v32  ;;  %v2625_v9 = vmul.f32 %v2621_v18, %v2621_v18 }
 0x6c6   : > { %v2596_v33 = vadd.f32 %v2595_v54, %v2594_v8 }
 0x6c7   : > { %v2626_v26 = vadd.f32 %v2623_v30, %v2622_v49  ;;  %v2729_v23 = vpop.permute.xlu1 %2728 }
 0x6c8   : > { %v2597_v10 = vrot.slane %v2596_v33, 2 }
 0x6c9   : > { %v2627_v52 = vadd.f32 %v2626_v26, %v2624_v45 }
 0x6ca   : > { %v2598_v20 = vadd.f32 %v2597_v10, %v2596_v33  ;;  %v2773_v33 = vpop.permute.xlu0 %2772 }
 0x6cb   : > { %v2628_v41 = vadd.f32 %v2627_v52, %v2625_v9  ;;  %v2763_v37 = vpop.permute.xlu1 %2762 }
 0x6cc   : > { %v2599_v57 = vrot.slane %v2598_v20, 1 }
 0x6cd   : > { %v2629_v21 = vrot.slane %v2628_v41, 4 }
 0x6ce   : > { %v2600_v28 = vadd.f32 %v2599_v57, %v2598_v20 }
 0x6cf   : > { %v2630_v40 = vadd.f32 %v2629_v21, %v2628_v41  ;;  %v2783_v25 = vpop.permute.xlu1 %2782 }
 0x6d0   : > { %v2601_v42 = vmul.f32 0.03125, %v2600_v28 }
 0x6d1   : > { %v2631_v3 = vrot.slane %v2630_v40, 2 }
 0x6d2   : > { %v2602_v29 = vadd.f32 1e-05, %v2601_v42 }
 0x6d3   : > { %v2632_v44 = vadd.f32 %v2631_v3, %v2630_v40  ;;  %v2788_v21 = vpop.permute.xlu1 %2787 }
 0x6d4   : > { %3653 = vrsqrt.f32 %v2602_v29 }
 0x6d5   : > { %v2633_v47 = vrot.slane %v2632_v44, 1 }
 0x6d7   : > { %v2634_v14 = vadd.f32 %v2633_v47, %v2632_v44  ;;  %v2793_v47 = vpop.permute.xlu1 %2792 }
 0x6d9   : > { %v2635_v31 = vmul.f32 0.03125, %v2634_v14 }
 0x6db   : > { %v2636_v11 = vadd.f32 1e-05, %v2635_v31 }
 0x6dd   : > { %3655 = vrsqrt.f32 %v2636_v11 }
 0x6de   : > { %v3654_v5 = vpop.eup %3653 }
 0x6df   : > { %v2605_v8 = vmul.f32 %v3654_v5, %v2585_v61  ;;  %v2607_v54 = vmul.f32 %v3654_v5, %v2587_v1  ;;  %v2604_v49 = vmul.f32 %v3654_v5, %v2584_v22  ;;  %v2606_v30 = vmul.f32 %v3654_v5, %v2586_v19 }
 0x6e1   : > { %v2692_v45 = vmul.f32 %v4991_v53, %v2605_v8  ;;  %v2694_v26 = vmul.f32 %v2669_v4, %v2607_v54  ;;  %v2691_v10 = vmul.f32 %v2654_v0, %v2604_v49  ;;  %v2693_v9 = vmul.f32 %v2664_v12, %v2606_v30  ;;  %v2778_v53 = vpop.permute.xlu0 %2777 }
 0x6e3   : > { %v2732_v52 = vadd.f32 %v5003_v43, %v2692_v45  ;;  %v2734_v20 = vadd.f32 %v4905_v38, %v2694_v26  ;;  %v2731_v41 = vadd.f32 %v4897_v55, %v2691_v10  ;;  %v2733_v57 = vadd.f32 %v2709_v62, %v2693_v9 }
 0x6e5   : > { %v2743_v28 = vmul.f32 %v2731_v41, %v4810_v6  ;;  %v2744_v61 = vmul.f32 %v4808_v27, %v2732_v52  ;;  %v2745_v22 = vmul.f32 %v2733_v57, %v4814_v34  ;;  %v2746_v19 = vmul.f32 %v4812_v60, %v2734_v20 }
 0x6e7   : > { %v3656_v1 = vpop.eup %3655  ;;  %v2800_v4 = vmul.f32 %v2763_v37, %v2743_v28  ;;  %v2801_v0 = vmul.f32 %v2768_v7, %v2744_v61  ;;  %v2802_v12 = vmul.f32 %v2773_v33, %v2745_v22  ;;  %v2803_v43 = vmul.f32 %v2778_v53, %v2746_v19 }
 0x6e8   : > { %v2638_v40 = vmul.f32 %v3656_v1, %v2618_v46  ;;  %v2640_v38 = vmul.f32 %v3656_v1, %v5007_v32  ;;  %v2641_v55 = vmul.f32 %v3656_v1, %v2621_v18  ;;  %v2639_v62 = vmul.f32 %v3656_v1, %v5009_v2 }
 0x6e9   : > { %v2808_v42 = vadd.f32 %v2800_v4, %v4925_v15  ;;  %v2809_v3 = vadd.f32 %v2801_v0, %v4928_v13  ;;  %v2810_v29 = vadd.f32 %v2802_v12, %v4934_v36  ;;  %v2811_v44 = vadd.f32 %v2803_v43, %v4931_v56 }
 0x6ea   : > { %v2695_v14 = vmul.f32 %v2674_v17, %v2638_v40  ;;  %v2697_v37 = vmul.f32 %v5000_v59, %v2640_v38  ;;  %v2698_v31 = vmul.f32 %v2689_v58, %v2641_v55  ;;  %v2696_v46 = vmul.f32 %v4995_v39, %v2639_v62  ;;  %v2798_v58 = vpop.permute.xlu1 %2797 }
 0x6eb   : > { %v2816_v7 = vadd.f32 %v2809_v3, %v2808_v42 }
 0x6ec   : > { %v2735_v32 = vadd.f32 %v5005_v63, %v2695_v14  ;;  %v2737_v18 = vadd.f32 %v2725_v24, %v2697_v37  ;;  %v2738_v2 = vadd.f32 %v2729_v23, %v2698_v31  ;;  %v2736_v15 = vadd.f32 %v4901_v35, %v2696_v46 }
 0x6ed   : > { %v2817_v11 = vadd.f32 %v2816_v7, %v2810_v29 }
 0x6ee   : > { %v2747_v13 = vmul.f32 %v2735_v32, %v4810_v6  ;;  %v2748_v36 = vmul.f32 %v4808_v27, %v2736_v15  ;;  %v2749_v56 = vmul.f32 %v2737_v18, %v4814_v34  ;;  %v2750_v17 = vmul.f32 %v4812_v60, %v2738_v2 }
 0x6ef   : > { %v2818_v59 = vadd.f32 %v2817_v11, %v2811_v44 }
 0x6f0   : > { %v2804_v39 = vmul.f32 %v2783_v25, %v2747_v13  ;;  %v2805_v5 = vmul.f32 %v2788_v21, %v2748_v36  ;;  %v2806_v8 = vmul.f32 %v2793_v47, %v2749_v56  ;;  %v2807_v63 = vmul.f32 %v2798_v58, %v2750_v17 }
 0x6f1   : > { %v2819_v24 = vrot.slane %v2818_v59, 4 }
 0x6f2   : > { %v2812_v23 = vadd.f32 %v2804_v39, %v4953_v48  ;;  %v2813_v35 = vadd.f32 %v2805_v5, %v4950_v50  ;;  %v2814_v6 = vadd.f32 %v2806_v8, %v4956_v51  ;;  %v2815_v27 = vadd.f32 %v2807_v63, %v4959_v16  ;;  %v2844_v16 = vpop.permute.xlu0 %2843 }
 0x6f3   : > { %v2820_v34 = vadd.f32 %v2819_v24, %v2818_v59 }
 0x6f4   : > { %v2825_v54 = vadd.f32 %v2813_v35, %v2812_v23 }
 0x6f5   : > { %v2821_v49 = vrot.slane %v2820_v34, 2 }
 0x6f6   : > { %v2826_v60 = vadd.f32 %v2825_v54, %v2814_v6 }
 0x6f7   : > { %v2822_v45 = vadd.f32 %v2821_v49, %v2820_v34 }
 0x6f8   : > { %v2827_v30 = vadd.f32 %v2826_v60, %v2815_v27 }
 0x6f9   : > { %v2823_v10 = vrot.slane %v2822_v45, 1 }
 0x6fa   : > { %v2828_v33 = vrot.slane %v2827_v30, 4 }
 0x6fb   : > { %v2824_v50 = vadd.f32 %v2823_v10, %v2822_v45 }
 0x6fc   : > { %v2829_v25 = vadd.f32 %v2828_v33, %v2827_v30 }
 0x6fe   : > { %v2830_v26 = vrot.slane %v2829_v25, 2 }
 0x700   : > { %v2831_v48 = vadd.f32 %v2830_v26, %v2829_v25 }
 0x702   : > { %v2832_v9 = vrot.slane %v2831_v48, 1 }
 0x704   : > { %v2833_v51 = vadd.f32 %v2832_v9, %v2831_v48 }
 0x706   : > { %v2835_v52 = vsel %vm2834_vm1, %v2824_v50, %v2833_v51 }
 0x707   : > { %v2846_v20 = vadd.f32 %v2844_v16, %v2835_v52 }
 0x709   : > { %2847 = vst [vmem:[%s288_s16] sm:$0x3] %v2846_v20 }
 0x70a   : > { %3670 = shalt.err (!%p3667_p3)
}
 0x70b   : > { %s3671_s25 = scalar_lea.hbm %s5046_s24, 32  ;;  %s3675_s10 = scalar_lea.hbm %s5095_s7, 64 }
 0x70c   : > { %p3672_p4 = scmp.ne.s32.totalorder %s5046_s24, %s3671_s25  ;;  %p3676_p9 = scmp.lt.u32.totalorder %s5046_s24, %s5095_s7 }
 0x70d   : > { %p3677_p10 = scmp.lt.u32.totalorder %s3675_s10, %s3671_s25  ;;  %p3679_p12 = scmp.lt.u32.totalorder %s3671_s25, %s5046_s24 }
 0x70e   : > { %p3673_p7 = pnand %p3672_p4, %p3805_p5 }
 0x70f   : > { %p3678_p11 = por %p3677_p10, %p3676_p9 }
 0x710   : > { %p3674_p8 = pneg %p3673_p7 }
 0x711   : > { %p3680_p13 = por %p3679_p12, %p3678_p11 }
 0x713   : > { %p3681_p0 = pnand %p3680_p13, %p3674_p8 }
 0x715   : > { %3684 = shalt.err (!%p3681_p0)
}
 0x716   : > { %3548 = dma.vmem_to_hbm [thread:$0]  (%p3805_p5), %s5048_s17, 32, %s5046_s24, %s2849_s20  }
 0x717 PF: > { %p3554_p1 = scmp.ge.s32.totalorder %s3719_s29, 2  ;;  %s2874_s16 = sand.u32 1, %s3707_s26  }
 0x718   : > { %s2875_s18 = scalar_lea.sflag [#allocation5], %s2874_s16 }
 0x719   : > { %p3551_p2 = pnand %p3554_p1, %p3809_p6 }
 0x71b   : > { %3702 = dma.done.wait (!%p3551_p2), %s2875_s18, 32  }
 0x71c   : > { %3704 = vsyncadd (!%p3551_p2), %s2875_s18, 4294967264  ;;  %p19_p3 = scmp.ge.s32.totalorder %s3792_s8, 4   ;;  %s5244_s26 = smov %s3711_s27 }
 0x71d   : > { %s5245_s27 = smov %s3715_s28  ;;  %s5246_s28 = smov %s3803_s11 }
 0x71e   : > { %s5247_s29 = smov %s3792_s8  ;;  %21 = sbr.rel (!%p19_p3) target bundleno = 6 (0x6), region = 103 }
 0x725   :  { %2880 = vsyncpa [#allocation5], 1 }
 0x726   :  { %2882 = vsyncpa [#allocation5 + $0x1], 1 }

</bundles_post_ra>
